<compile_context>
chip_gen: v5e
topology: v5e:2x2
jax: 0.10.0
libtpu: 0.0.40
codegen_flags: <defaults>
</compile_context>

<pallas_src>
import functools

import jax
import jax.numpy as jnp
from jax import lax
from jax.experimental import pallas as pl
from jax.experimental.pallas import tpu as pltpu


_CF = 256            # in-kernel chunk width along F (matches v6e/v7x 256x256 MXU)
_F_ALIGN = 2 * _CF   # pad F to a multiple of 512 at weight-prep time


def _round_up(n: int, k: int) -> int:
    return ((n + k - 1) // k) * k


def _vmem_limit_bytes() -> int:
    """Generation-aware scoped-VMEM limit: ~48 MiB on v7x (64 MiB physical),
    96 MiB on v5e/v6e (128 MiB physical)."""
    cap = None
    try:
        info = pltpu.get_tpu_info()
        for name in ("vmem_capacity_bytes", "vmem_size_bytes", "vmem_bytes"):
            v = getattr(info, name, None)
            if v:
                cap = int(v)
                break
    except Exception:
        cap = None
    if not cap:
        cap = 64 * 1024 * 1024          # conservative fallback (v7x per-core VMEM)
    return max(32 * 1024 * 1024, min(cap - 16 * 1024 * 1024, 96 * 1024 * 1024))


def _pick_tiles(T: int, H: int, F_pad: int, dsize: int, budget_bytes: int):
    """Pick (TM, tile_f) so everything fits the VMEM budget.

    Budget model (bytes):
      f32 accumulator scratch        : TM*H*4
      x + out tiles (double-buffered): 2 * 2 * TM*H*dsize
      x value held over the F loop   : TM*H*dsize
      down-proj partial + acc RMW    : 2 * TM*H*4
      g/u/silu chunk temporaries     : 6 * TM*_CF*4
      gate/up/down weight tiles (2x) : 3 * 2 * tile_f*H*dsize
    """
    tm_cap = _round_up(T, 16)
    min_w = 3 * 2 * _CF * H * dsize
    TM = 16
    for tm in (min(1024, tm_cap), 512, 256, 128, 16):
        TM = min(tm, tm_cap)
        fixed = (TM * H * 4
                 + 2 * 2 * TM * H * dsize
                 + TM * H * dsize
                 + 2 * TM * H * 4
                 + 6 * TM * _CF * 4)
        if fixed + min_w <= budget_bytes:
            break
    avail = budget_bytes - fixed
    nf = F_pad // _CF
    tile_f = _CF
    for d in range(nf, 0, -1):
        if nf % d:
            continue
        cand = d * _CF
        if 3 * 2 * cand * H * dsize <= avail:
            tile_f = cand
            break
    return TM, tile_f


def ffn_kernel(x_ref, wg_ref, wu_ref, wd_ref, o_ref, acc_ref, *, num_chunks):
    """Grid = (token tiles, F tiles); F (last grid axis) is the reduction.

    x_ref  : (TM, H)       activation tile (DMA deduped across the F axis)
    wg_ref : (H, tile_f)   gate_proj tile, pre-transposed (K-major)
    wu_ref : (H, tile_f)   up_proj tile,   pre-transposed (K-major)
    wd_ref : (tile_f, H)   down_proj tile, pre-transposed (K-major)
    o_ref  : (TM, H)       output tile, written on the last F step
    acc_ref: (TM, H) f32   accumulator scratch
    """
    j = pl.program_id(1)

    @pl.when(j == 0)
    def _():
        acc_ref[...] = jnp.zeros_like(acc_ref)

    x = x_ref[...]

    def chunk(c, carry):
        off = pl.multiple_of(c * _CF, _CF)
        g = jnp.dot(x, wg_ref[:, pl.ds(off, _CF)], preferred_element_type=jnp.float32)
        u = jnp.dot(x, wu_ref[:, pl.ds(off, _CF)], preferred_element_type=jnp.float32)
        # SiLU(g) * u, kept in f32 (v5e has no bf16 VPU/EUP path).
        h = (g * jax.nn.sigmoid(g)) * u
        acc_ref[...] += jnp.dot(h.astype(wd_ref.dtype), wd_ref[pl.ds(off, _CF), :],
                                preferred_element_type=jnp.float32)
        return carry

    lax.fori_loop(0, num_chunks, chunk, 0)

    @pl.when(j == pl.num_programs(1) - 1)
    def _():
        o_ref[...] = acc_ref[...].astype(o_ref.dtype)


def prepare_ffn_weights(wg, wu, wd, *, compute_dtype=jnp.bfloat16):
    """One-time (load-time) prep of the PyTorch nn.Linear weights.

    gate_proj/up_proj: (F, H) -> (H, F_pad); down_proj: (H, F) -> (F_pad, H).
    F is zero-padded to a multiple of 512; the padding contributes exactly 0.
    """
    F, H = wg.shape
    assert wu.shape == (F, H) and wd.shape == (H, F)
    pad = _round_up(F, _F_ALIGN) - F
    wg_t = jnp.pad(jnp.asarray(wg, compute_dtype), ((0, pad), (0, 0))).T
    wu_t = jnp.pad(jnp.asarray(wu, compute_dtype), ((0, pad), (0, 0))).T
    wd_t = jnp.pad(jnp.asarray(wd, compute_dtype), ((0, 0), (0, pad))).T
    return wg_t, wu_t, wd_t


@functools.partial(jax.jit, static_argnames=("compute_dtype",))
def feed_forward(x, wg_t, wu_t, wd_t, *, compute_dtype=jnp.bfloat16):
    """x: (..., H); wg_t/wu_t: (H, F_pad), wd_t: (F_pad, H) from prepare_ffn_weights."""
    orig_shape = x.shape
    out_dtype = x.dtype
    H = orig_shape[-1]
    F_pad = wg_t.shape[1]
    assert wg_t.shape == (H, F_pad) and wu_t.shape == (H, F_pad) and wd_t.shape == (F_pad, H)
    assert F_pad % _CF == 0 and H % 8 == 0

    x2d = x.reshape(-1, H).astype(compute_dtype)
    T = x2d.shape[0]
    dsize = jnp.dtype(compute_dtype).itemsize

    vmem_limit = int(_vmem_limit_bytes())
    TM, tile_f = _pick_tiles(T, H, F_pad, dsize, vmem_limit - 4 * 1024 * 1024)

    T_pad = _round_up(T, TM)
    if T_pad != T:
        x2d = jnp.pad(x2d, ((0, T_pad - T), (0, 0)))

    grid = (T_pad // TM, F_pad // tile_f)
    num_chunks = tile_f // _CF
    n_token_tiles = grid[0]

    cost = pl.CostEstimate(
        flops=6 * T_pad * H * F_pad,                 # three T*H*F matmuls
        transcendentals=T_pad * F_pad,               # sigmoid
        # Weight blocks are re-streamed once per token tile under this grid.
        bytes_accessed=(n_token_tiles * 3 * H * F_pad + 2 * T_pad * H) * dsize,
    )

    out = pl.pallas_call(
        functools.partial(ffn_kernel, num_chunks=num_chunks),
        out_shape=jax.ShapeDtypeStruct((T_pad, H), out_dtype),
        grid_spec=pltpu.PrefetchScalarGridSpec(
            num_scalar_prefetch=0,
            grid=grid,
            in_specs=[
                pl.BlockSpec((TM, H), lambda i, j: (i, 0)),        # x (held over F)
                pl.BlockSpec((H, tile_f), lambda i, j: (0, j)),    # gate_proj.T tile
                pl.BlockSpec((H, tile_f), lambda i, j: (0, j)),    # up_proj.T tile
                pl.BlockSpec((tile_f, H), lambda i, j: (j, 0)),    # down_proj.T tile
            ],
            out_specs=pl.BlockSpec((TM, H), lambda i, j: (i, 0)),
            scratch_shapes=[pltpu.VMEM((TM, H), jnp.float32)],
        ),
        compiler_params=pltpu.CompilerParams(
            dimension_semantics=("parallel", "arbitrary"),
            vmem_limit_bytes=vmem_limit,
        ),
        cost_estimate=cost,
    )(x2d, wg_t, wu_t, wd_t)

    if T_pad != T:
        out = out[:T]
    return out.reshape(orig_shape)


def feed_forward_ref(x, wg, wu, wd):
    """Pure-JAX f32 reference in the original PyTorch (out, in) weight layout."""
    x = x.astype(jnp.float32)
    wg = wg.astype(jnp.float32)
    wu = wu.astype(jnp.float32)
    wd = wd.astype(jnp.float32)
    g = x @ wg.T
    u = x @ wu.T
    return ((g * jax.nn.sigmoid(g)) * u) @ wd.T


if __name__ == "__main__":
    # Shapes consistent with ModelArgs: hidden_size=896, intermediate_size=4864.
    batch, seq = 2, 8
    H, F = 896, 4864

    key = jax.random.PRNGKey(0)
    kx, kg, ku, kd = jax.random.split(key, 4)

    # Store params in bf16 (as a real deployment would).
    x = jax.random.normal(kx, (batch, seq, H), dtype=jnp.float32).astype(jnp.bfloat16)
    wg = (jax.random.normal(kg, (F, H), dtype=jnp.float32) * (1.0 / H) ** 0.5).astype(jnp.bfloat16)
    wu = (jax.random.normal(ku, (F, H), dtype=jnp.float32) * (1.0 / H) ** 0.5).astype(jnp.bfloat16)
    wd = (jax.random.normal(kd, (H, F), dtype=jnp.float32) * (1.0 / F) ** 0.5).astype(jnp.bfloat16)

    # One-time, load-time weight prep (transpose + F padding); NOT per call.
    wg_t, wu_t, wd_t = prepare_ffn_weights(wg, wu, wd)
    wg_t = jax.block_until_ready(wg_t)
    wu_t = jax.block_until_ready(wu_t)
    wd_t = jax.block_until_ready(wd_t)

    out = feed_forward(x, wg_t, wu_t, wd_t)
    out = jax.block_until_ready(out)

    ref = feed_forward_ref(x, wg, wu, wd)
    assert out.shape == (batch, seq, H)
    assert out.dtype == x.dtype
    assert jnp.allclose(out.astype(jnp.float32), ref, atol=3e-2, rtol=3e-2), \
        "mismatch vs reference"

    print("KERNEL_OK")
</pallas_src>

<mosaic_0001>
module attributes {stable_mosaic.version = 11 : i64} {
  func.func @ffn_kernel(%arg0: i32, %arg1: i32, %arg2: memref<16x896xbf16, #tpu.memory_space<vmem>>, %arg3: memref<896x2560xbf16, #tpu.memory_space<vmem>>, %arg4: memref<896x2560xbf16, #tpu.memory_space<vmem>>, %arg5: memref<2560x896xbf16, #tpu.memory_space<vmem>>, %arg6: memref<16x896xbf16, #tpu.memory_space<vmem>>, %arg7: memref<16x896xf32, #tpu.memory_space<vmem>>) attributes {dimension_semantics = [#tpu.dimension_semantics<parallel>, #tpu.dimension_semantics<arbitrary>], iteration_bounds = array<i64: 1, 2>, scalar_prefetch = 0 : i64, scratch_operands = 1 : i64, tpu.core_type = #tpu.core_type<tc>, window_params = [{transform_indices = @transform_0, window_bounds = array<i64: 16, 896>}, {transform_indices = @transform_1, window_bounds = array<i64: 896, 2560>}, {transform_indices = @transform_2, window_bounds = array<i64: 896, 2560>}, {transform_indices = @transform_3, window_bounds = array<i64: 2560, 896>}, {transform_indices = @transform_4, window_bounds = array<i64: 16, 896>}]} {
    %c0_i32 = arith.constant 0 : i32
    %0 = arith.cmpi eq, %arg1, %c0_i32 : i32
    %1 = arith.extui %0 : i1 to i32
    %c0_i32_0 = arith.constant 0 : i32
    %2 = arith.cmpi ne, %1, %c0_i32_0 : i32
    scf.if %2 {
      %cst = arith.constant 0.000000e+00 : f32
      %8 = vector.broadcast %cst : f32 to vector<16x896xf32>
      %c0_6 = arith.constant 0 : index
      %c0_7 = arith.constant 0 : index
      %9 = vector.load %arg7[%c0_6, %c0_7] : memref<16x896xf32, #tpu.memory_space<vmem>>, vector<16x896xf32>
      tpu.vector_store %arg7[%c0_6, %c0_7], %8 {strides = array<i32>} : memref<16x896xf32, #tpu.memory_space<vmem>>, vector<16x896xf32>,
    } else {
    }
    %c0 = arith.constant 0 : index
    %c0_1 = arith.constant 0 : index
    %3 = vector.load %arg2[%c0, %c0_1] : memref<16x896xbf16, #tpu.memory_space<vmem>>, vector<16x896xbf16>
    %c0_i32_2 = arith.constant 0 : i32
    %c10_i32 = arith.constant 10 : i32
    %4 = arith.addi %c0_i32_2, %c10_i32 : i32
    %c1_i32 = arith.constant 1 : i32
    scf.for %arg8 = %c0_i32_2 to %4 step %c1_i32  : i32 {
      %c256_i32 = arith.constant 256 : i32
      %8 = arith.muli %arg8, %c256_i32 : i32
      %9 = tpu.assume_multiple %8, 256 : i32
      %c0_6 = arith.constant 0 : index
      %10 = arith.index_cast %9 : i32 to index
      %11 = vector.load %arg3[%c0_6, %10] : memref<896x2560xbf16, #tpu.memory_space<vmem>>, vector<896x256xbf16>
      %cst = arith.constant dense<0.000000e+00> : vector<16x256xf32>
      %12 = tpu.matmul %3, %11, %cst {dimension_numbers = #tpu.dot_dimension_numbers<[1], [0], [0], [1], [0, 0, 1, 1], [], []>} : vector<16x896xbf16>, vector<896x256xbf16>, vector<16x256xf32> -> vector<16x256xf32>
      %c0_7 = arith.constant 0 : index
      %13 = arith.index_cast %9 : i32 to index
      %14 = vector.load %arg4[%c0_7, %13] : memref<896x2560xbf16, #tpu.memory_space<vmem>>, vector<896x256xbf16>
      %cst_8 = arith.constant dense<0.000000e+00> : vector<16x256xf32>
      %15 = tpu.matmul %3, %14, %cst_8 {dimension_numbers = #tpu.dot_dimension_numbers<[1], [0], [0], [1], [0, 0, 1, 1], [], []>} : vector<16x896xbf16>, vector<896x256xbf16>, vector<16x256xf32> -> vector<16x256xf32>
      %16 = arith.negf %12 : vector<16x256xf32>
      %17 = math.exp %16 : vector<16x256xf32>
      %cst_9 = arith.constant 1.000000e+00 : f32
      %18 = vector.broadcast %cst_9 : f32 to vector<16x256xf32>
      %19 = arith.addf %18, %17 : vector<16x256xf32>
      %20 = arith.divf %18, %19 : vector<16x256xf32>
      %21 = arith.mulf %12, %20 : vector<16x256xf32>
      %22 = arith.mulf %21, %15 : vector<16x256xf32>
      %c0_10 = arith.constant 0 : index
      %c0_11 = arith.constant 0 : index
      %23 = vector.load %arg7[%c0_10, %c0_11] : memref<16x896xf32, #tpu.memory_space<vmem>>, vector<16x896xf32>
      %24 = arith.truncf %22 : vector<16x256xf32> to vector<16x256xbf16>
      %25 = arith.index_cast %9 : i32 to index
      %c0_12 = arith.constant 0 : index
      %26 = vector.load %arg5[%25, %c0_12] : memref<2560x896xbf16, #tpu.memory_space<vmem>>, vector<256x896xbf16>
      %cst_13 = arith.constant dense<0.000000e+00> : vector<16x896xf32>
      %27 = tpu.matmul %24, %26, %cst_13 {dimension_numbers = #tpu.dot_dimension_numbers<[1], [0], [0], [1], [0, 0, 1, 1], [], []>} : vector<16x256xbf16>, vector<256x896xbf16>, vector<16x896xf32> -> vector<16x896xf32>
      %28 = arith.addf %23, %27 : vector<16x896xf32>
      %c0_14 = arith.constant 0 : index
      %c0_15 = arith.constant 0 : index
      %29 = vector.load %arg7[%c0_14, %c0_15] : memref<16x896xf32, #tpu.memory_space<vmem>>, vector<16x896xf32>
      tpu.vector_store %arg7[%c0_14, %c0_15], %28 {strides = array<i32>} : memref<16x896xf32, #tpu.memory_space<vmem>>, vector<16x896xf32>,
    }
    %c10_i32_3 = arith.constant 10 : i32
    %c1_i32_4 = arith.constant 1 : i32
    %5 = arith.cmpi eq, %arg1, %c1_i32_4 : i32
    %6 = arith.extui %5 : i1 to i32
    %c0_i32_5 = arith.constant 0 : i32
    %7 = arith.cmpi ne, %6, %c0_i32_5 : i32
    scf.if %7 {
      %c0_6 = arith.constant 0 : index
      %c0_7 = arith.constant 0 : index
      %8 = vector.load %arg7[%c0_6, %c0_7] : memref<16x896xf32, #tpu.memory_space<vmem>>, vector<16x896xf32>
      %9 = arith.truncf %8 : vector<16x896xf32> to vector<16x896xbf16>
      %c0_8 = arith.constant 0 : index
      %c0_9 = arith.constant 0 : index
      %10 = vector.load %arg6[%c0_8, %c0_9] : memref<16x896xbf16, #tpu.memory_space<vmem>>, vector<16x896xbf16>
      tpu.vector_store %arg6[%c0_8, %c0_9], %9 {strides = array<i32>} : memref<16x896xbf16, #tpu.memory_space<vmem>>, vector<16x896xbf16>,
    } else {
    }
    return
  }
  func.func @transform_0(%arg0: i32, %arg1: i32) -> (i32, i32) {
    %c0_i32 = arith.constant 0 : i32
    %c0_i32_0 = arith.constant 0 : i32
    return %arg0, %c0_i32 : i32, i32
  }
  func.func @transform_1(%arg0: i32, %arg1: i32) -> (i32, i32) {
    %c0_i32 = arith.constant 0 : i32
    %c0_i32_0 = arith.constant 0 : i32
    return %c0_i32, %arg1 : i32, i32
  }
  func.func @transform_2(%arg0: i32, %arg1: i32) -> (i32, i32) {
    %c0_i32 = arith.constant 0 : i32
    %c0_i32_0 = arith.constant 0 : i32
    return %c0_i32, %arg1 : i32, i32
  }
  func.func @transform_3(%arg0: i32, %arg1: i32) -> (i32, i32) {
    %c0_i32 = arith.constant 0 : i32
    %c0_i32_0 = arith.constant 0 : i32
    return %arg1, %c0_i32 : i32, i32
  }
  func.func @transform_4(%arg0: i32, %arg1: i32) -> (i32, i32) {
    %c0_i32 = arith.constant 0 : i32
    %c0_i32_0 = arith.constant 0 : i32
    return %arg0, %c0_i32 : i32, i32
  }
}

</mosaic_0001>

<bundles_post_ra>
// kernel: feed_forward.1
= control target key start
LH: loop header
LB: loop body
LE: loop exit
PB: predicated region body
PF: predicated region fallthrough
CT: control target
= control target key end

     0   :  { %s6597_s0 = inlined_call_operand.hbm [shape: bf16[16,896], index: 0, kind: input, shape index: {}]   ;;  %s6598_s1 = inlined_call_operand.hbm [shape: bf16[896,5120], index: 1, kind: input, shape index: {}]   ;;  %s6599_s2 = inlined_call_operand.hbm [shape: bf16[896,5120], index: 2, kind: input, shape index: {}]   ;;  %s6600_s3 = inlined_call_operand.hbm [shape: bf16[5120,896], index: 3, kind: input, shape index: {}]   ;;  %s6601_s4 = inlined_call_operand.hbm [shape: bf16[16,896], index: 4, kind: output, shape index: {}]  }
   0x1   :  { %6606 = sst [smem:[#allocation18_spill]] %s6597_s0 }
   0x2   :  { %6607 = sst [smem:[#allocation19_spill]] %s6598_s1 }
   0x3   :  { %9 = vsyncpa [#allocation4], 0 }
   0x4   :  { %10 = vsyncpa [#allocation7], 0 }
   0x5   :  { %12 = vsyncpa [#allocation7 + $0x1], 0 }
   0x6   :  { %13 = vsyncpa [#allocation10], 0 }
   0x7   :  { %15 = vsyncpa [#allocation10 + $0x1], 0 }
   0x8   :  { %16 = vsyncpa [#allocation5], 0  ;;  %s5475_s15 = smov 0   ;;  %s5477_s16 = smov 0  }
   0x9   :  { %s5479_s17 = smov 0   ;;  %s5481_s18 = smov 0  }
   0xa   :  { %s5483_s19 = smov 0   ;;  %s5485_s20 = smov 0  }
   0xb LB: > { %s31_s21 = sadd.s32 1, %s5430_s19  ;;  %s67_s22 = sadd.s32 1, %s5422_s17  ;;  %s5434_s20 = sphi %s5485_s20, %s22_s20   ;;  %s5430_s19 = sphi %s5483_s19, %s6632_s19   ;;  %s5426_s18 = sphi %s5481_s18, %s6631_s18   ;;  %s5422_s17 = sphi %s5479_s17, %s6630_s17   ;;  %s5418_s16 = sphi %s5477_s16, %s6629_s16   ;;  %s5414_s15 = sphi %s5475_s15, %s6628_s15  }
   0xc   : > { %p32_p0 = scmp.ge.s32.totalorder %s31_s21, 2  ;;  %p74_p1 = scmp.ne.s32.totalorder %s5422_s17, %s5418_s16 }
   0xd   : > { %p75_p2 = scmp.eq.s32.totalorder %s5434_s20, 0  ;;  %p5133_p4 = scmp.lt.s32.totalorder %s5434_s20, 2 }
   0xe   : > { %s6634_s21 = smov (%p32_p0, %s31_s21), 0  ;;  %s200_s24 = sand.u32 1, %s5434_s20  }
   0xf   : > { %6608 = sst [smem:[#allocation16_spill]] %s6634_s21  ;;  %p76_p3 = por %p75_p2, %p74_p1 }
  0x10   : > { %s64_s23 = ssub.s32 %s5430_s19, %s6634_s21  ;;  %s6602_s25 = sand.u32 1, %s5422_s17  }
  0x11   : > { %p65_p5 = scmp.eq.s32.totalorder %s64_s23, 0  ;;  %s4753_s26 = smul.u32 80, %s5430_s19 }
  0x12   : > { %s5523_s28 = smul.u32 8960, %s6602_s25  ;;  %s6610_s1 = sld [smem:[#allocation19_spill]] }
  0x13   : > { %s5519_s27 = scalar_select %p65_p5, %s5422_s17, %s67_s22  }
  0x14   : > { %p5530_p6 = pnand %p5133_p4, %p76_p3  ;;  %s204_s8 = scalar_lea.vmem [#allocation6], %s5523_s28 }
  0x15   : > { %6609 = sst [smem:[#allocation17_spill]] %s5519_s27  ;;  %s212_s9 = sshll.u32 %s204_s8, 4  ;;  %s213_s9 = int_to_ptr.vmem [resolvable:$true] %s212_s9 }
  0x16   : > { %s5535_s10 = scalar_lea.sflag [#allocation7], %s200_s24  ;;  %s6603_s11 = smov 2560  }
  0x17   : > { %s6604_s12 = smov 1280   ;;  %s5442_s13 = smov 80  }
  0x18   : > { %s209_s5 = scalar_lea.hbm %s6610_s1, %s4753_s26  ;;  %s5544_s14 = sadd.s32 4294967295, %s5434_s20  }
  0x19   : > { %s210_s6 = sshll.u32 %s209_s5, 4  ;;  %p80_p7 = scmp.ne.s32.totalorder %s5418_s16, %s5414_s15  ;;  %s211_s6 = int_to_ptr.hbm [resolvable:$true] %s210_s6 }
  0x1a   : > { %5125 = dma.hbm_to_vmem [thread:$0]  (!%p5530_p6), %s211_s6, 143360, %s213_s9, %s5535_s10, %s6603_s11, %s6604_s12, %s5442_s13  }
  0x1b   : > { %p81_p8 = scmp.eq.s32.totalorder %s5544_s14, 0  ;;  %p3359_p9 = scmp.ge.s32.totalorder %s5434_s20, 1 }
  0x1c   : > { %p169_p10 = scmp.lt.s32.totalorder %s5434_s20, 3  ;;  %s6614_s0 = sld [smem:[#allocation18_spill]] }
  0x1d   : > { %p5553_p11 = por %p81_p8, %p80_p7  ;;  %s5443_s15 = smov [#allocation3]  }
  0x1e   : > { %p5557_p12 = pnand %p3359_p9, %p169_p10  ;;  %s186_s5 = sshll.u32 %s5443_s15, 4  ;;  %s187_s5 = int_to_ptr.vmem [resolvable:$true] %s186_s5 }
  0x1f   : > { %s231_s9 = scalar_lea.hbm %s6599_s2, %s4753_s26  ;;  %s5444_s29 = smov 448  }
  0x20   : > { %p5118_p13 = pneg %p5557_p12  ;;  %s232_s24 = sshll.u32 %s231_s9, 4  ;;  %s233_s24 = int_to_ptr.hbm [resolvable:$true] %s232_s24 }
  0x21   : > { %s5445_s25 = smov 28   ;;  %s226_s11 = scalar_lea.vmem [#allocation8], %s5523_s28 }
  0x22   : > { %s184_s30 = sshll.u32 %s6614_s0, 4  ;;  %p5119_p0 = pnand %p5118_p13, %p81_p8  ;;  %s185_s30 = int_to_ptr.hbm [resolvable:$true] %s184_s30 }
  0x23   : > { %s234_s12 = sshll.u32 %s226_s11, 4  ;;  %s6615_s15 = smov 1280   ;;  %s235_s12 = int_to_ptr.vmem [resolvable:$true] %s234_s12 }
  0x24   : > { %5121 = dma.hbm_to_vmem [thread:$0]  (!%p5119_p0), %s185_s30, 896, %s187_s5, [#allocation4], %s5444_s29, %s5444_s29, %s5445_s25  }
  0x25   : > { %s6616_s0 = smov 2560   ;;  %s5134_s1 = smul.u32 8960, %s5430_s19 }
  0x26   : > { %5128 = dma.hbm_to_vmem [thread:$0]  (!%p5530_p6), %s233_s24, 143360, %s235_s12, %s5535_s10, %s6616_s0, %s6615_s15, %s5442_s13  }
  0x27   : > { %s248_s21 = scalar_lea.vmem [#allocation9], %s5523_s28  ;;  %s254_s8 = scalar_lea.hbm %s6600_s3, %s5134_s1 }
  0x28   : > { %s257_s27 = sshll.u32 %s248_s21, 4  ;;  %s255_s9 = sshll.u32 %s254_s8, 4  ;;  %s258_s27 = int_to_ptr.vmem [resolvable:$true] %s257_s27  ;;  %s256_s9 = int_to_ptr.hbm [resolvable:$true] %s255_s9 }
  0x29   : > { %s6617_s30 = sand.u32 1, %s5422_s17   ;;  %269 = sbr.rel (%p5557_p12) target bundleno = 687 (0x2af), region = 36 }
  0x2a   : > { %s245_s5 = scalar_lea.sflag [#allocation10], %s6617_s30 }
  0x2b   : > { %5131 = dma.hbm_to_vmem [thread:$0]  (!%p5530_p6), %s256_s9, 143360, %s258_s27, %s245_s5, %s5444_s29, %s5444_s29, %s5445_s25  }
  0x2e   : > { %5397 = dma.done.wait (%p81_p8), [#allocation4], 896  }
  0x2f   : > { %5399 = vsyncadd (%p81_p8), [#allocation4], 4294966400  ;;  %s276_s0 = sand.u32 1, %s5544_s14   ;;  %s278_s1 = sand.u32 1, %s5418_s16  }
  0x30   : > { %s5597_s21 = smul.u32 8960, %s278_s1  ;;  %s277_s28 = scalar_lea.sflag [#allocation7], %s276_s0 }
  0x32   : > { %s280_s7 = scalar_lea.vmem [#allocation6], %s5597_s21 }
  0x33   : > { %5401 = dma.done.wait (%p5553_p11), %s277_s28, 286720  }
  0x34   : > { %5403 = vsyncadd (%p5553_p11), %s277_s28, 4294680576  ;;  %s290_s25 = scalar_lea.vmem [#allocation8], %s5597_s21  ;;  %s297_s27 = scalar_lea.sflag [#allocation10], %s278_s1 }
  0x35   : > { %s300_s10 = scalar_lea.vmem [#allocation9], %s5597_s21 }
  0x36   : > { %5405 = dma.done.wait (%p5553_p11), %s297_s27, 143360  }
  0x37   : > { %5407 = vsyncadd (%p5553_p11), %s297_s27, 4294823936  ;;  %p3367_p1 = scmp.ne.s32.totalorder %s5426_s18, 0 }
  0x39   : > { %339 = sbr.rel (%p3367_p1) target bundleno = 77 (0x4d), region = 56 }
  0x3e   : > { %v5446_v0 = vmov 0.0  }
  0x3f   : > { %340 = vst [vmem:[#allocation2 + $0x30] sm:$0xff] %v5446_v0 }
  0x40   : > { %341 = vst [vmem:[#allocation2] sm:$0xff] %v5446_v0 }
  0x41   : > { %342 = vst [vmem:[#allocation2 + $0x58] sm:$0xff] %v5446_v0 }
  0x42   : > { %343 = vst [vmem:[#allocation2 + $0x18] sm:$0xff] %v5446_v0 }
  0x43   : > { %344 = vst [vmem:[#allocation2 + $0x50] sm:$0xff] %v5446_v0 }
  0x44   : > { %345 = vst [vmem:[#allocation2 + $0x68] sm:$0xff] %v5446_v0 }
  0x45   : > { %346 = vst [vmem:[#allocation2 + $0x8] sm:$0xff] %v5446_v0 }
  0x46   : > { %347 = vst [vmem:[#allocation2 + $0x48] sm:$0xff] %v5446_v0 }
  0x47   : > { %348 = vst [vmem:[#allocation2 + $0x40] sm:$0xff] %v5446_v0 }
  0x48   : > { %349 = vst [vmem:[#allocation2 + $0x20] sm:$0xff] %v5446_v0 }
  0x49   : > { %350 = vst [vmem:[#allocation2 + $0x10] sm:$0xff] %v5446_v0 }
  0x4a   : > { %351 = vst [vmem:[#allocation2 + $0x38] sm:$0xff] %v5446_v0 }
  0x4b   : > { %352 = vst [vmem:[#allocation2 + $0x60] sm:$0xff] %v5446_v0 }
  0x4c   : > { %353 = vst [vmem:[#allocation2 + $0x28] sm:$0xff] %v5446_v0 }
  0x4d PF: > { %v5611_v1 = vld [vmem:[#allocation3 + $0x4] sm:$0xf]  ;;  %v5613_v2 = vld [vmem:[#allocation3] sm:$0xf]  ;;  %v5615_v3 = vld [vmem:[#allocation3 + $0xc] sm:$0xf] }
  0x4e   : > { %v5617_v4 = vld [vmem:[#allocation3 + $0x8] sm:$0xf]  ;;  %v5619_v5 = vld [vmem:[#allocation3 + $0x14] sm:$0xf]  ;;  %v5621_v6 = vld [vmem:[#allocation3 + $0x10] sm:$0xf] }
  0x4f   : > { %v5623_v7 = vld [vmem:[#allocation3 + $0x18] sm:$0xf]  ;;  %v5625_v8 = vld [vmem:[#allocation3 + $0x1c] sm:$0xf0]  ;;  %v5627_v9 = vld [vmem:[#allocation3 + $0x18] sm:$0xf0] }
  0x50   : > { %v5629_v10 = vld [vmem:[#allocation3 + $0x24] sm:$0xf0]  ;;  %v5631_v11 = vld [vmem:[#allocation3 + $0x20] sm:$0xf0]  ;;  %v5633_v12 = vld [vmem:[#allocation3 + $0x2c] sm:$0xf0] }
  0x51   : > { %v5635_v13 = vld [vmem:[#allocation3 + $0x28] sm:$0xf0]  ;;  %v5637_v14 = vld [vmem:[#allocation3 + $0x30] sm:$0xf0]  ;;  %s5639_s11 = smov 0  }
  0x52 LB: >> { %s3368_s12 = sshll.u32 %s5438_s11, 8  ;;  %s367_s11 = sadd.s32 1, %s5438_s11   ;;  %s5438_s11 = sphi %s5639_s11, %s367_s11  }
  0x53   : >> { %s5647_s13 = sshra.s32 %s3368_s12, 7  ;;  %s2247_s29 = sshra.s32 %s3368_s12, 3 }
  0x54   : >> { %s3369_s22 = sshll.u32 %s5647_s13, 2  ;;  %s4986_s15 = smul.u32 28, %s2247_s29 }
  0x55   : >> { %s5654_s23 = scalar_lea.vmem %s280_s7, %s3369_s22 [#allocation6]  ;;  %s5882_s24 = scalar_lea.vmem %s290_s25, %s3369_s22 [#allocation8] }
  0x56   : >> { %v3456_v15 = vld [vmem:[%s5654_s23 + $0x460] sm:$0xf]  ;;  %v4777_v16 = vld [vmem:[%s5654_s23 + $0x4ac] sm:$0xf0]  ;;  %s6170_s6 = scalar_lea.vmem %s300_s10, %s4986_s15 [#allocation9]  ;;  %p364_p2 = scmp.ge.s32.totalorder %s367_s11, 10  }
  0x57   : >> { %v3520_v17 = vld [vmem:[%s5654_s23 + $0x960] sm:$0xf]  ;;  %v3457_v18 = vor.u32 %v4777_v16, %v3456_v15  ;;  %v4793_v19 = vld [vmem:[%s5654_s23 + $0x9ac] sm:$0xf0]  ;;  %p4748_p3 = scmp.ne.s32.totalorder (%p364_p2), %s5426_s18, 1 }
  0x58   : >> { %v3584_v20 = vld [vmem:[%s5654_s23 + $0xe60] sm:$0xf]  ;;  %v4809_v21 = vld [vmem:[%s5654_s23 + $0xeac] sm:$0xf0]  ;;  %v3521_v22 = vor.u32 %v4793_v19, %v3520_v17 }
  0x59   : >> { %v3585_v23 = vor.u32 %v4809_v21, %v3584_v20  ;;  %v3648_v24 = vld [vmem:[%s5654_s23 + $0x1360] sm:$0xf]  ;;  %v4825_v25 = vld [vmem:[%s5654_s23 + $0x13ac] sm:$0xf0]  ;;  %1081 = vmatpush.bf16.msra.mxu0 %v3457_v18 }
  0x5a   : >> { %v3448_v26 = vld [vmem:[%s5654_s23 + $0x3c0] sm:$0xf]  ;;  %v3649_v27 = vor.u32 %v4825_v25, %v3648_v24  ;;  %v4775_v28 = vld [vmem:[%s5654_s23 + $0x40c] sm:$0xf0]  ;;  %1095 = vmatpush.bf16.msra.mxu1 %v3521_v22 }
  0x5b   : >> { %v3512_v29 = vld [vmem:[%s5654_s23 + $0x8c0] sm:$0xf]  ;;  %v4791_v30 = vld [vmem:[%s5654_s23 + $0x90c] sm:$0xf0]  ;;  %1109 = vmatpush.bf16.msra.mxu2 %v3585_v23  ;;  %v3449_v31 = vor.u32 %v4775_v28, %v3448_v26 }
  0x5c   : >> { %v3513_v32 = vor.u32 %v4791_v30, %v3512_v29  ;;  %v3576_v33 = vld [vmem:[%s5654_s23 + $0xdc0] sm:$0xf]  ;;  %v4807_v34 = vld [vmem:[%s5654_s23 + $0xe0c] sm:$0xf0]  ;;  %1123 = vmatpush.bf16.msra.mxu3 %v3649_v27 }
  0x5d   : >> { %v3640_v35 = vld [vmem:[%s5654_s23 + $0x12c0] sm:$0xf]  ;;  %v3577_v36 = vor.u32 %v4807_v34, %v3576_v33  ;;  %v4823_v37 = vld [vmem:[%s5654_s23 + $0x130c] sm:$0xf0]  ;;  %1082 = vmatpush.bf16.msra.mxu0 %v3449_v31 }
  0x5e   : >> { %v3440_v38 = vld [vmem:[%s5654_s23 + $0x320] sm:$0xf]  ;;  %v4773_v39 = vld [vmem:[%s5654_s23 + $0x36c] sm:$0xf0]  ;;  %v3641_v40 = vor.u32 %v4823_v37, %v3640_v35  ;;  %1096 = vmatpush.bf16.msra.mxu1 %v3513_v32 }
  0x5f   : >> { %v3504_v41 = vld [vmem:[%s5654_s23 + $0x820] sm:$0xf]  ;;  %v4789_v42 = vld [vmem:[%s5654_s23 + $0x86c] sm:$0xf0]  ;;  %v3441_v44 = vor.u32 %v4773_v39, %v3440_v38  ;;  %1110 = vmatpush.bf16.msra.mxu2 %v3577_v36 }
  0x60   : >> { %v3568_v43 = vld [vmem:[%s5654_s23 + $0xd20] sm:$0xf]  ;;  %v4805_v45 = vld [vmem:[%s5654_s23 + $0xd6c] sm:$0xf0]  ;;  %v3505_v48 = vor.u32 %v4789_v42, %v3504_v41  ;;  %1124 = vmatpush.bf16.msra.mxu3 %v3641_v40 }
  0x61   : >> { %v3632_v46 = vld [vmem:[%s5654_s23 + $0x1220] sm:$0xf]  ;;  %v4821_v47 = vld [vmem:[%s5654_s23 + $0x126c] sm:$0xf0]  ;;  %v3569_v49 = vor.u32 %v4805_v45, %v3568_v43  ;;  %1083 = vmatpush.bf16.msra.mxu0 %v3441_v44 }
  0x62   : >> { %v3432_v50 = vld [vmem:[%s5654_s23 + $0x280] sm:$0xf]  ;;  %v4771_v51 = vld [vmem:[%s5654_s23 + $0x2cc] sm:$0xf0]  ;;  %v3633_v53 = vor.u32 %v4821_v47, %v3632_v46  ;;  %1097 = vmatpush.bf16.msra.mxu1 %v3505_v48 }
  0x63   : >> { %v3496_v52 = vld [vmem:[%s5654_s23 + $0x780] sm:$0xf]  ;;  %v4787_v54 = vld [vmem:[%s5654_s23 + $0x7cc] sm:$0xf0]  ;;  %v3433_v59 = vor.u32 %v4771_v51, %v3432_v50  ;;  %1111 = vmatpush.bf16.msra.mxu2 %v3569_v49 }
  0x64   : >> { %v3560_v55 = vld [vmem:[%s5654_s23 + $0xc80] sm:$0xf]  ;;  %v4803_v56 = vld [vmem:[%s5654_s23 + $0xccc] sm:$0xf0]  ;;  %v3497_v60 = vor.u32 %v4787_v54, %v3496_v52  ;;  %1125 = vmatpush.bf16.msra.mxu3 %v3633_v53 }
  0x65   : >> { %v3624_v57 = vld [vmem:[%s5654_s23 + $0x1180] sm:$0xf]  ;;  %v4819_v58 = vld [vmem:[%s5654_s23 + $0x11cc] sm:$0xf0]  ;;  %v3561_v61 = vor.u32 %v4803_v56, %v3560_v55  ;;  %1084 = vmatpush.bf16.msra.mxu0 %v3433_v59 }
  0x66   : >> { %v3424_v62 = vld [vmem:[%s5654_s23 + $0x1e0] sm:$0xf]  ;;  %v4769_v63 = vld [vmem:[%s5654_s23 + $0x22c] sm:$0xf0]  ;;  %v3625_v15 = vor.u32 %v4819_v58, %v3624_v57  ;;  %1098 = vmatpush.bf16.msra.mxu1 %v3497_v60 }
  0x67   : >> { %v3488_v0 = vld [vmem:[%s5654_s23 + $0x6e0] sm:$0xf]  ;;  %v4785_v16 = vld [vmem:[%s5654_s23 + $0x72c] sm:$0xf0]  ;;  %v3425_v21 = vor.u32 %v4769_v63, %v3424_v62  ;;  %1112 = vmatpush.bf16.msra.mxu2 %v3561_v61 }
  0x68   : >> { %v3552_v17 = vld [vmem:[%s5654_s23 + $0xbe0] sm:$0xf]  ;;  %v4801_v18 = vld [vmem:[%s5654_s23 + $0xc2c] sm:$0xf0]  ;;  %v3489_v22 = vor.u32 %v4785_v16, %v3488_v0  ;;  %1126 = vmatpush.bf16.msra.mxu3 %v3625_v15  ;;  %v4776_v16 = vld [vmem:[%s5654_s23 + $0x464] sm:$0xf] }
  0x69   : >> { %v3616_v19 = vld [vmem:[%s5654_s23 + $0x10e0] sm:$0xf]  ;;  %v4817_v20 = vld [vmem:[%s5654_s23 + $0x112c] sm:$0xf0]  ;;  %v3553_v23 = vor.u32 %v4801_v18, %v3552_v17  ;;  %1085 = vmatpush.bf16.msra.mxu0 %v3425_v21  ;;  %v3458_v17 = vld [vmem:[%s5654_s23 + $0x4b0] sm:$0xf0] }
  0x6a   : >> { %v3416_v24 = vld [vmem:[%s5654_s23 + $0x140] sm:$0xf]  ;;  %v4767_v25 = vld [vmem:[%s5654_s23 + $0x18c] sm:$0xf0]  ;;  %v3617_v27 = vor.u32 %v4817_v20, %v3616_v19  ;;  %1099 = vmatpush.bf16.msra.mxu1 %v3489_v22 }
  0x6b   : >> { %v3480_v26 = vld [vmem:[%s5654_s23 + $0x640] sm:$0xf]  ;;  %v4783_v28 = vld [vmem:[%s5654_s23 + $0x68c] sm:$0xf0]  ;;  %v3417_v33 = vor.u32 %v4767_v25, %v3416_v24  ;;  %1113 = vmatpush.bf16.msra.mxu2 %v3553_v23  ;;  %v3461_v25 = vor.u32 %v4776_v16, %v3458_v17 }
  0x6c   : >> { %v3544_v29 = vld [vmem:[%s5654_s23 + $0xb40] sm:$0xf]  ;;  %v4799_v30 = vld [vmem:[%s5654_s23 + $0xb8c] sm:$0xf0]  ;;  %v3481_v34 = vor.u32 %v4783_v28, %v3480_v26  ;;  %1127 = vmatpush.bf16.msra.mxu3 %v3617_v27 }
  0x6d   : >> { %v3608_v31 = vld [vmem:[%s5654_s23 + $0x1040] sm:$0xf]  ;;  %v4815_v32 = vld [vmem:[%s5654_s23 + $0x108c] sm:$0xf0]  ;;  %v3545_v35 = vor.u32 %v4799_v30, %v3544_v29  ;;  %1086 = vmatpush.bf16.msra.mxu0 %v3417_v33  ;;  %v5736_v29 = vor.u32 %v5627_v9, %v5613_v2  ;;  %v4774_v30 = vld [vmem:[%s5654_s23 + $0x3c4] sm:$0xf]  ;;  %v5746_v33 = vor.u32 %v5611_v1, %v5625_v8 }
  0x6e   : >> { %v3408_v36 = vld [vmem:[%s5654_s23 + $0xa0] sm:$0xf]  ;;  %v4765_v37 = vld [vmem:[%s5654_s23 + $0xec] sm:$0xf0]  ;;  %v3609_v39 = vor.u32 %v4815_v32, %v3608_v31  ;;  %1100 = vmatpush.bf16.msra.mxu1 %v3481_v34  ;;  %v3450_v31 = vld [vmem:[%s5654_s23 + $0x410] sm:$0xf0]  ;;  %v5742_v32 = vor.u32 %v5631_v11, %v5617_v4 }
  0x6f   : >> { %v3472_v38 = vld [vmem:[%s5654_s23 + $0x5a0] sm:$0xf]  ;;  %v4781_v40 = vld [vmem:[%s5654_s23 + $0x5ec] sm:$0xf0]  ;;  %v3409_v45 = vor.u32 %v4765_v37, %v3408_v36  ;;  %1114 = vmatpush.bf16.msra.mxu2 %v3545_v35  ;;  %v5750_v35 = vor.u32 %v5615_v3, %v5629_v10 }
  0x70   : >> { %v3536_v41 = vld [vmem:[%s5654_s23 + $0xaa0] sm:$0xf]  ;;  %v4797_v42 = vld [vmem:[%s5654_s23 + $0xaec] sm:$0xf0]  ;;  %v3473_v48 = vor.u32 %v4781_v40, %v3472_v38  ;;  %1128 = vmatpush.bf16.msra.mxu3 %v3609_v39 }
  0x71   : >> { %v3600_v43 = vld [vmem:[%s5654_s23 + $0xfa0] sm:$0xf]  ;;  %v4813_v44 = vld [vmem:[%s5654_s23 + $0xfec] sm:$0xf0]  ;;  %v3537_v49 = vor.u32 %v4797_v42, %v3536_v41  ;;  %1087 = vmatpush.bf16.msra.mxu0 %v3409_v45  ;;  %v3453_v41 = vor.u32 %v4774_v30, %v3450_v31  ;;  %v4772_v45 = vld [vmem:[%s5654_s23 + $0x324] sm:$0xf] }
  0x72   : >> { %v3400_v46 = vld [vmem:[%s5654_s23] sm:$0xf]  ;;  %v4763_v47 = vld [vmem:[%s5654_s23 + $0x4c] sm:$0xf0]  ;;  %v3601_v53 = vor.u32 %v4813_v44, %v3600_v43  ;;  %1101 = vmatpush.bf16.msra.mxu1 %v3473_v48 }
  0x73   : >> { %v3464_v50 = vld [vmem:[%s5654_s23 + $0x500] sm:$0xf]  ;;  %v4779_v51 = vld [vmem:[%s5654_s23 + $0x54c] sm:$0xf0]  ;;  %v3401_v60 = vor.u32 %v4763_v47, %v3400_v46  ;;  %1115 = vmatpush.bf16.msra.mxu2 %v3537_v49  ;;  %v3442_v46 = vld [vmem:[%s5654_s23 + $0x370] sm:$0xf0] }
  0x74   : >> { %v3528_v52 = vld [vmem:[%s5654_s23 + $0xa00] sm:$0xf]  ;;  %v4795_v54 = vld [vmem:[%s5654_s23 + $0xa4c] sm:$0xf0]  ;;  %v3465_v0 = vor.u32 %v4779_v51, %v3464_v50  ;;  %1129 = vmatpush.bf16.msra.mxu3 %v3601_v53  ;;  %v3445_v53 = vor.u32 %v4772_v45, %v3442_v46 }
  0x75   : >> { %v3592_v55 = vld [vmem:[%s5654_s23 + $0xf00] sm:$0xf]  ;;  %v4811_v56 = vld [vmem:[%s5654_s23 + $0xf4c] sm:$0xf0]  ;;  %v3529_v15 = vor.u32 %v4795_v54, %v3528_v52  ;;  %1088 = vmatpush.bf16.msra.mxu0 %v3401_v60 }
  0x76   : >> { %v3712_v57 = vld [vmem:[%s5654_s23 + $0x1860] sm:$0xf]  ;;  %v4841_v58 = vld [vmem:[%s5654_s23 + $0x18ac] sm:$0xf0]  ;;  %v3593_v18 = vor.u32 %v4811_v56, %v3592_v55  ;;  %1102 = vmatpush.bf16.msra.mxu1 %v3465_v0 }
  0x77   : >> { %v3776_v59 = vld [vmem:[%s5654_s23 + $0x1d60] sm:$0xf]  ;;  %v4857_v61 = vld [vmem:[%s5654_s23 + $0x1dac] sm:$0xf0]  ;;  %v3713_v19 = vor.u32 %v4841_v58, %v3712_v57  ;;  %1116 = vmatpush.bf16.msra.mxu2 %v3529_v15  ;;  %v4770_v57 = vld [vmem:[%s5654_s23 + $0x284] sm:$0xf] }
  0x78   : >> { %v3840_v62 = vld [vmem:[%s5654_s23 + $0x2260] sm:$0xf]  ;;  %v4873_v63 = vld [vmem:[%s5654_s23 + $0x22ac] sm:$0xf0]  ;;  %v3777_v20 = vor.u32 %v4857_v61, %v3776_v59  ;;  %1130 = vmatpush.bf16.msra.mxu3 %v3593_v18  ;;  %1089 = vmatmul.bf16.vlgmr.msra.gmra.mxu0 %v5736_v29  ;;  %v3434_v58 = vld [vmem:[%s5654_s23 + $0x2d0] sm:$0xf0] }
  0x79   : >> { %v3841_v21 = vor.u32 %v4873_v63, %v3840_v62  ;;  %v3704_v22 = vld [vmem:[%s5654_s23 + $0x17c0] sm:$0xf]  ;;  %v4839_v23 = vld [vmem:[%s5654_s23 + $0x180c] sm:$0xf0]  ;;  %1137 = vmatpush.bf16.msrb.mxu0 %v3713_v19  ;;  %1103 = vmatmul.bf16.vlgmr.msra.gmra.mxu1 %v5746_v33  ;;  %v3437_v15 = vor.u32 %v4770_v57, %v3434_v58  ;;  %v4768_v19 = vld [vmem:[%s5654_s23 + $0x1e4] sm:$0xf] }
  0x7a   : >> { %v3768_v24 = vld [vmem:[%s5654_s23 + $0x1cc0] sm:$0xf]  ;;  %v4855_v26 = vld [vmem:[%s5654_s23 + $0x1d0c] sm:$0xf0]  ;;  %v3705_v34 = vor.u32 %v4839_v23, %v3704_v22  ;;  %1151 = vmatpush.bf16.msrb.mxu1 %v3777_v20  ;;  %1117 = vmatmul.bf16.vlgmr.msra.gmra.mxu2 %v5742_v32  ;;  %v3426_v20 = vld [vmem:[%s5654_s23 + $0x230] sm:$0xf0] }
  0x7b   : >> { %v3832_v27 = vld [vmem:[%s5654_s23 + $0x21c0] sm:$0xf]  ;;  %v4871_v28 = vld [vmem:[%s5654_s23 + $0x220c] sm:$0xf0]  ;;  %1165 = vmatpush.bf16.msrb.mxu2 %v3841_v21  ;;  %v3769_v36 = vor.u32 %v4855_v26, %v3768_v24  ;;  %1131 = vmatmul.bf16.vlgmr.msra.gmra.mxu3 %v5750_v35 }
  0x7c   : >> { %v3833_v37 = vor.u32 %v4871_v28, %v3832_v27  ;;  %v3696_v38 = vld [vmem:[%s5654_s23 + $0x1720] sm:$0xf]  ;;  %v4837_v39 = vld [vmem:[%s5654_s23 + $0x176c] sm:$0xf0]  ;;  %1179 = vmatpush.bf16.msrb.mxu3 %v3461_v25  ;;  %v3429_v27 = vor.u32 %v4768_v19, %v3426_v20  ;;  %v4840_v20 = vld [vmem:[%s5654_s23 + $0x1864] sm:$0xf] }
  0x7d   : >> { %v3760_v40 = vld [vmem:[%s5654_s23 + $0x1c20] sm:$0xf]  ;;  %v4853_v42 = vld [vmem:[%s5654_s23 + $0x1c6c] sm:$0xf0]  ;;  %1138 = vmatpush.bf16.msrb.mxu0 %v3705_v34  ;;  %v3697_v47 = vor.u32 %v4837_v39, %v3696_v38  ;;  %v4766_v34 = vld [vmem:[%s5654_s23 + $0x144] sm:$0xf] }
  0x7e   : >> { %v3824_v43 = vld [vmem:[%s5654_s23 + $0x2120] sm:$0xf]  ;;  %v4869_v44 = vld [vmem:[%s5654_s23 + $0x216c] sm:$0xf0]  ;;  %1152 = vmatpush.bf16.msrb.mxu1 %v3769_v36  ;;  %v3761_v48 = vor.u32 %v4853_v42, %v3760_v40  ;;  %v3418_v36 = vld [vmem:[%s5654_s23 + $0x190] sm:$0xf0] }
  0x7f   : >> { %1166 = vmatpush.bf16.msrb.mxu2 %v3833_v37  ;;  %v3825_v49 = vor.u32 %v4869_v44, %v3824_v43  ;;  %v3688_v50 = vld [vmem:[%s5654_s23 + $0x1680] sm:$0xf]  ;;  %v4835_v51 = vld [vmem:[%s5654_s23 + $0x16cc] sm:$0xf0]  ;;  %v3421_v43 = vor.u32 %v4766_v34, %v3418_v36  ;;  %v3578_v34 = vld [vmem:[%s5654_s23 + $0xe10] sm:$0xf0] }
  0x80   : >> { %v3752_v52 = vld [vmem:[%s5654_s23 + $0x1b80] sm:$0xf]  ;;  %1180 = vmatpush.bf16.msrb.mxu3 %v3453_v41  ;;  %v4851_v54 = vld [vmem:[%s5654_s23 + $0x1bcc] sm:$0xf0]  ;;  %v3689_v59 = vor.u32 %v4835_v51, %v3688_v50  ;;  %v4822_v36 = vld [vmem:[%s5654_s23 + $0x12c4] sm:$0xf] }
  0x81   : >> { %v3816_v55 = vld [vmem:[%s5654_s23 + $0x2080] sm:$0xf]  ;;  %v4867_v56 = vld [vmem:[%s5654_s23 + $0x20cc] sm:$0xf0]  ;;  %1139 = vmatpush.bf16.msrb.mxu0 %v3697_v47  ;;  %v3753_v60 = vor.u32 %v4851_v54, %v3752_v52  ;;  %v4764_v47 = vld [vmem:[%s5654_s23 + $0xa4] sm:$0xf] }
  0x82   : >> { %1153 = vmatpush.bf16.msrb.mxu1 %v3761_v48  ;;  %v3817_v61 = vor.u32 %v4867_v56, %v3816_v55  ;;  %v3680_v62 = vld [vmem:[%s5654_s23 + $0x15e0] sm:$0xf]  ;;  %v4833_v63 = vld [vmem:[%s5654_s23 + $0x162c] sm:$0xf0]  ;;  %v3410_v48 = vld [vmem:[%s5654_s23 + $0xf0] sm:$0xf0] }
  0x83   : >> { %1167 = vmatpush.bf16.msrb.mxu2 %v3825_v49  ;;  %v3744_v0 = vld [vmem:[%s5654_s23 + $0x1ae0] sm:$0xf]  ;;  %v4849_v16 = vld [vmem:[%s5654_s23 + $0x1b2c] sm:$0xf0]  ;;  %v3681_v21 = vor.u32 %v4833_v63, %v3680_v62  ;;  %v3413_v57 = vor.u32 %v4764_v47, %v3410_v48  ;;  %v3522_v62 = vld [vmem:[%s5654_s23 + $0x9b0] sm:$0xf0] }
  0x84   : >> { %1181 = vmatpush.bf16.msrb.mxu3 %v3445_v53  ;;  %v3808_v17 = vld [vmem:[%s5654_s23 + $0x1fe0] sm:$0xf]  ;;  %v4865_v18 = vld [vmem:[%s5654_s23 + $0x202c] sm:$0xf0]  ;;  %v3745_v22 = vor.u32 %v4849_v16, %v3744_v0  ;;  %v4808_v63 = vld [vmem:[%s5654_s23 + $0xe64] sm:$0xf] }
  0x85   : >> { %1140 = vmatpush.bf16.msrb.mxu0 %v3689_v59  ;;  %v3809_v23 = vor.u32 %v4865_v18, %v3808_v17  ;;  %v3672_v24 = vld [vmem:[%s5654_s23 + $0x1540] sm:$0xf]  ;;  %v4831_v25 = vld [vmem:[%s5654_s23 + $0x158c] sm:$0xf0]  ;;  %v4762_v59 = vld [vmem:[%s5654_s23 + $0x4] sm:$0xf] }
  0x86   : >> { %1154 = vmatpush.bf16.msrb.mxu1 %v3753_v60  ;;  %v3736_v26 = vld [vmem:[%s5654_s23 + $0x1a40] sm:$0xf]  ;;  %v4847_v28 = vld [vmem:[%s5654_s23 + $0x1a8c] sm:$0xf0]  ;;  %v3673_v37 = vor.u32 %v4831_v25, %v3672_v24  ;;  %v3402_v60 = vld [vmem:[%s5654_s23 + $0x50] sm:$0xf0] }
  0x87   : >> { %1168 = vmatpush.bf16.msrb.mxu2 %v3817_v61  ;;  %v3800_v30 = vld [vmem:[%s5654_s23 + $0x1f40] sm:$0xf]  ;;  %v4863_v31 = vld [vmem:[%s5654_s23 + $0x1f8c] sm:$0xf0]  ;;  %v3737_v38 = vor.u32 %v4847_v28, %v3736_v26  ;;  %v4792_v61 = vld [vmem:[%s5654_s23 + $0x964] sm:$0xf] }
  0x88   : >> { %1182 = vmatpush.bf16.msrb.mxu3 %v3437_v15  ;;  %v3801_v39 = vor.u32 %v4863_v31, %v3800_v30  ;;  %v3664_v40 = vld [vmem:[%s5654_s23 + $0x14a0] sm:$0xf]  ;;  %v4829_v41 = vld [vmem:[%s5654_s23 + $0x14ec] sm:$0xf0]  ;;  %v3586_v15 = vld [vmem:[%s5654_s23 + $0xeb0] sm:$0xf0]  ;;  %v5817_v31 = vor.u32 %v5635_v13, %v5621_v6 }
  0x89   : >> { %1141 = vmatpush.bf16.msrb.mxu0 %v3681_v21  ;;  %v3728_v42 = vld [vmem:[%s5654_s23 + $0x19a0] sm:$0xf]  ;;  %v4845_v44 = vld [vmem:[%s5654_s23 + $0x19ec] sm:$0xf0]  ;;  %v3665_v49 = vor.u32 %v4829_v41, %v3664_v40  ;;  %v4824_v16 = vld [vmem:[%s5654_s23 + $0x1364] sm:$0xf]  ;;  %v3589_v24 = vor.u32 %v4808_v63, %v3586_v15 }
  0x8a   : >> { %1155 = vmatpush.bf16.msrb.mxu1 %v3745_v22  ;;  %v3792_v45 = vld [vmem:[%s5654_s23 + $0x1ea0] sm:$0xf]  ;;  %v4861_v46 = vld [vmem:[%s5654_s23 + $0x1eec] sm:$0xf0]  ;;  %v3729_v52 = vor.u32 %v4845_v44, %v3728_v42  ;;  %v3650_v17 = vld [vmem:[%s5654_s23 + $0x13b0] sm:$0xf0]  ;;  %v3405_v22 = vor.u32 %v4762_v59, %v3402_v60 }
  0x8b   : >> { %1169 = vmatpush.bf16.msrb.mxu2 %v3809_v23  ;;  %v3656_v50 = vld [vmem:[%s5654_s23 + $0x1400] sm:$0xf]  ;;  %v4827_v51 = vld [vmem:[%s5654_s23 + $0x144c] sm:$0xf0]  ;;  %v3793_v53 = vor.u32 %v4861_v46, %v3792_v45  ;;  %v3714_v21 = vld [vmem:[%s5654_s23 + $0x18b0] sm:$0xf0]  ;;  %v3525_v23 = vor.u32 %v4792_v61, %v3522_v62  ;;  %v3653_v25 = vor.u32 %v4824_v16, %v3650_v17 }
  0x8c   : >> { %1183 = vmatpush.bf16.msrb.mxu3 %v3429_v27  ;;  %v3720_v54 = vld [vmem:[%s5654_s23 + $0x1900] sm:$0xf]  ;;  %v4843_v55 = vld [vmem:[%s5654_s23 + $0x194c] sm:$0xf0]  ;;  %v3657_v0 = vor.u32 %v4827_v51, %v3656_v50  ;;  %v4790_v26 = vld [vmem:[%s5654_s23 + $0x8c4] sm:$0xf]  ;;  %v3717_v30 = vor.u32 %v4840_v20, %v3714_v21 }
  0x8d   : >> { %1142 = vmatpush.bf16.msrb.mxu0 %v3673_v37  ;;  %v3784_v56 = vld [vmem:[%s5654_s23 + $0x1e00] sm:$0xf]  ;;  %v4859_v58 = vld [vmem:[%s5654_s23 + $0x1e4c] sm:$0xf0]  ;;  %v3721_v18 = vor.u32 %v4843_v55, %v3720_v54  ;;  %v3514_v27 = vld [vmem:[%s5654_s23 + $0x910] sm:$0xf0] }
  0x8e   : >> { %1156 = vmatpush.bf16.msrb.mxu1 %v3737_v38  ;;  %v3785_v19 = vor.u32 %v4859_v58, %v3784_v56  ;;  %v4806_v28 = vld [vmem:[%s5654_s23 + $0xdc4] sm:$0xf]  ;;  %v3642_v37 = vld [vmem:[%s5654_s23 + $0x1310] sm:$0xf0]  ;;  %v5824_v38 = vor.u32 %v5637_v14, %v5623_v7  ;;  %v3517_v42 = vor.u32 %v4790_v26, %v3514_v27 }
  0x8f   : >> { %1170 = vmatpush.bf16.msrb.mxu2 %v3801_v39  ;;  %v5828_v39 = vor.u32 %v5619_v5, %v5633_v12  ;;  %v4838_v40 = vld [vmem:[%s5654_s23 + $0x17c4] sm:$0xf]  ;;  %v3706_v41 = vld [vmem:[%s5654_s23 + $0x1810] sm:$0xf0]  ;;  %v3645_v44 = vor.u32 %v4822_v36, %v3642_v37 }
  0x90   : >> { %1184 = vmatpush.bf16.msrb.mxu3 %v3421_v43  ;;  %v3581_v43 = vor.u32 %v4806_v28, %v3578_v34  ;;  %v4788_v45 = vld [vmem:[%s5654_s23 + $0x824] sm:$0xf]  ;;  %v3506_v46 = vld [vmem:[%s5654_s23 + $0x870] sm:$0xf0]  ;;  %v3709_v48 = vor.u32 %v4838_v40, %v3706_v41 }
  0x91   : >> { %1143 = vmatpush.bf16.msrb.mxu0 %v3665_v49  ;;  %v4804_v47 = vld [vmem:[%s5654_s23 + $0xd24] sm:$0xf]  ;;  %v3570_v49 = vld [vmem:[%s5654_s23 + $0xd70] sm:$0xf0]  ;;  %v3509_v54 = vor.u32 %v4788_v45, %v3506_v46 }
  0x92   : >> { %1157 = vmatpush.bf16.msrb.mxu1 %v3729_v52  ;;  %v4820_v50 = vld [vmem:[%s5654_s23 + $0x1224] sm:$0xf]  ;;  %v3634_v51 = vld [vmem:[%s5654_s23 + $0x1270] sm:$0xf0]  ;;  %v3573_v55 = vor.u32 %v4804_v47, %v3570_v49 }
  0x93   : >> { %1171 = vmatpush.bf16.msrb.mxu2 %v3793_v53  ;;  %v4836_v52 = vld [vmem:[%s5654_s23 + $0x1724] sm:$0xf]  ;;  %v3698_v53 = vld [vmem:[%s5654_s23 + $0x1770] sm:$0xf0]  ;;  %v3637_v56 = vor.u32 %v4820_v50, %v3634_v51 }
  0x94   : >> { %1185 = vmatpush.bf16.msrb.mxu3 %v3413_v57  ;;  %v4786_v57 = vld [vmem:[%s5654_s23 + $0x784] sm:$0xf]  ;;  %v3498_v58 = vld [vmem:[%s5654_s23 + $0x7d0] sm:$0xf0]  ;;  %v3701_v60 = vor.u32 %v4836_v52, %v3698_v53 }
  0x95   : >> { %1144 = vmatpush.bf16.msrb.mxu0 %v3657_v0  ;;  %v4802_v59 = vld [vmem:[%s5654_s23 + $0xc84] sm:$0xf]  ;;  %v3562_v61 = vld [vmem:[%s5654_s23 + $0xcd0] sm:$0xf0]  ;;  %v3501_v16 = vor.u32 %v4786_v57, %v3498_v58 }
  0x96   : >> { %1158 = vmatpush.bf16.msrb.mxu1 %v3721_v18  ;;  %v4818_v62 = vld [vmem:[%s5654_s23 + $0x1184] sm:$0xf]  ;;  %v3626_v63 = vld [vmem:[%s5654_s23 + $0x11d0] sm:$0xf0]  ;;  %v3565_v17 = vor.u32 %v4802_v59, %v3562_v61 }
  0x97   : >> { %1172 = vmatpush.bf16.msrb.mxu2 %v3785_v19  ;;  %v4834_v0 = vld [vmem:[%s5654_s23 + $0x1684] sm:$0xf]  ;;  %v3690_v15 = vld [vmem:[%s5654_s23 + $0x16d0] sm:$0xf0]  ;;  %v3629_v18 = vor.u32 %v4818_v62, %v3626_v63 }
  0x98   : >> { %1186 = vmatpush.bf16.msrb.mxu3 %v3405_v22  ;;  %1145 = vmatmul.bf16.vlgmr.msrb.gmra.mxu0 %v5817_v31  ;;  %v4784_v19 = vld [vmem:[%s5654_s23 + $0x6e4] sm:$0xf]  ;;  %v3490_v20 = vld [vmem:[%s5654_s23 + $0x730] sm:$0xf0]  ;;  %v3693_v22 = vor.u32 %v4834_v0, %v3690_v15 }
  0x99   : >> { %1193 = vmatpush.bf16.msra.mxu0 %v3525_v23  ;;  %1159 = vmatmul.bf16.vlgmr.msrb.gmra.mxu1 %v5828_v39  ;;  %v4800_v21 = vld [vmem:[%s5654_s23 + $0xbe4] sm:$0xf]  ;;  %v3554_v23 = vld [vmem:[%s5654_s23 + $0xc30] sm:$0xf0]  ;;  %v3493_v28 = vor.u32 %v4784_v19, %v3490_v20 }
  0x9a   : >> { %1207 = vmatpush.bf16.msra.mxu1 %v3589_v24  ;;  %1173 = vmatmul.bf16.vlgmr.msrb.gmra.mxu2 %v5824_v38  ;;  %v4816_v24 = vld [vmem:[%s5654_s23 + $0x10e4] sm:$0xf]  ;;  %v3682_v27 = vld [vmem:[%s5654_s23 + $0x1630] sm:$0xf0] }
  0x9b   : >> { %1221 = vmatpush.bf16.msra.mxu2 %v3653_v25  ;;  %1187 = vmatmul.bf16.vlgmr.msrb.gmra.mxu3 %v5736_v29  ;;  %v3618_v25 = vld [vmem:[%s5654_s23 + $0x1130] sm:$0xf0]  ;;  %v4832_v26 = vld [vmem:[%s5654_s23 + $0x15e4] sm:$0xf] }
  0x9c   : >> { %1235 = vmatpush.bf16.msra.mxu3 %v3717_v30  ;;  %v3557_v30 = vor.u32 %v4800_v21, %v3554_v23  ;;  %v3621_v34 = vor.u32 %v4816_v24, %v3618_v25  ;;  %v4782_v36 = vld [vmem:[%s5654_s23 + $0x644] sm:$0xf]  ;;  %v3482_v37 = vld [vmem:[%s5654_s23 + $0x690] sm:$0xf0]  ;;  %v3685_v41 = vor.u32 %v4832_v26, %v3682_v27  ;;  %v3905_v26 = vld [vmem:[%s5882_s24 + $0x460] sm:$0xf] }
  0x9d   : >> { %1194 = vmatpush.bf16.msra.mxu0 %v3517_v42  ;;  %v4798_v40 = vld [vmem:[%s5654_s23 + $0xb44] sm:$0xf]  ;;  %v3546_v42 = vld [vmem:[%s5654_s23 + $0xb90] sm:$0xf0]  ;;  %v3485_v47 = vor.u32 %v4782_v36, %v3482_v37  ;;  %v4889_v27 = vld [vmem:[%s5882_s24 + $0x4ac] sm:$0xf0] }
  0x9e   : >> { %1208 = vmatpush.bf16.msra.mxu1 %v3581_v43  ;;  %v4814_v43 = vld [vmem:[%s5654_s23 + $0x1044] sm:$0xf]  ;;  %v3674_v46 = vld [vmem:[%s5654_s23 + $0x1590] sm:$0xf0]  ;;  %v4905_v36 = vld [vmem:[%s5882_s24 + $0x9ac] sm:$0xf0] }
  0x9f   : >> { %1222 = vmatpush.bf16.msra.mxu2 %v3645_v44  ;;  %v3610_v44 = vld [vmem:[%s5654_s23 + $0x1090] sm:$0xf0]  ;;  %v4830_v45 = vld [vmem:[%s5654_s23 + $0x1544] sm:$0xf] }
  0xa0   : >> { %1236 = vmatpush.bf16.msra.mxu3 %v3709_v48  ;;  %v3549_v48 = vor.u32 %v4798_v40, %v3546_v42  ;;  %v3613_v49 = vor.u32 %v4814_v43, %v3610_v44  ;;  %v4780_v50 = vld [vmem:[%s5654_s23 + $0x5a4] sm:$0xf]  ;;  %v3474_v51 = vld [vmem:[%s5654_s23 + $0x5f0] sm:$0xf0]  ;;  %v3677_v53 = vor.u32 %v4830_v45, %v3674_v46  ;;  %v3906_v42 = vor.u32 %v4889_v27, %v3905_v26 }
  0xa1   : >> { %1195 = vmatpush.bf16.msra.mxu0 %v3509_v54  ;;  %v4796_v52 = vld [vmem:[%s5654_s23 + $0xaa4] sm:$0xf]  ;;  %v3538_v54 = vld [vmem:[%s5654_s23 + $0xaf0] sm:$0xf0]  ;;  %v3477_v59 = vor.u32 %v4780_v50, %v3474_v51  ;;  %v3961_v50 = vld [vmem:[%s5882_s24 + $0x8c0] sm:$0xf] }
  0xa2   : >> { %1209 = vmatpush.bf16.msra.mxu1 %v3573_v55  ;;  %v4812_v55 = vld [vmem:[%s5654_s23 + $0xfa4] sm:$0xf]  ;;  %v3666_v58 = vld [vmem:[%s5654_s23 + $0x14f0] sm:$0xf0]  ;;  %v3541_v62 = vor.u32 %v4796_v52, %v3538_v54  ;;  %v4903_v51 = vld [vmem:[%s5882_s24 + $0x90c] sm:$0xf0] }
  0xa3   : >> { %1223 = vmatpush.bf16.msra.mxu2 %v3637_v56  ;;  %v3602_v56 = vld [vmem:[%s5654_s23 + $0xff0] sm:$0xf0]  ;;  %v4828_v57 = vld [vmem:[%s5654_s23 + $0x14a4] sm:$0xf] }
  0xa4   : >> { %1237 = vmatpush.bf16.msra.mxu3 %v3701_v60  ;;  %v4778_v60 = vld [vmem:[%s5654_s23 + $0x504] sm:$0xf]  ;;  %v3466_v61 = vld [vmem:[%s5654_s23 + $0x550] sm:$0xf0]  ;;  %v3605_v63 = vor.u32 %v4812_v55, %v3602_v56 }
  0xa5   : >> { %1196 = vmatpush.bf16.msra.mxu0 %v3501_v16  ;;  %v4794_v0 = vld [vmem:[%s5654_s23 + $0xa04] sm:$0xf]  ;;  %v3530_v15 = vld [vmem:[%s5654_s23 + $0xa50] sm:$0xf0]  ;;  %v3469_v24 = vor.u32 %v4778_v60, %v3466_v61  ;;  %v3889_v60 = vld [vmem:[%s5882_s24 + $0x320] sm:$0xf] }
  0xa6   : >> { %1210 = vmatpush.bf16.msra.mxu1 %v3565_v17  ;;  %v4810_v16 = vld [vmem:[%s5654_s23 + $0xf04] sm:$0xf]  ;;  %v3669_v17 = vor.u32 %v4828_v57, %v3666_v58  ;;  %v3658_v20 = vld [vmem:[%s5654_s23 + $0x1450] sm:$0xf0]  ;;  %v3962_v58 = vor.u32 %v4903_v51, %v3961_v50  ;;  %v4885_v61 = vld [vmem:[%s5882_s24 + $0x36c] sm:$0xf0] }
  0xa7   : >> { %1224 = vmatpush.bf16.msra.mxu2 %v3629_v18  ;;  %v3594_v18 = vld [vmem:[%s5654_s23 + $0xf50] sm:$0xf0]  ;;  %v4826_v19 = vld [vmem:[%s5654_s23 + $0x1404] sm:$0xf] }
  0xa8   : >> { %1238 = vmatpush.bf16.msra.mxu3 %v3693_v22  ;;  %v4856_v21 = vld [vmem:[%s5654_s23 + $0x1d64] sm:$0xf]  ;;  %v3778_v22 = vld [vmem:[%s5654_s23 + $0x1db0] sm:$0xf0]  ;;  %v3661_v37 = vor.u32 %v4826_v19, %v3658_v20 }
  0xa9   : >> { %1197 = vmatpush.bf16.msra.mxu0 %v3493_v28  ;;  %v4872_v23 = vld [vmem:[%s5654_s23 + $0x2264] sm:$0xf]  ;;  %v3842_v25 = vld [vmem:[%s5654_s23 + $0x22b0] sm:$0xf0]  ;;  %v3533_v28 = vor.u32 %v4794_v0, %v3530_v15  ;;  %v3781_v40 = vor.u32 %v4856_v21, %v3778_v22  ;;  %v3881_v22 = vld [vmem:[%s5882_s24 + $0x280] sm:$0xf] }
  0xaa   : >> { %1211 = vmatpush.bf16.msra.mxu1 %v3557_v30  ;;  %v3597_v30 = vor.u32 %v4810_v16, %v3594_v18  ;;  %v4854_v43 = vld [vmem:[%s5654_s23 + $0x1cc4] sm:$0xf]  ;;  %v3770_v44 = vld [vmem:[%s5654_s23 + $0x1d10] sm:$0xf0]  ;;  %v3890_v16 = vor.u32 %v4885_v61, %v3889_v60 }
  0xab   : >> { %1225 = vmatpush.bf16.msra.mxu2 %v3621_v34  ;;  %v3969_v34 = vld [vmem:[%s5882_s24 + $0x960] sm:$0xf]  ;;  %v4870_v45 = vld [vmem:[%s5654_s23 + $0x21c4] sm:$0xf]  ;;  %v3773_v52 = vor.u32 %v4854_v43, %v3770_v44  ;;  %v3762_v56 = vld [vmem:[%s5654_s23 + $0x1c70] sm:$0xf0] }
  0xac   : >> { %1239 = vmatpush.bf16.msra.mxu3 %v3685_v41  ;;  %v3845_v41 = vor.u32 %v4872_v23, %v3842_v25  ;;  %v3970_v46 = vor.u32 %v4905_v36, %v3969_v34  ;;  %v4852_v55 = vld [vmem:[%s5654_s23 + $0x1c24] sm:$0xf]  ;;  %v3754_v18 = vld [vmem:[%s5654_s23 + $0x1bd0] sm:$0xf0]  ;;  %v4883_v23 = vld [vmem:[%s5882_s24 + $0x2cc] sm:$0xf0] }
  0xad   : >> { %1198 = vmatpush.bf16.msra.mxu0 %v3485_v47  ;;  %v3834_v47 = vld [vmem:[%s5654_s23 + $0x2210] sm:$0xf0]  ;;  %v4868_v57 = vld [vmem:[%s5654_s23 + $0x2124] sm:$0xf]  ;;  %v3765_v0 = vor.u32 %v4852_v55, %v3762_v56  ;;  %v4899_v25 = vld [vmem:[%s5882_s24 + $0x7cc] sm:$0xf0] }
  0xae   : >> { %1212 = vmatpush.bf16.msra.mxu1 %v3549_v48  ;;  %v3897_v48 = vld [vmem:[%s5882_s24 + $0x3c0] sm:$0xf]  ;;  %v4866_v19 = vld [vmem:[%s5654_s23 + $0x2084] sm:$0xf]  ;;  %v3818_v21 = vld [vmem:[%s5654_s23 + $0x20d0] sm:$0xf0] }
  0xaf   : >> { %1226 = vmatpush.bf16.msra.mxu2 %v3613_v49  ;;  %v4887_v49 = vld [vmem:[%s5882_s24 + $0x40c] sm:$0xf0]  ;;  %v3821_v27 = vor.u32 %v4866_v19, %v3818_v21  ;;  %v3746_v34 = vld [vmem:[%s5654_s23 + $0x1b30] sm:$0xf0]  ;;  %v4864_v36 = vld [vmem:[%s5654_s23 + $0x1fe4] sm:$0xf] }
  0xb0   : >> { %1240 = vmatpush.bf16.msra.mxu3 %v3677_v53  ;;  %v3837_v53 = vor.u32 %v4870_v45, %v3834_v47  ;;  %v3898_v54 = vor.u32 %v4887_v49, %v3897_v48  ;;  %v3937_v43 = vld [vmem:[%s5882_s24 + $0x6e0] sm:$0xf]  ;;  %v4897_v44 = vld [vmem:[%s5882_s24 + $0x72c] sm:$0xf0]  ;;  %v4846_v48 = vld [vmem:[%s5654_s23 + $0x1a44] sm:$0xf] }
  0xb1   : >> { %1199 = vmatpush.bf16.msra.mxu0 %v3477_v59  ;;  %v3826_v59 = vld [vmem:[%s5654_s23 + $0x2170] sm:$0xf0]  ;;  %v4862_v50 = vld [vmem:[%s5654_s23 + $0x1f44] sm:$0xf]  ;;  %v3938_v51 = vor.u32 %v4897_v44, %v3937_v43  ;;  %v3929_v55 = vld [vmem:[%s5882_s24 + $0x640] sm:$0xf] }
  0xb2   : >> { %1213 = vmatpush.bf16.msra.mxu1 %v3541_v62  ;;  %v3953_v62 = vld [vmem:[%s5882_s24 + $0x820] sm:$0xf]  ;;  %v3829_v15 = vor.u32 %v4868_v57, %v3826_v59  ;;  %v3738_v49 = vld [vmem:[%s5654_s23 + $0x1a90] sm:$0xf0]  ;;  %v4895_v56 = vld [vmem:[%s5882_s24 + $0x68c] sm:$0xf0] }
  0xb3   : >> { %1227 = vmatpush.bf16.msra.mxu2 %v3605_v63  ;;  %v4901_v63 = vld [vmem:[%s5882_s24 + $0x86c] sm:$0xf0]  ;;  %v3741_v57 = vor.u32 %v4846_v48, %v3738_v49  ;;  %v4844_v60 = vld [vmem:[%s5654_s23 + $0x19a4] sm:$0xf]  ;;  %v3730_v61 = vld [vmem:[%s5654_s23 + $0x19f0] sm:$0xf0] }
  0xb4   : >> { %1241 = vmatpush.bf16.msra.mxu3 %v3669_v17  ;;  %v4850_v17 = vld [vmem:[%s5654_s23 + $0x1b84] sm:$0xf]  ;;  %v3954_v20 = vor.u32 %v4901_v63, %v3953_v62  ;;  %v3930_v63 = vor.u32 %v4895_v56, %v3929_v55  ;;  %v3733_v19 = vor.u32 %v4844_v60, %v3730_v61  ;;  %v3722_v21 = vld [vmem:[%s5654_s23 + $0x1950] sm:$0xf0]  ;;  %v4161_v43 = vld [vmem:[%s5882_s24 + $0x1860] sm:$0xf] }
  0xb5   : >> { %1200 = vmatpush.bf16.msra.mxu0 %v3469_v24  ;;  %v3945_v24 = vld [vmem:[%s5882_s24 + $0x780] sm:$0xf]  ;;  %v3757_v26 = vor.u32 %v4850_v17, %v3754_v18  ;;  %v4860_v62 = vld [vmem:[%s5654_s23 + $0x1ea4] sm:$0xf]  ;;  %v4893_v18 = vld [vmem:[%s5882_s24 + $0x5ec] sm:$0xf0] }
  0xb6   : >> { %1214 = vmatpush.bf16.msra.mxu1 %v3533_v28  ;;  %v3882_v28 = vor.u32 %v4883_v23, %v3881_v22  ;;  %v3921_v17 = vld [vmem:[%s5882_s24 + $0x5a0] sm:$0xf]  ;;  %v4953_v44 = vld [vmem:[%s5882_s24 + $0x18ac] sm:$0xf0] }
  0xb7   : >> { %1228 = vmatpush.bf16.msra.mxu2 %v3597_v30  ;;  %v4848_v30 = vld [vmem:[%s5654_s23 + $0x1ae4] sm:$0xf]  ;;  %v4969_v48 = vld [vmem:[%s5882_s24 + $0x1dac] sm:$0xf0]  ;;  %v4089_v55 = vld [vmem:[%s5882_s24 + $0x12c0] sm:$0xf] }
  0xb8   : >> { %1242 = vmatpush.bf16.msra.mxu3 %v3661_v37  ;;  %1201 = vmatmul.bf16.vlgmr.msra.gmra.mxu0 %v5746_v33  ;;  %v3946_v37 = vor.u32 %v4899_v25, %v3945_v24  ;;  %v3749_v45 = vor.u32 %v4848_v30, %v3746_v34  ;;  %v4858_v24 = vld [vmem:[%s5654_s23 + $0x1e04] sm:$0xf]  ;;  %v3786_v25 = vld [vmem:[%s5654_s23 + $0x1e50] sm:$0xf0]  ;;  %v3913_v30 = vld [vmem:[%s5882_s24 + $0x500] sm:$0xf] }
  0xb9   : >> { %1249 = vmatpush.bf16.msrb.mxu0 %v3781_v40  ;;  %1215 = vmatmul.bf16.vlgmr.msra.gmra.mxu1 %v5742_v32  ;;  %v3810_v40 = vld [vmem:[%s5654_s23 + $0x2030] sm:$0xf0]  ;;  %v4891_v34 = vld [vmem:[%s5882_s24 + $0x54c] sm:$0xf0]  ;;  %v4217_v60 = vld [vmem:[%s5882_s24 + $0x1cc0] sm:$0xf] }
  0xba   : >> { %1263 = vmatpush.bf16.msrb.mxu1 %v3845_v41  ;;  %1229 = vmatmul.bf16.vlgmr.msra.gmra.mxu2 %v5750_v35  ;;  %v3873_v41 = vld [vmem:[%s5882_s24 + $0x1e0] sm:$0xf]  ;;  %v3914_v49 = vor.u32 %v4891_v34, %v3913_v30  ;;  %v4967_v61 = vld [vmem:[%s5882_s24 + $0x1d0c] sm:$0xf0] }
  0xbb   : >> { %1951 = vmatpush.bf16.msrb.mxu2 %v3906_v42  ;;  %1243 = vmatmul.bf16.vlgmr.msra.gmra.mxu3 %v5817_v31  ;;  %v4881_v42 = vld [vmem:[%s5882_s24 + $0x22c] sm:$0xf0]  ;;  %v4073_v30 = vld [vmem:[%s5882_s24 + $0x1180] sm:$0xf] }
  0xbc   : >> { %1965 = vmatpush.bf16.msrb.mxu3 %v3970_v46  ;;  %v3813_v46 = vor.u32 %v4864_v36, %v3810_v40  ;;  %v3874_v47 = vor.u32 %v4881_v42, %v3873_v41  ;;  %v4033_v36 = vld [vmem:[%s5882_s24 + $0xe60] sm:$0xf]  ;;  %v4937_v42 = vld [vmem:[%s5882_s24 + $0x13ac] sm:$0xf0] }
  0xbd   : >> { %1250 = vmatpush.bf16.msrb.mxu0 %v3773_v52  ;;  %v3802_v52 = vld [vmem:[%s5654_s23 + $0x1f90] sm:$0xf0]  ;;  %v4097_v40 = vld [vmem:[%s5882_s24 + $0x1360] sm:$0xf] }
  0xbe   : >> { %1264 = vmatpush.bf16.msrb.mxu1 %v3837_v53  ;;  %v3865_v53 = vld [vmem:[%s5882_s24 + $0x140] sm:$0xf] }
  0xbf   : >> { %1952 = vmatpush.bf16.msrb.mxu2 %v3898_v54  ;;  %v4879_v54 = vld [vmem:[%s5882_s24 + $0x18c] sm:$0xf0] }
  0xc0   : >> { %1966 = vmatpush.bf16.msrb.mxu3 %v3962_v58  ;;  %v3805_v58 = vor.u32 %v4862_v50, %v3802_v52  ;;  %v3866_v59 = vor.u32 %v4879_v54, %v3865_v53  ;;  %v4162_v52 = vor.u32 %v4953_v44, %v4161_v43  ;;  %v4025_v53 = vld [vmem:[%s5882_s24 + $0xdc0] sm:$0xf]  ;;  %v4919_v54 = vld [vmem:[%s5882_s24 + $0xe0c] sm:$0xf0] }
  0xc1   : >> { %1251 = vmatpush.bf16.msrb.mxu0 %v3765_v0  ;;  %v3794_v0 = vld [vmem:[%s5654_s23 + $0x1ef0] sm:$0xf0] }
  0xc2   : >> { %1265 = vmatpush.bf16.msrb.mxu1 %v3829_v15  ;;  %v3857_v15 = vld [vmem:[%s5882_s24 + $0xa0] sm:$0xf]  ;;  %v3797_v22 = vor.u32 %v4860_v62, %v3794_v0  ;;  %v4026_v62 = vor.u32 %v4919_v54, %v4025_v53  ;;  %v4961_v54 = vld [vmem:[%s5882_s24 + $0x1b2c] sm:$0xf0] }
  0xc3   : >> { %1953 = vmatpush.bf16.msrb.mxu2 %v3890_v16  ;;  %v4877_v16 = vld [vmem:[%s5882_s24 + $0xec] sm:$0xf0]  ;;  %v4193_v53 = vld [vmem:[%s5882_s24 + $0x1ae0] sm:$0xf] }
  0xc4   : >> { %1967 = vmatpush.bf16.msrb.mxu3 %v3954_v20  ;;  %v4842_v20 = vld [vmem:[%s5654_s23 + $0x1904] sm:$0xf]  ;;  %v3858_v23 = vor.u32 %v4877_v16, %v3857_v15  ;;  %v4017_v15 = vld [vmem:[%s5882_s24 + $0xd20] sm:$0xf]  ;;  %v4917_v16 = vld [vmem:[%s5882_s24 + $0xd6c] sm:$0xf0] }
  0xc5   : >> { %1252 = vmatpush.bf16.msrb.mxu0 %v3757_v26  ;;  %v3849_v26 = vld [vmem:[%s5882_s24] sm:$0xf]  ;;  %v3725_v41 = vor.u32 %v4842_v20, %v3722_v21  ;;  %v4949_v21 = vld [vmem:[%s5882_s24 + $0x176c] sm:$0xf0] }
  0xc6   : >> { %1266 = vmatpush.bf16.msrb.mxu1 %v3821_v27  ;;  %v3922_v27 = vor.u32 %v4893_v18, %v3921_v17  ;;  %v4081_v17 = vld [vmem:[%s5882_s24 + $0x1220] sm:$0xf]  ;;  %v4218_v18 = vor.u32 %v4967_v61, %v4217_v60  ;;  %v4194_v61 = vor.u32 %v4961_v54, %v4193_v53  ;;  %v4904_v53 = vld [vmem:[%s5882_s24 + $0x964] sm:$0xf]  ;;  %v3971_v54 = vld [vmem:[%s5882_s24 + $0x9b0] sm:$0xf0] }
  0xc7   : >> { %1954 = vmatpush.bf16.msrb.mxu2 %v3882_v28  ;;  %v4875_v28 = vld [vmem:[%s5882_s24 + $0x4c] sm:$0xf0]  ;;  %v4145_v20 = vld [vmem:[%s5882_s24 + $0x1720] sm:$0xf] }
  0xc8   : >> { %1968 = vmatpush.bf16.msrb.mxu3 %v3946_v37  ;;  %v4921_v37 = vld [vmem:[%s5882_s24 + $0xeac] sm:$0xf0]  ;;  %v4057_v60 = vld [vmem:[%s5882_s24 + $0x1040] sm:$0xf] }
  0xc9   : >> { %1253 = vmatpush.bf16.msrb.mxu0 %v3749_v45  ;;  %v3789_v45 = vor.u32 %v4858_v24, %v3786_v25  ;;  %v4034_v50 = vor.u32 %v4921_v37, %v4033_v36  ;;  %v4018_v24 = vor.u32 %v4917_v16, %v4017_v15  ;;  %v4931_v36 = vld [vmem:[%s5882_s24 + $0x11cc] sm:$0xf0]  ;;  %v4137_v37 = vld [vmem:[%s5882_s24 + $0x1680] sm:$0xf] }
  0xca   : >> { %1267 = vmatpush.bf16.msrb.mxu1 %v3813_v46  ;;  %v3850_v46 = vor.u32 %v4875_v28, %v3849_v26  ;;  %v4146_v26 = vor.u32 %v4949_v21, %v4145_v20  ;;  %v4915_v28 = vld [vmem:[%s5882_s24 + $0xccc] sm:$0xf0]  ;;  %v4074_v44 = vor.u32 %v4931_v36, %v4073_v30  ;;  %v4185_v15 = vld [vmem:[%s5882_s24 + $0x1a40] sm:$0xf] }
  0xcb   : >> { %1955 = vmatpush.bf16.msrb.mxu2 %v3874_v47  ;;  %v4225_v47 = vld [vmem:[%s5882_s24 + $0x1d60] sm:$0xf]  ;;  %v4959_v16 = vld [vmem:[%s5882_s24 + $0x1a8c] sm:$0xf0] }
  0xcc   : >> { %1969 = vmatpush.bf16.msrb.mxu3 %v3938_v51  ;;  %v4098_v51 = vor.u32 %v4937_v42, %v4097_v40  ;;  %v4226_v56 = vor.u32 %v4969_v48, %v4225_v47  ;;  %v4947_v40 = vld [vmem:[%s5882_s24 + $0x16cc] sm:$0xf0]  ;;  %v4065_v48 = vld [vmem:[%s5882_s24 + $0x10e0] sm:$0xf] }
  0xcd   : >> { %1254 = vmatpush.bf16.msrb.mxu0 %v3741_v57  ;;  %v4935_v57 = vld [vmem:[%s5882_s24 + $0x130c] sm:$0xf0]  ;;  %v3985_v20 = vld [vmem:[%s5882_s24 + $0xaa0] sm:$0xf] }
  0xce   : >> { %1268 = vmatpush.bf16.msrb.mxu1 %v3805_v58  ;;  %v4153_v58 = vld [vmem:[%s5882_s24 + $0x17c0] sm:$0xf]  ;;  %v4963_v42 = vld [vmem:[%s5882_s24 + $0x1bcc] sm:$0xf0] }
  0xcf   : >> { %1956 = vmatpush.bf16.msrb.mxu2 %v3866_v59  ;;  %v4951_v59 = vld [vmem:[%s5882_s24 + $0x180c] sm:$0xf0] }
  0xd0   : >> { %1970 = vmatpush.bf16.msrb.mxu3 %v3930_v63  ;;  %v4090_v63 = vor.u32 %v4935_v57, %v4089_v55  ;;  %v4154_v0 = vor.u32 %v4951_v59, %v4153_v58  ;;  %v4913_v47 = vld [vmem:[%s5882_s24 + $0xc2c] sm:$0xf0]  ;;  %v3993_v58 = vld [vmem:[%s5882_s24 + $0xb40] sm:$0xf] }
  0xd1   : >> { %1255 = vmatpush.bf16.msrb.mxu0 %v3733_v19  ;;  %v4933_v19 = vld [vmem:[%s5882_s24 + $0x126c] sm:$0xf0] }
  0xd2   : >> { %1269 = vmatpush.bf16.msrb.mxu1 %v3797_v22  ;;  %v4209_v22 = vld [vmem:[%s5882_s24 + $0x1c20] sm:$0xf]  ;;  %v4082_v25 = vor.u32 %v4933_v19, %v4081_v17  ;;  %v4911_v59 = vld [vmem:[%s5882_s24 + $0xb8c] sm:$0xf0] }
  0xd3   : >> { %1957 = vmatpush.bf16.msrb.mxu2 %v3858_v23  ;;  %v4965_v23 = vld [vmem:[%s5882_s24 + $0x1c6c] sm:$0xf0]  ;;  %v3994_v17 = vor.u32 %v4911_v59, %v3993_v58  ;;  %v4035_v58 = vld [vmem:[%s5882_s24 + $0xeb0] sm:$0xf0] }
  0xd4   : >> { %1971 = vmatpush.bf16.msrb.mxu3 %v3922_v27  ;;  %v4009_v27 = vld [vmem:[%s5882_s24 + $0xc80] sm:$0xf]  ;;  %v4210_v34 = vor.u32 %v4965_v23, %v4209_v22  ;;  %v4909_v21 = vld [vmem:[%s5882_s24 + $0xaec] sm:$0xf0]  ;;  %v4186_v23 = vor.u32 %v4959_v16, %v4185_v15  ;;  %v4886_v15 = vld [vmem:[%s5882_s24 + $0x3c4] sm:$0xf] }
  0xd5   : >> { %1256 = vmatpush.bf16.msrb.mxu0 %v3725_v41  ;;  %v4201_v41 = vld [vmem:[%s5882_s24 + $0x1b80] sm:$0xf]  ;;  %v4010_v43 = vor.u32 %v4915_v28, %v4009_v27  ;;  %v4957_v28 = vld [vmem:[%s5882_s24 + $0x19ec] sm:$0xf0]  ;;  %v3986_v30 = vor.u32 %v4909_v21, %v3985_v20  ;;  %v4918_v20 = vld [vmem:[%s5882_s24 + $0xdc4] sm:$0xf] }
  0xd6   : >> { %1270 = vmatpush.bf16.msrb.mxu1 %v3789_v45  ;;  %v4138_v45 = vor.u32 %v4947_v40, %v4137_v37  ;;  %v4049_v22 = vld [vmem:[%s5882_s24 + $0xfa0] sm:$0xf]  ;;  %v4907_v36 = vld [vmem:[%s5882_s24 + $0xa4c] sm:$0xf0]  ;;  %v4027_v21 = vld [vmem:[%s5882_s24 + $0xe10] sm:$0xf0] }
  0xd7   : >> { %1958 = vmatpush.bf16.msrb.mxu2 %v3850_v46  ;;  %v4001_v46 = vld [vmem:[%s5882_s24 + $0xbe0] sm:$0xf] }
  0xd8   : >> { %1972 = vmatpush.bf16.msrb.mxu3 %v3914_v49  ;;  %1257 = vmatmul.bf16.vlgmr.msrb.gmra.mxu0 %v5828_v39  ;;  %v4202_v49 = vor.u32 %v4963_v42, %v4201_v41  ;;  %v4002_v55 = vor.u32 %v4913_v47, %v4001_v46  ;;  %v4177_v27 = vld [vmem:[%s5882_s24 + $0x19a0] sm:$0xf]  ;;  %v4923_v42 = vld [vmem:[%s5882_s24 + $0xf4c] sm:$0xf0] }
  0xd9   : >> { %1979 = vmatpush.bf16.msra.mxu0 %v4034_v50  ;;  %1271 = vmatmul.bf16.vlgmr.msrb.gmra.mxu1 %v5824_v38  ;;  %v4929_v50 = vld [vmem:[%s5882_s24 + $0x112c] sm:$0xf0]  ;;  %v4041_v41 = vld [vmem:[%s5882_s24 + $0xf00] sm:$0xf] }
  0xda   : >> { %1993 = vmatpush.bf16.msra.mxu1 %v4098_v51  ;;  %1959 = vmatmul.bf16.vlgmr.msrb.gmra.mxu2 %v5736_v29  ;;  %v4129_v51 = vld [vmem:[%s5882_s24 + $0x15e0] sm:$0xf]  ;;  %v4955_v47 = vld [vmem:[%s5882_s24 + $0x194c] sm:$0xf0] }
  0xdb   : >> { %2007 = vmatpush.bf16.msra.mxu2 %v4162_v52  ;;  %1973 = vmatmul.bf16.vlgmr.msrb.gmra.mxu3 %v5746_v33  ;;  %v4945_v52 = vld [vmem:[%s5882_s24 + $0x162c] sm:$0xf0]  ;;  %v4169_v46 = vld [vmem:[%s5882_s24 + $0x1900] sm:$0xf] }
  0xdc   : >> { %2021 = vmatpush.bf16.msra.mxu3 %v4226_v56  ;;  %v4066_v56 = vor.u32 %v4929_v50, %v4065_v48  ;;  %v4130_v57 = vor.u32 %v4945_v52, %v4129_v51  ;;  %v4289_v48 = vld [vmem:[%s5882_s24 + $0x2260] sm:$0xf]  ;;  %v4888_v50 = vld [vmem:[%s5882_s24 + $0x464] sm:$0xf]  ;;  %v3907_v52 = vld [vmem:[%s5882_s24 + $0x4b0] sm:$0xf0]  ;;  %v4170_v59 = vor.u32 %v4955_v47, %v4169_v46 }
  0xdd   : >> { %1980 = vmatpush.bf16.msra.mxu0 %v4026_v62  ;;  %v4927_v62 = vld [vmem:[%s5882_s24 + $0x108c] sm:$0xf0]  ;;  %v4882_v46 = vld [vmem:[%s5882_s24 + $0x284] sm:$0xf] }
  0xde   : >> { %1994 = vmatpush.bf16.msra.mxu1 %v4090_v63  ;;  %v4121_v63 = vld [vmem:[%s5882_s24 + $0x1540] sm:$0xf] }
  0xdf   : >> { %2008 = vmatpush.bf16.msra.mxu2 %v4154_v0  ;;  %v4943_v0 = vld [vmem:[%s5882_s24 + $0x158c] sm:$0xf0] }
  0xe0   : >> { %2022 = vmatpush.bf16.msra.mxu3 %v4218_v18  ;;  %v4058_v18 = vor.u32 %v4927_v62, %v4057_v60  ;;  %v4122_v19 = vor.u32 %v4943_v0, %v4121_v63  ;;  %v3974_v62 = vor.u32 %v4904_v53, %v3971_v54  ;;  %v4281_v63 = vld [vmem:[%s5882_s24 + $0x21c0] sm:$0xf]  ;;  %v4983_v0 = vld [vmem:[%s5882_s24 + $0x220c] sm:$0xf0] }
  0xe1   : >> { %1981 = vmatpush.bf16.msra.mxu0 %v4018_v24  ;;  %v4925_v24 = vld [vmem:[%s5882_s24 + $0xfec] sm:$0xf0] }
  0xe2   : >> { %1995 = vmatpush.bf16.msra.mxu1 %v4082_v25  ;;  %v4113_v25 = vld [vmem:[%s5882_s24 + $0x14a0] sm:$0xf]  ;;  %v4050_v37 = vor.u32 %v4925_v24, %v4049_v22  ;;  %v4282_v22 = vor.u32 %v4983_v0, %v4281_v63  ;;  %v4912_v63 = vld [vmem:[%s5882_s24 + $0xbe4] sm:$0xf]  ;;  %v4003_v0 = vld [vmem:[%s5882_s24 + $0xc30] sm:$0xf0] }
  0xe3   : >> { %2009 = vmatpush.bf16.msra.mxu2 %v4146_v26  ;;  %v4941_v26 = vld [vmem:[%s5882_s24 + $0x14ec] sm:$0xf0] }
  0xe4   : >> { %2023 = vmatpush.bf16.msra.mxu3 %v4210_v34  ;;  %v3977_v34 = vld [vmem:[%s5882_s24 + $0xa00] sm:$0xf]  ;;  %v4114_v40 = vor.u32 %v4941_v26, %v4113_v25  ;;  %v4981_v26 = vld [vmem:[%s5882_s24 + $0x216c] sm:$0xf0] }
  0xe5   : >> { %1982 = vmatpush.bf16.msra.mxu0 %v4010_v43  ;;  %v4105_v43 = vld [vmem:[%s5882_s24 + $0x1400] sm:$0xf]  ;;  %v3978_v51 = vor.u32 %v4907_v36, %v3977_v34  ;;  %v4900_v34 = vld [vmem:[%s5882_s24 + $0x824] sm:$0xf]  ;;  %v3955_v36 = vld [vmem:[%s5882_s24 + $0x870] sm:$0xf0] }
  0xe6   : >> { %1996 = vmatpush.bf16.msra.mxu1 %v4074_v44  ;;  %v4178_v44 = vor.u32 %v4957_v28, %v4177_v27  ;;  %v4273_v25 = vld [vmem:[%s5882_s24 + $0x2120] sm:$0xf]  ;;  %v4884_v27 = vld [vmem:[%s5882_s24 + $0x324] sm:$0xf]  ;;  %v4030_v28 = vor.u32 %v4918_v20, %v4027_v21  ;;  %v4006_v21 = vor.u32 %v4912_v63, %v4003_v0  ;;  %v4227_v0 = vld [vmem:[%s5882_s24 + $0x1db0] sm:$0xf0] }
  0xe7   : >> { %2010 = vmatpush.bf16.msra.mxu2 %v4138_v45  ;;  %v4939_v45 = vld [vmem:[%s5882_s24 + $0x144c] sm:$0xf0]  ;;  %v4878_v20 = vld [vmem:[%s5882_s24 + $0x144] sm:$0xf] }
  0xe8   : >> { %2024 = vmatpush.bf16.msra.mxu3 %v4202_v49  ;;  %v4985_v49 = vld [vmem:[%s5882_s24 + $0x22ac] sm:$0xf0]  ;;  %v4968_v63 = vld [vmem:[%s5882_s24 + $0x1d64] sm:$0xf] }
  0xe9   : >> { %1983 = vmatpush.bf16.msra.mxu0 %v4002_v55  ;;  %v4042_v55 = vor.u32 %v4923_v42, %v4041_v41  ;;  %v4290_v60 = vor.u32 %v4985_v49, %v4289_v48  ;;  %v4274_v41 = vor.u32 %v4981_v26, %v4273_v25  ;;  %v3883_v48 = vld [vmem:[%s5882_s24 + $0x2d0] sm:$0xf0]  ;;  %v4898_v49 = vld [vmem:[%s5882_s24 + $0x784] sm:$0xf] }
  0xea   : >> { %1997 = vmatpush.bf16.msra.mxu1 %v4066_v56  ;;  %v4106_v56 = vor.u32 %v4939_v45, %v4105_v43  ;;  %v3958_v43 = vor.u32 %v4900_v34, %v3955_v36  ;;  %v4979_v45 = vld [vmem:[%s5882_s24 + $0x20cc] sm:$0xf0]  ;;  %v3886_v54 = vor.u32 %v4882_v46, %v3883_v48  ;;  %v4910_v25 = vld [vmem:[%s5882_s24 + $0xb44] sm:$0xf]  ;;  %v3995_v26 = vld [vmem:[%s5882_s24 + $0xb90] sm:$0xf0] }
  0xeb   : >> { %2011 = vmatpush.bf16.msra.mxu2 %v4130_v57  ;;  %v4920_v57 = vld [vmem:[%s5882_s24 + $0xe64] sm:$0xf]  ;;  %v4241_v34 = vld [vmem:[%s5882_s24 + $0x1ea0] sm:$0xf]  ;;  %v4973_v36 = vld [vmem:[%s5882_s24 + $0x1eec] sm:$0xf0] }
  0xec   : >> { %2025 = vmatpush.bf16.msra.mxu3 %v4194_v61  ;;  %v3910_v61 = vor.u32 %v4888_v50, %v3907_v52  ;;  %v4038_v16 = vor.u32 %v4920_v57, %v4035_v58  ;;  %v3947_v50 = vld [vmem:[%s5882_s24 + $0x7d0] sm:$0xf0]  ;;  %v4977_v57 = vld [vmem:[%s5882_s24 + $0x202c] sm:$0xf0]  ;;  %v4880_v58 = vld [vmem:[%s5882_s24 + $0x1e4] sm:$0xf]  ;;  %v4242_v46 = vor.u32 %v4973_v36, %v4241_v34 }
  0xed   : >> { %1984 = vmatpush.bf16.msra.mxu0 %v3994_v17  ;;  %v3899_v17 = vld [vmem:[%s5882_s24 + $0x410] sm:$0xf0]  ;;  %v4971_v48 = vld [vmem:[%s5882_s24 + $0x1e4c] sm:$0xf0]  ;;  %v4982_v34 = vld [vmem:[%s5882_s24 + $0x21c4] sm:$0xf] }
  0xee   : >> { %1998 = vmatpush.bf16.msra.mxu1 %v4058_v18  ;;  %v4902_v18 = vld [vmem:[%s5882_s24 + $0x8c4] sm:$0xf]  ;;  %v4011_v52 = vld [vmem:[%s5882_s24 + $0xcd0] sm:$0xf0] }
  0xef   : >> { %2012 = vmatpush.bf16.msra.mxu2 %v4122_v19  ;;  %v3963_v19 = vld [vmem:[%s5882_s24 + $0x910] sm:$0xf0] }
  0xf0   : >> { %2026 = vmatpush.bf16.msra.mxu3 %v4186_v23  ;;  %v3902_v23 = vor.u32 %v4886_v15, %v3899_v17  ;;  %v3966_v24 = vor.u32 %v4902_v18, %v3963_v19  ;;  %v4249_v18 = vld [vmem:[%s5882_s24 + $0x1f40] sm:$0xf]  ;;  %v4975_v19 = vld [vmem:[%s5882_s24 + $0x1f8c] sm:$0xf0]  ;;  %v4283_v36 = vld [vmem:[%s5882_s24 + $0x2210] sm:$0xf0] }
  0xf1   : >> { %1985 = vmatpush.bf16.msra.mxu0 %v3986_v30  ;;  %v3891_v30 = vld [vmem:[%s5882_s24 + $0x370] sm:$0xf0] }
  0xf2   : >> { %1999 = vmatpush.bf16.msra.mxu1 %v4050_v37  ;;  %v4916_v37 = vld [vmem:[%s5882_s24 + $0xd24] sm:$0xf]  ;;  %v3894_v42 = vor.u32 %v4884_v27, %v3891_v30  ;;  %v4250_v27 = vor.u32 %v4975_v19, %v4249_v18  ;;  %v4291_v18 = vld [vmem:[%s5882_s24 + $0x22b0] sm:$0xf0] }
  0xf3   : >> { %2013 = vmatpush.bf16.msra.mxu2 %v4114_v40  ;;  %v4019_v40 = vld [vmem:[%s5882_s24 + $0xd70] sm:$0xf0] }
  0xf4   : >> { %2027 = vmatpush.bf16.msra.mxu3 %v4178_v44  ;;  %v4265_v44 = vld [vmem:[%s5882_s24 + $0x2080] sm:$0xf]  ;;  %v4022_v47 = vor.u32 %v4916_v37, %v4019_v40  ;;  %v4876_v37 = vld [vmem:[%s5882_s24 + $0xa4] sm:$0xf]  ;;  %v3998_v40 = vor.u32 %v4910_v25, %v3995_v26 }
  0xf5   : >> { %1986 = vmatpush.bf16.msra.mxu0 %v3978_v51  ;;  %v4914_v51 = vld [vmem:[%s5882_s24 + $0xc84] sm:$0xf]  ;;  %v4266_v53 = vor.u32 %v4979_v45, %v4265_v44  ;;  %v3987_v45 = vld [vmem:[%s5882_s24 + $0xaf0] sm:$0xf0] }
  0xf6   : >> { %2000 = vmatpush.bf16.msra.mxu1 %v4042_v55  ;;  %v3950_v55 = vor.u32 %v4898_v49, %v3947_v50  ;;  %v4908_v44 = vld [vmem:[%s5882_s24 + $0xaa4] sm:$0xf] }
  0xf7   : >> { %2014 = vmatpush.bf16.msra.mxu2 %v4106_v56  ;;  %v4257_v56 = vld [vmem:[%s5882_s24 + $0x1fe0] sm:$0xf]  ;;  %v4950_v25 = vld [vmem:[%s5882_s24 + $0x17c4] sm:$0xf] }
  0xf8   : >> { %2028 = vmatpush.bf16.msra.mxu3 %v4170_v59  ;;  %1987 = vmatmul.bf16.vlgmr.msra.gmra.mxu0 %v5742_v32  ;;  %v4014_v59 = vor.u32 %v4914_v51, %v4011_v52  ;;  %v4258_v15 = vor.u32 %v4977_v57, %v4257_v56  ;;  %v4874_v51 = vld [vmem:[%s5882_s24 + $0x4] sm:$0xf]  ;;  %v3851_v52 = vld [vmem:[%s5882_s24 + $0x50] sm:$0xf0] }
  0xf9   : >> { %2035 = vmatpush.bf16.msrb.mxu0 %v4290_v60  ;;  %2001 = vmatmul.bf16.vlgmr.msra.gmra.mxu1 %v5750_v35  ;;  %v3875_v60 = vld [vmem:[%s5882_s24 + $0x230] sm:$0xf0]  ;;  %v4906_v56 = vld [vmem:[%s5882_s24 + $0xa04] sm:$0xf] }
  0xfa   : >> { %2049 = vmatpush.bf16.msrb.mxu1 %v3910_v61  ;;  %2015 = vmatmul.bf16.vlgmr.msra.gmra.mxu2 %v5817_v31  ;;  %v4896_v61 = vld [vmem:[%s5882_s24 + $0x6e4] sm:$0xf]  ;;  %v3979_v57 = vld [vmem:[%s5882_s24 + $0xa50] sm:$0xf0] }
  0xfb   : >> { %2063 = vmatpush.bf16.msrb.mxu2 %v3974_v62  ;;  %2029 = vmatmul.bf16.vlgmr.msra.gmra.mxu3 %v5828_v39  ;;  %v3939_v62 = vld [vmem:[%s5882_s24 + $0x730] sm:$0xf0]  ;;  %v3982_v19 = vor.u32 %v4906_v56, %v3979_v57  ;;  %v4962_v57 = vld [vmem:[%s5882_s24 + $0x1b84] sm:$0xf] }
  0xfc   : >> { %2077 = vmatpush.bf16.msrb.mxu3 %v4038_v16  ;;  %v3878_v16 = vor.u32 %v4880_v58, %v3875_v60  ;;  %v3942_v17 = vor.u32 %v4896_v61, %v3939_v62  ;;  %v4936_v58 = vld [vmem:[%s5882_s24 + $0x1364] sm:$0xf]  ;;  %v4163_v62 = vld [vmem:[%s5882_s24 + $0x18b0] sm:$0xf0] }
  0xfd   : >> { %2036 = vmatpush.bf16.msrb.mxu0 %v4282_v22  ;;  %v3867_v22 = vld [vmem:[%s5882_s24 + $0x190] sm:$0xf0]  ;;  %v4952_v60 = vld [vmem:[%s5882_s24 + $0x1864] sm:$0xf] }
  0xfe   : >> { %2050 = vmatpush.bf16.msrb.mxu1 %v3902_v23  ;;  %v4894_v23 = vld [vmem:[%s5882_s24 + $0x644] sm:$0xf]  ;;  %v4139_v56 = vld [vmem:[%s5882_s24 + $0x16d0] sm:$0xf0] }
  0xff   : >> { %2064 = vmatpush.bf16.msrb.mxu2 %v3966_v24  ;;  %v3931_v24 = vld [vmem:[%s5882_s24 + $0x690] sm:$0xf0] }
 0x100   : >> { %2078 = vmatpush.bf16.msrb.mxu3 %v4030_v28  ;;  %v3870_v28 = vor.u32 %v4878_v20, %v3867_v22  ;;  %v3934_v30 = vor.u32 %v4894_v23, %v3931_v24  ;;  %v4230_v22 = vor.u32 %v4968_v63, %v4227_v0  ;;  %v4934_v23 = vld [vmem:[%s5882_s24 + $0x12c4] sm:$0xf]  ;;  %v4091_v24 = vld [vmem:[%s5882_s24 + $0x1310] sm:$0xf0] }
 0x101   : >> { %2037 = vmatpush.bf16.msrb.mxu0 %v4274_v41  ;;  %v3859_v41 = vld [vmem:[%s5882_s24 + $0xf0] sm:$0xf0]  ;;  %v4928_v63 = vld [vmem:[%s5882_s24 + $0x10e4] sm:$0xf] }
 0x102   : >> { %2051 = vmatpush.bf16.msrb.mxu1 %v3894_v42  ;;  %v4892_v42 = vld [vmem:[%s5882_s24 + $0x5a4] sm:$0xf]  ;;  %v3862_v49 = vor.u32 %v4876_v37, %v3859_v41  ;;  %v4094_v37 = vor.u32 %v4934_v23, %v4091_v24  ;;  %v4067_v0 = vld [vmem:[%s5882_s24 + $0x1130] sm:$0xf0] }
 0x103   : >> { %2065 = vmatpush.bf16.msrb.mxu2 %v3958_v43  ;;  %v3923_v43 = vld [vmem:[%s5882_s24 + $0x5f0] sm:$0xf0] }
 0x104   : >> { %2079 = vmatpush.bf16.msrb.mxu3 %v4022_v47  ;;  %v4233_v47 = vld [vmem:[%s5882_s24 + $0x1e00] sm:$0xf]  ;;  %v3926_v50 = vor.u32 %v4892_v42, %v3923_v43  ;;  %v4932_v42 = vld [vmem:[%s5882_s24 + $0x1224] sm:$0xf]  ;;  %v4083_v43 = vld [vmem:[%s5882_s24 + $0x1270] sm:$0xf0] }
 0x105   : >> { %2038 = vmatpush.bf16.msrb.mxu0 %v4266_v53  ;;  %v4890_v53 = vld [vmem:[%s5882_s24 + $0x504] sm:$0xf]  ;;  %v4234_v61 = vor.u32 %v4971_v48, %v4233_v47  ;;  %v4211_v48 = vld [vmem:[%s5882_s24 + $0x1c70] sm:$0xf0] }
 0x106   : >> { %2052 = vmatpush.bf16.msrb.mxu1 %v3886_v54  ;;  %v3990_v54 = vor.u32 %v4908_v44, %v3987_v45  ;;  %v4948_v44 = vld [vmem:[%s5882_s24 + $0x1724] sm:$0xf]  ;;  %v4286_v45 = vor.u32 %v4982_v34, %v4283_v36  ;;  %v4187_v36 = vld [vmem:[%s5882_s24 + $0x1a90] sm:$0xf0] }
 0x107   : >> { %2066 = vmatpush.bf16.msrb.mxu2 %v3950_v55  ;;  %v3915_v55 = vld [vmem:[%s5882_s24 + $0x550] sm:$0xf0]  ;;  %v4964_v47 = vld [vmem:[%s5882_s24 + $0x1c24] sm:$0xf] }
 0x108   : >> { %2080 = vmatpush.bf16.msrb.mxu3 %v4014_v59  ;;  %v4099_v59 = vld [vmem:[%s5882_s24 + $0x13b0] sm:$0xf0]  ;;  %v4958_v34 = vld [vmem:[%s5882_s24 + $0x1a44] sm:$0xf] }
 0x109   : >> { %2039 = vmatpush.bf16.msrb.mxu0 %v4258_v15  ;;  %v3854_v15 = vor.u32 %v4874_v51, %v3851_v52  ;;  %v4102_v20 = vor.u32 %v4936_v58, %v4099_v59  ;;  %v4086_v51 = vor.u32 %v4932_v42, %v4083_v43  ;;  %v4203_v58 = vld [vmem:[%s5882_s24 + $0x1bd0] sm:$0xf0]  ;;  %v4978_v59 = vld [vmem:[%s5882_s24 + $0x2084] sm:$0xf]  ;;  %v4190_v43 = vor.u32 %v4958_v34, %v4187_v36  ;;  %v4472_v36 = vld [vmem:[%s6170_s6 + $0x16c] sm:$0xf0] }
 0x10a   : >> { %2053 = vmatpush.bf16.msrb.mxu1 %v3878_v16  ;;  %v3918_v16 = vor.u32 %v4890_v53, %v3915_v55  ;;  %v4214_v53 = vor.u32 %v4964_v47, %v4211_v48  ;;  %v4946_v55 = vld [vmem:[%s5882_s24 + $0x1684] sm:$0xf]  ;;  %v4115_v48 = vld [vmem:[%s5882_s24 + $0x14f0] sm:$0xf0] }
 0x10b   : >> { %2067 = vmatpush.bf16.msrb.mxu2 %v3942_v17  ;;  %v4984_v17 = vld [vmem:[%s5882_s24 + $0x2264] sm:$0xf]  ;;  %v5029_v34 = vld [vmem:[%s6170_s6 + $0x154] sm:$0xf] }
 0x10c   : >> { %2081 = vmatpush.bf16.msrb.mxu3 %v4006_v21  ;;  %v4166_v21 = vor.u32 %v4952_v60, %v4163_v62  ;;  %v4294_v26 = vor.u32 %v4984_v17, %v4291_v18  ;;  %v4206_v62 = vor.u32 %v4962_v57, %v4203_v58  ;;  %v4131_v17 = vld [vmem:[%s5882_s24 + $0x1630] sm:$0xf0]  ;;  %v4960_v18 = vld [vmem:[%s5882_s24 + $0x1ae4] sm:$0xf] }
 0x10d   : >> { %2040 = vmatpush.bf16.msrb.mxu0 %v4250_v27  ;;  %v4155_v27 = vld [vmem:[%s5882_s24 + $0x1810] sm:$0xf0] }
 0x10e   : >> { %2054 = vmatpush.bf16.msrb.mxu1 %v3870_v28  ;;  %v4966_v28 = vld [vmem:[%s5882_s24 + $0x1cc4] sm:$0xf]  ;;  %v4107_v58 = vld [vmem:[%s5882_s24 + $0x1450] sm:$0xf0] }
 0x10f   : >> { %2068 = vmatpush.bf16.msrb.mxu2 %v3934_v30  ;;  %v4219_v30 = vld [vmem:[%s5882_s24 + $0x1d10] sm:$0xf0] }
 0x110   : >> { %2082 = vmatpush.bf16.msrb.mxu3 %v3998_v40  ;;  %v4158_v40 = vor.u32 %v4950_v25, %v4155_v27  ;;  %v4222_v41 = vor.u32 %v4966_v28, %v4219_v30  ;;  %v4926_v25 = vld [vmem:[%s5882_s24 + $0x1044] sm:$0xf]  ;;  %v4123_v30 = vld [vmem:[%s5882_s24 + $0x1590] sm:$0xf0] }
 0x111   : >> { %2041 = vmatpush.bf16.msrb.mxu0 %v4242_v46  ;;  %v4147_v46 = vld [vmem:[%s5882_s24 + $0x1770] sm:$0xf0]  ;;  %v4942_v27 = vld [vmem:[%s5882_s24 + $0x1544] sm:$0xf] }
 0x112   : >> { %2055 = vmatpush.bf16.msrb.mxu1 %v3862_v49  ;;  %v4980_v49 = vld [vmem:[%s5882_s24 + $0x2124] sm:$0xf]  ;;  %v4150_v52 = vor.u32 %v4948_v44, %v4147_v46  ;;  %v4126_v42 = vor.u32 %v4942_v27, %v4123_v30  ;;  %v4470_v27 = vld [vmem:[%s6170_s6 + $0x150] sm:$0xf] }
 0x113   : >> { %2069 = vmatpush.bf16.msrb.mxu2 %v3926_v50  ;;  %v4275_v50 = vld [vmem:[%s5882_s24 + $0x2170] sm:$0xf0]  ;;  %v4924_v44 = vld [vmem:[%s5882_s24 + $0xfa4] sm:$0xf] }
 0x114   : >> { %2083 = vmatpush.bf16.msrb.mxu3 %v3990_v54  ;;  %v4930_v54 = vld [vmem:[%s5882_s24 + $0x1184] sm:$0xf] }
 0x115   : >> { %2042 = vmatpush.bf16.msrb.mxu0 %v4234_v61  ;;  %v4142_v61 = vor.u32 %v4946_v55, %v4139_v56  ;;  %v4940_v46 = vld [vmem:[%s5882_s24 + $0x14a4] sm:$0xf] }
 0x116   : >> { %2056 = vmatpush.bf16.msrb.mxu1 %v3854_v15  ;;  %v4944_v15 = vld [vmem:[%s5882_s24 + $0x15e4] sm:$0xf] }
 0x117   : >> { %2070 = vmatpush.bf16.msrb.mxu2 %v3918_v16  ;;  %v4134_v23 = vor.u32 %v4944_v15, %v4131_v17  ;;  %v4922_v55 = vld [vmem:[%s5882_s24 + $0xf04] sm:$0xf]  ;;  %v1104_v17 = vpop.f32.mrf.mxu1 }
 0x118   : >> { %2084 = vmatpush.bf16.msrb.mxu3 %v3982_v19  ;;  %2043 = vmatmul.bf16.vlgmr.msrb.gmra.mxu0 %v5824_v38  ;;  %v4195_v19 = vld [vmem:[%s5882_s24 + $0x1b30] sm:$0xf0]  ;;  %v4938_v56 = vld [vmem:[%s5882_s24 + $0x1404] sm:$0xf] }
 0x119   : >> { %2091 = vmatpush.bf16.msra.mxu0 %v4102_v20  ;;  %2057 = vmatmul.bf16.vlgmr.msrb.gmra.mxu1 %v5736_v29  ;;  %v4267_v29 = vld [vmem:[%s5882_s24 + $0x20d0] sm:$0xf0]  ;;  %v4976_v20 = vld [vmem:[%s5882_s24 + $0x1fe4] sm:$0xf]  ;;  %v4198_v24 = vor.u32 %v4960_v18, %v4195_v19  ;;  %v1118_v18 = vpop.f32.mrf.mxu2 }
 0x11a   : >> { %2105 = vmatpush.bf16.msra.mxu1 %v4166_v21  ;;  %2071 = vmatmul.bf16.vlgmr.msrb.gmra.mxu2 %v5746_v33  ;;  %v4075_v33 = vld [vmem:[%s5882_s24 + $0x11d0] sm:$0xf0]  ;;  %v4270_v16 = vor.u32 %v4978_v59, %v4267_v29  ;;  %v4954_v59 = vld [vmem:[%s5882_s24 + $0x1904] sm:$0xf] }
 0x11b   : >> { %2119 = vmatpush.bf16.msra.mxu2 %v4230_v22  ;;  %2085 = vmatmul.bf16.vlgmr.msrb.gmra.mxu3 %v5742_v32  ;;  %v4278_v32 = vor.u32 %v4980_v49, %v4275_v50  ;;  %v4078_v60 = vor.u32 %v4930_v54, %v4075_v33  ;;  %v4259_v21 = vld [vmem:[%s5882_s24 + $0x2030] sm:$0xf0]  ;;  %v4070_v22 = vor.u32 %v4928_v63, %v4067_v0  ;;  %v4956_v49 = vld [vmem:[%s5882_s24 + $0x19a4] sm:$0xf] }
 0x11c   : >> { %2133 = vmatpush.bf16.msra.mxu3 %v4294_v26  ;;  %v4059_v26 = vld [vmem:[%s5882_s24 + $0x1090] sm:$0xf0]  ;;  %v4262_v28 = vor.u32 %v4976_v20, %v4259_v21  ;;  %v4118_v54 = vor.u32 %v4940_v46, %v4115_v48  ;;  %v4110_v63 = vor.u32 %v4938_v56, %v4107_v58  ;;  %v1132_v20 = vpop.f32.mrf.mxu3  ;;  %v4386_v58 = vld [vmem:[%s6170_s6 + $0xa8] sm:$0xf] }
 0x11d   : >> { %2092 = vmatpush.bf16.msra.mxu0 %v4094_v37  ;;  %v4974_v37 = vld [vmem:[%s5882_s24 + $0x1f44] sm:$0xf]  ;;  %v4179_v50 = vld [vmem:[%s5882_s24 + $0x19f0] sm:$0xf0] }
 0x11e   : >> { %2106 = vmatpush.bf16.msra.mxu1 %v4158_v40  ;;  %v4251_v40 = vld [vmem:[%s5882_s24 + $0x1f90] sm:$0xf0]  ;;  %v4182_v33 = vor.u32 %v4956_v49, %v4179_v50 }
 0x11f   : >> { %2120 = vmatpush.bf16.msra.mxu2 %v4222_v41  ;;  %v4062_v41 = vor.u32 %v4926_v25, %v4059_v26  ;;  %v4254_v47 = vor.u32 %v4974_v37, %v4251_v40  ;;  %v4171_v29 = vld [vmem:[%s5882_s24 + $0x1950] sm:$0xf0]  ;;  %v4475_v37 = vor.u32 %v5029_v34, %v4472_v36 }
 0x120   : >> { %2134 = vmatpush.bf16.msra.mxu3 %v4286_v45  ;;  %v4051_v45 = vld [vmem:[%s5882_s24 + $0xff0] sm:$0xf0]  ;;  %v4174_v0 = vor.u32 %v4954_v59, %v4171_v29  ;;  %v5011_v59 = vld [vmem:[%s6170_s6 + $0xc0] sm:$0xf0] }
 0x121   : >> { %2093 = vmatpush.bf16.msra.mxu0 %v4086_v51  ;;  %v4972_v51 = vld [vmem:[%s5882_s24 + $0x1ea4] sm:$0xf]  ;;  %v4387_v29 = vor.u32 %v5011_v59, %v4386_v58  ;;  %v5030_v58 = vld [vmem:[%s6170_s6 + $0x15c] sm:$0xf]  ;;  %v4480_v59 = vld [vmem:[%s6170_s6 + $0x174] sm:$0xf0] }
 0x122   : >> { %2107 = vmatpush.bf16.msra.mxu1 %v4150_v52  ;;  %v4243_v52 = vld [vmem:[%s5882_s24 + $0x1ef0] sm:$0xf0] }
 0x123   : >> { %2121 = vmatpush.bf16.msra.mxu2 %v4214_v53  ;;  %v4054_v53 = vor.u32 %v4924_v44, %v4051_v45  ;;  %v4246_v57 = vor.u32 %v4972_v51, %v4243_v52  ;;  %v5022_v44 = vld [vmem:[%s6170_s6 + $0x11c] sm:$0xf]  ;;  %v4444_v45 = vld [vmem:[%s6170_s6 + $0x134] sm:$0xf0]  ;;  %v4414_v51 = vld [vmem:[%s6170_s6 + $0xe0] sm:$0xf] }
 0x124   : >> { %2135 = vmatpush.bf16.msra.mxu3 %v4278_v32  ;;  %v4043_v32 = vld [vmem:[%s5882_s24 + $0xf50] sm:$0xf0]  ;;  %v1134_v26 = vpop.f32.mrf.mxu3  ;;  %v4447_v48 = vor.u32 %v5022_v44, %v4444_v45  ;;  %v5018_v52 = vld [vmem:[%s6170_s6 + $0xf8] sm:$0xf0]  ;;  %v4987_v44 = vld [vmem:[%s6170_s6 + $0x4] sm:$0xf] }
 0x125   : >> { %2094 = vmatpush.bf16.msra.mxu0 %v4078_v60  ;;  %v4970_v60 = vld [vmem:[%s5882_s24 + $0x1e04] sm:$0xf]  ;;  %v4304_v45 = vld [vmem:[%s6170_s6 + $0x1c] sm:$0xf0] }
 0x126   : >> { %2108 = vmatpush.bf16.msra.mxu1 %v4142_v61  ;;  %v4235_v61 = vld [vmem:[%s5882_s24 + $0x1e50] sm:$0xf0] }
 0x127   : >> { %2122 = vmatpush.bf16.msra.mxu2 %v4206_v62  ;;  %v4046_v62 = vor.u32 %v4922_v55, %v4043_v32  ;;  %v4238_v15 = vor.u32 %v4970_v60, %v4235_v61  ;;  %v5008_v60 = vld [vmem:[%s6170_s6 + $0xac] sm:$0xf]  ;;  %v4388_v61 = vld [vmem:[%s6170_s6 + $0xc4] sm:$0xf0] }
 0x128   : >> { %2136 = vmatpush.bf16.msra.mxu3 %v4270_v16  ;;  %v1090_v16 = vpop.f32.mrf.mxu0 }
 0x129   : >> { %2095 = vmatpush.bf16.msra.mxu0 %v4070_v22  ;;  %v5036_v22 = vld [vmem:[%s6170_s6 + $0x18c] sm:$0xf]  ;;  %v1105_v40 = vadd.f32 %v1104_v17, %v1090_v16  ;;  %v4358_v17 = vld [vmem:[%s6170_s6 + $0x70] sm:$0xf] }
 0x12a   : >> { %2109 = vmatpush.bf16.msra.mxu1 %v4134_v23  ;;  %v4500_v23 = vld [vmem:[%s6170_s6 + $0x1a4] sm:$0xf0] }
 0x12b   : >> { %2123 = vmatpush.bf16.msra.mxu2 %v4198_v24  ;;  %v4503_v24 = vor.u32 %v5036_v22, %v4500_v23  ;;  %v1119_v49 = vadd.f32 %v1118_v18, %v1105_v40  ;;  %v5004_v18 = vld [vmem:[%s6170_s6 + $0x88] sm:$0xf0] }
 0x12c   : >> { %2137 = vmatpush.bf16.msra.mxu3 %v4262_v28  ;;  %v5032_v28 = vld [vmem:[%s6170_s6 + $0x168] sm:$0xf0]  ;;  %v6184_v50 = vpop.f32.mrf.mxu3 }
 0x12d   : >> { %2096 = vmatpush.bf16.msra.mxu0 %v4062_v41  ;;  %v4471_v30 = vor.u32 %v5032_v28, %v4470_v27  ;;  %v4442_v41 = vld [vmem:[%s6170_s6 + $0x118] sm:$0xf]  ;;  %v4994_v28 = vld [vmem:[%s6170_s6 + $0x3c] sm:$0xf] }
 0x12e   : >> { %2110 = vmatpush.bf16.msra.mxu1 %v4126_v42  ;;  %v5025_v42 = vld [vmem:[%s6170_s6 + $0x130] sm:$0xf0] }
 0x12f   : >> { %2124 = vmatpush.bf16.msra.mxu2 %v4190_v43  ;;  %v4443_v43 = vor.u32 %v5025_v42, %v4442_v41  ;;  %v4302_v41 = vld [vmem:[%s6170_s6] sm:$0xf]  ;;  %v4990_v42 = vld [vmem:[%s6170_s6 + $0x18] sm:$0xf0] }
 0x130   : >> { %2138 = vmatpush.bf16.msra.mxu3 %v4254_v47  ;;  %v1092_v19 = vpop.f32.mrf.mxu0 }
 0x131   : >> { %2097 = vmatpush.bf16.msra.mxu0 %v4054_v53  ;;  %v4415_v53 = vor.u32 %v5018_v52, %v4414_v51  ;;  %v5037_v52 = vld [vmem:[%s6170_s6 + $0x194] sm:$0xf] }
 0x132   : >> { %2111 = vmatpush.bf16.msra.mxu1 %v4118_v54  ;;  %v5015_v54 = vld [vmem:[%s6170_s6 + $0xe4] sm:$0xf] }
 0x133   : >> { %2125 = vmatpush.bf16.msra.mxu2 %v4182_v33  ;;  %v4416_v33 = vld [vmem:[%s6170_s6 + $0xfc] sm:$0xf0] }
 0x134   : >> { %2139 = vmatpush.bf16.msra.mxu3 %v4246_v57  ;;  %v4419_v56 = vor.u32 %v5015_v54, %v4416_v33  ;;  %v1133_v57 = vadd.f32 %v1132_v20, %v1119_v49  ;;  %v5001_v20 = vld [vmem:[%s6170_s6 + $0x74] sm:$0xf]  ;;  %v5040_v49 = vld [vmem:[%s6170_s6 + $0x1a8] sm:$0xf0] }
 0x135   : >> { %2098 = vmatpush.bf16.msra.mxu0 %v4046_v62 }
 0x136   : >> { %2112 = vmatpush.bf16.msra.mxu1 %v4110_v63  ;;  %v4391_v63 = vor.u32 %v5008_v60, %v4388_v61  ;;  %v4722_v61 = vld [vmem:[%s6170_s6 + $0x348] sm:$0xf] }
 0x137   : >> { %2126 = vmatpush.bf16.msra.mxu2 %v4174_v0 }
 0x138   : >> { %2140 = vmatpush.bf16.msra.mxu3 %v4238_v15  ;;  %2099 = vmatmul.bf16.vlgmr.msra.gmra.mxu0 %v5750_v35  ;;  %v1106_v35 = vpop.f32.mrf.mxu1  ;;  %v1146_v25 = vpop.f32.mrf.mxu0 }
 0x139   : >> { %2113 = vmatmul.bf16.vlgmr.msra.gmra.mxu1 %v5817_v31  ;;  %v1120_v31 = vpop.f32.mrf.mxu2  ;;  %v1107_v55 = vadd.f32 %v1106_v35, %v1092_v19  ;;  %v1147_v0 = vadd.f32 %v1146_v25, %v1133_v57  ;;  %v4359_v19 = vor.u32 %v5004_v18, %v4358_v17  ;;  %v4360_v35 = vld [vmem:[%s6170_s6 + $0x8c] sm:$0xf0]  ;;  %v4997_v25 = vld [vmem:[%s6170_s6 + $0x50] sm:$0xf0]  ;;  %v5092_v17 = vld [vmem:[%s6170_s6 + $0x34c] sm:$0xf] }
 0x13a   : >> { %2127 = vmatmul.bf16.vlgmr.msra.gmra.mxu2 %v5828_v39  ;;  %v5039_v39 = vld [vmem:[%s6170_s6 + $0x1a0] sm:$0xf0]  ;;  %v5033_v57 = vld [vmem:[%s6170_s6 + $0x170] sm:$0xf0]  ;;  %v4724_v18 = vld [vmem:[%s6170_s6 + $0x364] sm:$0xf0] }
 0x13b   : >> { %2141 = vmatmul.bf16.vlgmr.msra.gmra.mxu3 %v5824_v38  ;;  %v4498_v38 = vld [vmem:[%s6170_s6 + $0x188] sm:$0xf]  ;;  %2984 = vmatpush.bf16.msrb.mxu2 %v4503_v24  ;;  %v1121_v62 = vadd.f32 %v1120_v31, %v1107_v55  ;;  %v4363_v31 = vor.u32 %v5001_v20, %v4360_v35  ;;  %v4330_v24 = vld [vmem:[%s6170_s6 + $0x38] sm:$0xf]  ;;  %v4452_v20 = vld [vmem:[%s6170_s6 + $0x13c] sm:$0xf0] }
 0x13c   : >> { %v4499_v21 = vor.u32 %v5039_v39, %v4498_v38  ;;  %v6198_v39 = vpop.f32.mrf.mxu3  ;;  %v4331_v27 = vor.u32 %v4997_v25, %v4330_v24 }
 0x13d   : >> { %v1135_v38 = vadd.f32 %v1134_v26, %v1121_v62  ;;  %v5095_v62 = vld [vmem:[%s6170_s6 + $0x360] sm:$0xf0] }
 0x13e   : >> { %2956 = vmatpush.bf16.msrb.mxu0 %v4499_v21 }
 0x13f   : >> { %2985 = vmatpush.bf16.msrb.mxu2 %v4475_v37 }
 0x140   : >> { %v1160_v46 = vpop.f32.mrf.mxu1  ;;  %v1148_v32 = vpop.f32.mrf.mxu0 }
 0x141   : >> { %v1174_v47 = vpop.f32.mrf.mxu2  ;;  %v1161_v22 = vadd.f32 %v1160_v46, %v1147_v0  ;;  %v1149_v23 = vadd.f32 %v1148_v32, %v1135_v38  ;;  %v4478_v32 = vld [vmem:[%s6170_s6 + $0x158] sm:$0xf]  ;;  %v4723_v0 = vor.u32 %v5095_v62, %v4722_v61  ;;  %v4727_v38 = vor.u32 %v5092_v17, %v4724_v18  ;;  %v4396_v61 = vld [vmem:[%s6170_s6 + $0xcc] sm:$0xf0]  ;;  %v4638_v62 = vld [vmem:[%s6170_s6 + $0x2a0] sm:$0xf] }
 0x142   : >> { %2957 = vmatpush.bf16.msrb.mxu0 %v4471_v30  ;;  %v4332_v30 = vld [vmem:[%s6170_s6 + $0x54] sm:$0xf0]  ;;  %v4479_v60 = vor.u32 %v5033_v57, %v4478_v32 }
 0x143   : >> { %2986 = vmatpush.bf16.msrb.mxu2 %v4447_v48  ;;  %v4335_v26 = vor.u32 %v4994_v28, %v4332_v30  ;;  %v6206_v34 = vadd.f32 %v1174_v47, %v1161_v22  ;;  %v4307_v47 = vor.u32 %v4987_v44, %v4304_v45  ;;  %v4506_v48 = vld [vmem:[%s6170_s6 + $0x190] sm:$0xf]  ;;  %2970 = vmatpush.bf16.msrb.mxu1 %v4723_v0  ;;  %v5088_v22 = vld [vmem:[%s6170_s6 + $0x328] sm:$0xf0]  ;;  %v5019_v28 = vld [vmem:[%s6170_s6 + $0x100] sm:$0xf0] }
 0x144   : >> { %v4507_v51 = vor.u32 %v5040_v49, %v4506_v48  ;;  %v6225_v55 = vpop.f32.mrf.mxu3  ;;  %v5085_v30 = vld [vmem:[%s6170_s6 + $0x314] sm:$0xf]  ;;  %2998 = vmatpush.bf16.msrb.mxu3 %v4727_v38  ;;  %v4366_v17 = vld [vmem:[%s6170_s6 + $0x78] sm:$0xf]  ;;  %v5071_v38 = vld [vmem:[%s6170_s6 + $0x2a4] sm:$0xf] }
 0x145   : >> { %v4295_v54 = vmul.f32 -1.442695, %v6206_v34 }
 0x146   : >> { %2958 = vmatpush.bf16.msrb.mxu0 %v4443_v43  ;;  %v4303_v43 = vor.u32 %v4990_v42, %v4302_v41  ;;  %v5016_v42 = vld [vmem:[%s6170_s6 + $0xec] sm:$0xf] }
 0x147   : >> { %2987 = vmatpush.bf16.msrb.mxu2 %v4419_v56  ;;  %5204 = vpow2.f32 %v4295_v54 }
 0x148   : >> { %v1162_v15 = vpop.f32.mrf.mxu1  ;;  %v6200_v21 = vpop.f32.mrf.mxu0 }
 0x149   : >> { %v1176_v16 = vpop.f32.mrf.mxu2  ;;  %v1163_v36 = vadd.f32 %v1162_v15, %v1149_v23  ;;  %v4450_v15 = vld [vmem:[%s6170_s6 + $0x120] sm:$0xf] }
 0x14a   : >> { %2959 = vmatpush.bf16.msrb.mxu0 %v4415_v53  ;;  %v4508_v53 = vld [vmem:[%s6170_s6 + $0x1ac] sm:$0xf0] }
 0x14b   : >> { %2988 = vmatpush.bf16.msrb.mxu2 %v4391_v63  ;;  %v6216_v46 = vadd.f32 %v1176_v16, %v1163_v36  ;;  %v4511_v56 = vor.u32 %v5037_v52, %v4508_v53  ;;  %v4483_v63 = vor.u32 %v5030_v58, %v4480_v59  ;;  %v5026_v16 = vld [vmem:[%s6170_s6 + $0x138] sm:$0xf0]  ;;  %v4696_v36 = vld [vmem:[%s6170_s6 + $0x32c] sm:$0xf0]  ;;  %v5081_v52 = vld [vmem:[%s6170_s6 + $0x2f0] sm:$0xf0] }
 0x14c   : >> { %v4451_v35 = vor.u32 %v5026_v16, %v4450_v15  ;;  %v4699_v45 = vor.u32 %v5085_v30, %v4696_v36  ;;  %v4394_v53 = vld [vmem:[%s6170_s6 + $0xb0] sm:$0xf]  ;;  %v5012_v58 = vld [vmem:[%s6170_s6 + $0xc8] sm:$0xf0]  ;;  %v5078_v59 = vld [vmem:[%s6170_s6 + $0x2dc] sm:$0xf] }
 0x14d   : >> { %v5205_v49 = vpop.eup %5204  ;;  %v5074_v16 = vld [vmem:[%s6170_s6 + $0x2b8] sm:$0xf0]  ;;  %v4368_v30 = vld [vmem:[%s6170_s6 + $0x94] sm:$0xf0] }
 0x14e   : >> { %2960 = vmatpush.bf16.msrb.mxu0 %v4387_v29  ;;  %v4297_v29 = vmul.f32 -1.442695, %v6216_v46  ;;  %2999 = vmatpush.bf16.msrb.mxu3 %v4699_v45  ;;  %v6271_v18 = vadd.f32 1.0, %v5205_v49  ;;  %v4338_v45 = vld [vmem:[%s6170_s6 + $0x40] sm:$0xf] }
 0x14f   : >> { %2989 = vmatpush.bf16.msrb.mxu2 %v4363_v31  ;;  %v4694_v31 = vld [vmem:[%s6170_s6 + $0x310] sm:$0xf]  ;;  %v5064_v49 = vld [vmem:[%s6170_s6 + $0x26c] sm:$0xf] }
 0x150   : >> { %v6208_v37 = vpop.f32.mrf.mxu1  ;;  %v6223_v33 = vpop.f32.mrf.mxu0  ;;  %v4695_v25 = vor.u32 %v5088_v22, %v4694_v31  ;;  %5206 = vpow2.f32 %v4297_v29  ;;  %v4668_v29 = vld [vmem:[%s6170_s6 + $0x2f4] sm:$0xf0]  ;;  %vm2168_vm0 = vweird.f32 %v6271_v18 }
 0x151   : >> { %v6210_v40 = vpop.f32.mrf.mxu2  ;;  %v4671_v0 = vor.u32 %v5078_v59, %v4668_v29  ;;  %5208 = vrcp.f32 %v6271_v18  ;;  %v4582_v29 = vld [vmem:[%s6170_s6 + $0x230] sm:$0xf] }
 0x152   : >> { %2961 = vmatpush.bf16.msrb.mxu0 %v4359_v19  ;;  %v5023_v19 = vld [vmem:[%s6170_s6 + $0x124] sm:$0xf]  ;;  %2971 = vmatpush.bf16.msrb.mxu1 %v4695_v25 }
 0x153   : >> { %2990 = vmatpush.bf16.msrb.mxu2 %v4335_v26  ;;  %v4455_v26 = vor.u32 %v5023_v19, %v4452_v20  ;;  %v4639_v20 = vor.u32 %v5074_v16, %v4638_v62  ;;  %3000 = vmatpush.bf16.msrb.mxu3 %v4671_v0  ;;  %v4991_v0 = vld [vmem:[%s6170_s6 + $0x20] sm:$0xf0]  ;;  %v4584_v16 = vld [vmem:[%s6170_s6 + $0x24c] sm:$0xf0] }
 0x156   : >> { %2962 = vmatpush.bf16.msrb.mxu0 %v4331_v27  ;;  %v4422_v27 = vld [vmem:[%s6170_s6 + $0xe8] sm:$0xf]  ;;  %v5207_v54 = vpop.eup %5206 }
 0x157   : >> { %2991 = vmatpush.bf16.msrb.mxu2 %v4307_v47  ;;  %v4423_v44 = vor.u32 %v5019_v28, %v4422_v27  ;;  %v6254_v47 = vpop.f32.mrf.mxu3  ;;  %v6273_v19 = vadd.f32 1.0, %v5207_v54  ;;  %v4640_v27 = vld [vmem:[%s6170_s6 + $0x2bc] sm:$0xf0]  ;;  %v5002_v28 = vld [vmem:[%s6170_s6 + $0x7c] sm:$0xf] }
 0x158   : >> { %v6242_v23 = vpop.f32.mrf.mxu1  ;;  %v6250_v41 = vpop.f32.mrf.mxu0  ;;  %v4643_v36 = vor.u32 %v5071_v38, %v4640_v27 }
 0x159   : >> { %v6244_v24 = vpop.f32.mrf.mxu2  ;;  %5210 = vrcp.f32 %v6273_v19  ;;  %vm2198_vm3 = vweird.f32 %v6273_v19 }
 0x15a   : >> { %2963 = vmatpush.bf16.msrb.mxu0 %v4303_v43  ;;  %v4424_v43 = vld [vmem:[%s6170_s6 + $0x104] sm:$0xf0]  ;;  %3001 = vmatpush.bf16.msrb.mxu3 %v4643_v36  ;;  %v4554_v36 = vld [vmem:[%s6170_s6 + $0x1f8] sm:$0xf] }
 0x15b   : >> { %3040 = vmatpush.bf16.msra.mxu2 %v4511_v56  ;;  %v4427_v48 = vor.u32 %v5016_v42, %v4424_v43  ;;  %v4371_v42 = vor.u32 %v5002_v28, %v4368_v30  ;;  %v4610_v43 = vld [vmem:[%s6170_s6 + $0x268] sm:$0xf] }
 0x15e   : >> { %3012 = vmatpush.bf16.msra.mxu0 %v4507_v51  ;;  %v4666_v51 = vld [vmem:[%s6170_s6 + $0x2d8] sm:$0xf] }
 0x15f   : >> { %3041 = vmatpush.bf16.msra.mxu2 %v4483_v63  ;;  %v4667_v57 = vor.u32 %v5081_v52, %v4666_v51  ;;  %v4395_v63 = vor.u32 %v5012_v58, %v4394_v53  ;;  %v6279_v22 = vpop.f32.mrf.mxu3  ;;  %v4612_v51 = vld [vmem:[%s6170_s6 + $0x284] sm:$0xf0]  ;;  %v4340_v58 = vld [vmem:[%s6170_s6 + $0x5c] sm:$0xf0] }
 0x160   : >> { %v6259_v32 = vpop.f32.mrf.mxu1  ;;  %v6277_v31 = vpop.f32.mrf.mxu0  ;;  %v4615_v54 = vor.u32 %v5064_v49, %v4612_v51  ;;  %v4526_v51 = vld [vmem:[%s6170_s6 + $0x1c0] sm:$0xf] }
 0x161   : >> { %v6261_v56 = vpop.f32.mrf.mxu2  ;;  %2972 = vmatpush.bf16.msrb.mxu1 %v4667_v57  ;;  %v4995_v57 = vld [vmem:[%s6170_s6 + $0x44] sm:$0xf] }
 0x162   : >> { %3013 = vmatpush.bf16.msra.mxu0 %v4479_v60  ;;  %v5009_v60 = vld [vmem:[%s6170_s6 + $0xb4] sm:$0xf]  ;;  %v4343_v59 = vor.u32 %v4995_v57, %v4340_v58  ;;  %3002 = vmatpush.bf16.msrb.mxu3 %v4615_v54  ;;  %v1975_v57 = vadd.f32 %v6279_v22, %v6261_v56  ;;  %v4702_v22 = vld [vmem:[%s6170_s6 + $0x318] sm:$0xf] }
 0x163   : >> { %3042 = vmatpush.bf16.msra.mxu2 %v4455_v26  ;;  %v4399_v15 = vor.u32 %v5009_v60, %v4396_v61  ;;  %v1203_v26 = vadd.f32 %v6200_v21, %v6184_v50  ;;  %v4998_v21 = vld [vmem:[%s6170_s6 + $0x58] sm:$0xf0]  ;;  %v5060_v60 = vld [vmem:[%s6170_s6 + $0x248] sm:$0xf0]  ;;  %v4310_v61 = vld [vmem:[%s6170_s6 + $0x8] sm:$0xf] }
 0x164   : >> { %v4339_v53 = vor.u32 %v4998_v21, %v4338_v45 }
 0x165   : >> { %2973 = vmatpush.bf16.msrb.mxu1 %v4639_v20  ;;  %v1217_v52 = vadd.f32 %v6208_v37, %v1203_v26 }
 0x166   : >> { %3014 = vmatpush.bf16.msra.mxu0 %v4451_v35  ;;  %v5005_v35 = vld [vmem:[%s6170_s6 + $0x90] sm:$0xf0] }
 0x167   : >> { %3043 = vmatpush.bf16.msra.mxu2 %v4427_v48  ;;  %v4367_v25 = vor.u32 %v5005_v35, %v4366_v17  ;;  %v1205_v48 = vadd.f32 %v6223_v33, %v6198_v39  ;;  %v6310_v17 = vpop.eup %5208  ;;  %v1231_v20 = vadd.f32 %v6210_v40, %v1217_v52  ;;  %v4311_v35 = vor.u32 %v4991_v0, %v4310_v61  ;;  %v1976_v30 = vpop.f32.mrf.mxu3  ;;  %v5046_v52 = vld [vmem:[%s6170_s6 + $0x1d8] sm:$0xf0] }
 0x168   : >> { %v6299_v39 = vpop.f32.mrf.mxu1  ;;  %v6315_v27 = vpop.eup %5210  ;;  %v2164_v45 = vmul.f32 %v6310_v17, %v6271_v18  ;;  %v4527_v58 = vor.u32 %v5046_v52, %v4526_v51  ;;  %vm2169_vm1 = vweird.f32 %v6310_v17  ;;  %v4676_v51 = vld [vmem:[%s6170_s6 + $0x2fc] sm:$0xf0]  ;;  %v2174_v52 = vand.u32 2147483648, %v6271_v18 }
 0x169   : >> { %v6301_v33 = vpop.f32.mrf.mxu2  ;;  %v1219_v37 = vadd.f32 %v6242_v23, %v1205_v48  ;;  %v4312_v23 = vld [vmem:[%s6170_s6 + $0x24] sm:$0xf0]  ;;  %v1245_v48 = vadd.f32 %v6225_v55, %v1231_v20  ;;  %v4730_v55 = vld [vmem:[%s6170_s6 + $0x350] sm:$0xf]  ;;  %v5089_v20 = vld [vmem:[%s6170_s6 + $0x330] sm:$0xf0]  ;;  %vm2199_vm2 = vweird.f32 %v6315_v27 }
 0x16a   : >> { %3015 = vmatpush.bf16.msra.mxu0 %v4423_v44  ;;  %v5067_v44 = vld [vmem:[%s6170_s6 + $0x280] sm:$0xf0]  ;;  %vm6372_vm4 = vmor %vm2168_vm0, %vm2169_vm1 }
 0x16b   : >> { %3044 = vmatpush.bf16.msra.mxu2 %v4399_v15  ;;  %v4611_v50 = vor.u32 %v5067_v44, %v4610_v43  ;;  %v5057_v15 = vld [vmem:[%s6170_s6 + $0x234] sm:$0xf]  ;;  %v1233_v28 = vadd.f32 %v6244_v24, %v1219_v37  ;;  %v5050_v43 = vld [vmem:[%s6170_s6 + $0x1fc] sm:$0xf]  ;;  %v4556_v44 = vld [vmem:[%s6170_s6 + $0x214] sm:$0xf0]  ;;  %v2194_v24 = vmul.f32 %v6315_v27, %v6273_v19  ;;  %v1259_v54 = vadd.f32 %v6250_v41, %v1245_v48 }
 0x16c   : >> { %v4587_v38 = vor.u32 %v5057_v15, %v4584_v16  ;;  %v5093_v15 = vld [vmem:[%s6170_s6 + $0x354] sm:$0xf]  ;;  %v4732_v16 = vld [vmem:[%s6170_s6 + $0x36c] sm:$0xf0]  ;;  %vm6379_vm5 = vmor %vm2198_vm3, %vm2199_vm2 }
 0x16d   : >> { %2974 = vmatpush.bf16.msrb.mxu1 %v4611_v50  ;;  %v4559_v50 = vor.u32 %v5050_v43, %v4556_v44  ;;  %v1247_v21 = vadd.f32 %v6254_v47, %v1233_v28  ;;  %v2195_v0 = vsub.f32 1.0, %v2194_v24  ;;  %v4735_v56 = vor.u32 %v5093_v15, %v4732_v16  ;;  %v5082_v24 = vld [vmem:[%s6170_s6 + $0x2f8] sm:$0xf0]  ;;  %v5072_v15 = vld [vmem:[%s6170_s6 + $0x2ac] sm:$0xf] }
 0x16e   : >> { %3016 = vmatpush.bf16.msra.mxu0 %v4395_v63  ;;  %v4583_v63 = vor.u32 %v5060_v60, %v4582_v29  ;;  %3003 = vmatpush.bf16.msrb.mxu3 %v4587_v38  ;;  %v5096_v29 = vld [vmem:[%s6170_s6 + $0x368] sm:$0xf0]  ;;  %v4648_v16 = vld [vmem:[%s6170_s6 + $0x2c4] sm:$0xf0] }
 0x16f   : >> { %3045 = vmatpush.bf16.msra.mxu2 %v4371_v42  ;;  %v5053_v42 = vld [vmem:[%s6170_s6 + $0x210] sm:$0xf0]  ;;  %v1261_v47 = vadd.f32 %v6277_v31, %v1247_v21  ;;  %v4731_v37 = vor.u32 %v5096_v29, %v4730_v55  ;;  %v4703_v31 = vor.u32 %v5089_v20, %v4702_v22  ;;  %v2202_v55 = vand.u32 2147483647, %v6273_v19 }
 0x170   : >> { %v4555_v40 = vor.u32 %v5053_v42, %v4554_v36  ;;  %v1977_v36 = vadd.f32 %v1976_v30, %v6301_v33  ;;  %v5086_v42 = vld [vmem:[%s6170_s6 + $0x31c] sm:$0xf]  ;;  %v4674_v30 = vld [vmem:[%s6170_s6 + $0x2e0] sm:$0xf]  ;;  %v4651_v20 = vor.u32 %v5072_v15, %v4648_v16  ;;  %v5051_v15 = vld [vmem:[%s6170_s6 + $0x204] sm:$0xf] }
 0x171   : >> { %2975 = vmatpush.bf16.msrb.mxu1 %v4583_v63  ;;  %v2165_v63 = vsub.f32 1.0, %v2164_v45  ;;  %v4675_v21 = vor.u32 %v5082_v24, %v4674_v30  ;;  %vm2203_vm7 = vcmp.eq.f32.partialorder %v2202_v55, 8.507059e+37  ;;  %v5041_v24 = vld [vmem:[%s6170_s6 + $0x1b0] sm:$0xf0]  ;;  %v4486_v55 = vld [vmem:[%s6170_s6 + $0x160] sm:$0xf] }
 0x172   : >> { %3017 = vmatpush.bf16.msra.mxu0 %v4367_v25  ;;  %v4988_v25 = vld [vmem:[%s6170_s6 + $0xc] sm:$0xf]  ;;  %3004 = vmatpush.bf16.msrb.mxu3 %v4559_v50  ;;  %v4564_v16 = vld [vmem:[%s6170_s6 + $0x21c] sm:$0xf0] }
 0x173   : >> { %3046 = vmatpush.bf16.msra.mxu2 %v4343_v59  ;;  %v4315_v26 = vor.u32 %v4988_v25, %v4312_v23  ;;  %v4528_v59 = vld [vmem:[%s6170_s6 + $0x1dc] sm:$0xf0]  ;;  %v6346_v25 = vadd.f32 %v6299_v39, %v1261_v47  ;;  %v2166_v28 = vmul.f32 %v6310_v17, %v2165_v63 }
 0x175   : >> { %v1988_v62 = vpop.f32.mrf.mxu0  ;;  %2976 = vmatpush.bf16.msrb.mxu1 %v4555_v40  ;;  %v4298_v45 = vmul.f32 -1.442695, %v6346_v25  ;;  %v2167_v48 = vadd.f32 %v6310_v17, %v2166_v28  ;;  %v5068_v28 = vld [vmem:[%s6170_s6 + $0x288] sm:$0xf0] }
 0x176   : >> { %3018 = vmatpush.bf16.msra.mxu0 %v4339_v53  ;;  %v2002_v49 = vpop.f32.mrf.mxu1  ;;  %v5043_v53 = vld [vmem:[%s6170_s6 + $0x1c4] sm:$0xf]  ;;  %v1989_v38 = vadd.f32 %v1988_v62, %v1975_v57  ;;  %v2172_v62 = vand.u32 2147483647, %v6271_v18  ;;  %v4646_v18 = vld [vmem:[%s6170_s6 + $0x2a8] sm:$0xf] }
 0x177   : >> { %3047 = vmatpush.bf16.msra.mxu2 %v4315_v26  ;;  %v4531_v61 = vor.u32 %v5043_v53, %v4528_v59  ;;  %v2196_v26 = vmul.f32 %v6315_v27, %v2195_v0  ;;  %v2204_v53 = vand.u32 2147483648, %v6273_v19  ;;  %v2171_v63 = vsel %vm6372_vm4, %v6310_v17, %v2167_v48  ;;  %v5038_v48 = vld [vmem:[%s6170_s6 + $0x19c] sm:$0xf] }
 0x178   : >> { %v2003_v43 = vadd.f32 %v2002_v49, %v1989_v38  ;;  %v5079_v49 = vld [vmem:[%s6170_s6 + $0x2e4] sm:$0xf]  ;;  %vm2173_vm6 = vcmp.eq.f32.partialorder %v2172_v62, 8.507059e+37  ;;  %v4620_v62 = vld [vmem:[%s6170_s6 + $0x28c] sm:$0xf0] }
 0x179   : >> { %2977 = vmatpush.bf16.msrb.mxu1 %v4527_v58  ;;  %3005 = vmatpush.bf16.msrb.mxu3 %v4531_v61  ;;  %v2197_v50 = vadd.f32 %v6315_v27, %v2196_v26  ;;  %v4679_v58 = vor.u32 %v5079_v49, %v4676_v51  ;;  %v4590_v49 = vld [vmem:[%s6170_s6 + $0x238] sm:$0xf]  ;;  %v5061_v51 = vld [vmem:[%s6170_s6 + $0x250] sm:$0xf0]  ;;  %v5031_v61 = vld [vmem:[%s6170_s6 + $0x164] sm:$0xf] }
 0x17a   : >> { %3019 = vmatpush.bf16.msra.mxu0 %v4311_v35  ;;  %v6343_v35 = vadd.f32 %v6259_v32, %v1259_v54  ;;  %v4704_v32 = vld [vmem:[%s6170_s6 + $0x334] sm:$0xf0] }
 0x17b   : >> { %v4707_v40 = vor.u32 %v5086_v42, %v4704_v32  ;;  %v2201_v19 = vsel %vm6379_vm5, %v6315_v27, %v2197_v50  ;;  %v4516_v50 = vld [vmem:[%s6170_s6 + $0x1b4] sm:$0xf0] }
 0x17c   : >> { %v4296_v39 = vmul.f32 -1.442695, %v6343_v35  ;;  %v4519_v59 = vor.u32 %v5038_v48, %v4516_v50 }
 0x17d   : >> { %v2016_v60 = vpop.f32.mrf.mxu2  ;;  %v1990_v41 = vpop.f32.mrf.mxu0  ;;  %3026 = vmatpush.bf16.msra.mxu1 %v4731_v37  ;;  %3054 = vmatpush.bf16.msra.mxu3 %v4735_v56  ;;  %v5075_v37 = vld [vmem:[%s6170_s6 + $0x2c0] sm:$0xf0]  ;;  %v2205_v56 = vor.u32 1.1754944e-38, %v2204_v53 }
 0x17e   : >> { %v2030_v23 = vpop.f32.mrf.mxu3  ;;  %v1991_v44 = vadd.f32 %v1990_v41, %v1977_v36  ;;  %v2004_v33 = vpop.f32.mrf.mxu1  ;;  %5212 = vpow2.f32 %v4296_v39  ;;  %v2017_v29 = vadd.f32 %v2016_v60, %v2003_v43  ;;  %v4647_v0 = vor.u32 %v5075_v37, %v4646_v18  ;;  %v4488_v18 = vld [vmem:[%s6170_s6 + $0x17c] sm:$0xf0] }
 0x17f   : >> { %5214 = vpow2.f32 %v4298_v45  ;;  %v2175_v41 = vor.u32 1.1754944e-38, %v2174_v52  ;;  %v2206_v27 = vsel %vm2203_vm7, %v2205_v56, %v2201_v19  ;;  %v4562_v19 = vld [vmem:[%s6170_s6 + $0x200] sm:$0xf]  ;;  %v4491_v56 = vor.u32 %v5031_v61, %v4488_v18 }
 0x180   : >> { %v2005_v47 = vadd.f32 %v2004_v33, %v1991_v44  ;;  %v2031_v17 = vadd.f32 %v2030_v23, %v2017_v29  ;;  %v4514_v23 = vld [vmem:[%s6170_s6 + $0x198] sm:$0xf]  ;;  %v2225_v33 = vmul.f32 %v2206_v27, %v6216_v46  ;;  %v4591_v46 = vor.u32 %v5061_v51, %v4590_v49  ;;  %v4374_v18 = vld [vmem:[%s6170_s6 + $0x80] sm:$0xf] }
 0x181   : >> { %3027 = vmatpush.bf16.msra.mxu1 %v4703_v31  ;;  %3055 = vmatpush.bf16.msra.mxu3 %v4707_v40  ;;  %v2176_v38 = vsel %vm2173_vm6, %v2175_v41, %v2171_v63  ;;  %v4618_v31 = vld [vmem:[%s6170_s6 + $0x270] sm:$0xf]  ;;  %v5065_v40 = vld [vmem:[%s6170_s6 + $0x274] sm:$0xf]  ;;  %v4567_v27 = vor.u32 %v5051_v15, %v4564_v16  ;;  %v5003_v15 = vld [vmem:[%s6170_s6 + $0x84] sm:$0xf] }
 0x182   : >> { %v4619_v32 = vor.u32 %v5068_v28, %v4618_v31  ;;  %v4623_v44 = vor.u32 %v5065_v40, %v4620_v62  ;;  %v2223_v45 = vmul.f32 %v2176_v38, %v6206_v34  ;;  %v4460_v38 = vld [vmem:[%s6170_s6 + $0x144] sm:$0xf0]  ;;  %v4376_v16 = vld [vmem:[%s6170_s6 + $0x9c] sm:$0xf0] }
 0x183   : >> { %v4534_v28 = vld [vmem:[%s6170_s6 + $0x1c8] sm:$0xf] }
 0x184   : >> { %v5213_v26 = vpop.eup %5212  ;;  %v4536_v40 = vld [vmem:[%s6170_s6 + $0x1e4] sm:$0xf0] }
 0x185   : >> { %v2018_v54 = vpop.f32.mrf.mxu2  ;;  %3028 = vmatpush.bf16.msra.mxu1 %v4675_v21  ;;  %3056 = vmatpush.bf16.msra.mxu3 %v4679_v58  ;;  %v5215_v39 = vpop.eup %5214  ;;  %v6403_v21 = vadd.f32 1.0, %v5213_v26  ;;  %v4515_v58 = vor.u32 %v5041_v24, %v4514_v23  ;;  %v5047_v26 = vld [vmem:[%s6170_s6 + $0x1e0] sm:$0xf0]  ;;  %v4430_v23 = vld [vmem:[%s6170_s6 + $0xf0] sm:$0xf] }
 0x186   : >> { %v2019_v60 = vadd.f32 %v2018_v54, %v2005_v47  ;;  %v2032_v22 = vpop.f32.mrf.mxu3  ;;  %v6407_v52 = vadd.f32 1.0, %v5215_v39  ;;  %v5058_v54 = vld [vmem:[%s6170_s6 + $0x23c] sm:$0xf] }
 0x187   : >> { %v5034_v47 = vld [vmem:[%s6170_s6 + $0x178] sm:$0xf0]  ;;  %5216 = vrcp.f32 %v6403_v21  ;;  %vm2183_vm10 = vweird.f32 %v6403_v21 }
 0x188   : >> { %v2033_v36 = vadd.f32 %v2032_v22, %v2019_v60  ;;  %v5054_v60 = vld [vmem:[%s6170_s6 + $0x218] sm:$0xf0]  ;;  %5218 = vrcp.f32 %v6407_v52  ;;  %v4487_v41 = vor.u32 %v5034_v47, %v4486_v55  ;;  %v4458_v22 = vld [vmem:[%s6170_s6 + $0x128] sm:$0xf]  ;;  %vm2213_vm12 = vweird.f32 %v6407_v52 }
 0x189   : >> { %3029 = vmatpush.bf16.msra.mxu1 %v4647_v0  ;;  %3057 = vmatpush.bf16.msra.mxu3 %v4651_v20  ;;  %v4563_v0 = vor.u32 %v5054_v60, %v4562_v19  ;;  %v5027_v20 = vld [vmem:[%s6170_s6 + $0x140] sm:$0xf0] }
 0x18a   : >> { %v4459_v39 = vor.u32 %v5027_v20, %v4458_v22  ;;  %v4379_v22 = vor.u32 %v5003_v15, %v4376_v16  ;;  %v4346_v20 = vld [vmem:[%s6170_s6 + $0x48] sm:$0xf]  ;;  %v5035_v16 = vld [vmem:[%s6170_s6 + $0x180] sm:$0xf0] }
 0x18b   : >> { %v4494_v15 = vld [vmem:[%s6170_s6 + $0x168] sm:$0xf] }
 0x18d   : >> { %3030 = vmatpush.bf16.msra.mxu1 %v4619_v32  ;;  %3058 = vmatpush.bf16.msra.mxu3 %v4623_v44  ;;  %v5044_v32 = vld [vmem:[%s6170_s6 + $0x1cc] sm:$0xf]  ;;  %v6433_v62 = vpop.eup %5216 }
 0x18e   : >> { %v6436_v44 = vpop.eup %5218  ;;  %v4539_v24 = vor.u32 %v5044_v32, %v4536_v40  ;;  %v2179_v48 = vmul.f32 %v6433_v62, %v6403_v21  ;;  %vm2184_vm8 = vweird.f32 %v6433_v62  ;;  %v2187_v32 = vand.u32 2147483647, %v6403_v21 }
 0x18f   : >> { %v2209_v50 = vmul.f32 %v6436_v44, %v6407_v52  ;;  %vm2214_vm9 = vweird.f32 %v6436_v44  ;;  %vm6477_vm11 = vmor %vm2183_vm10, %vm2184_vm8 }
 0x190   : >> { %vm6485_vm13 = vmor %vm2213_vm12, %vm2214_vm9  ;;  %vm2188_vm14 = vcmp.eq.f32.partialorder %v2187_v32, 8.507059e+37  ;;  %v5028_v32 = vld [vmem:[%s6170_s6 + $0x148] sm:$0xf0] }
 0x191   : >> { %3031 = vmatpush.bf16.msra.mxu1 %v4591_v46  ;;  %v5013_v46 = vld [vmem:[%s6170_s6 + $0xd0] sm:$0xf0] }
 0x195   : >> { %v2044_v57 = vpop.f32.mrf.mxu0  ;;  %3032 = vmatpush.bf16.msra.mxu1 %v4563_v0  ;;  %v5006_v0 = vld [vmem:[%s6170_s6 + $0x98] sm:$0xf0] }
 0x196   : >> { %v2045_v42 = vadd.f32 %v2044_v57, %v2031_v17  ;;  %v4592_v57 = vld [vmem:[%s6170_s6 + $0x254] sm:$0xf0]  ;;  %v2058_v63 = vpop.f32.mrf.mxu1  ;;  %v5024_v17 = vld [vmem:[%s6170_s6 + $0x12c] sm:$0xf] }
 0x197   : >> { %v4595_v37 = vor.u32 %v5058_v54, %v4592_v57  ;;  %v5010_v54 = vld [vmem:[%s6170_s6 + $0xbc] sm:$0xf]  ;;  %v4404_v57 = vld [vmem:[%s6170_s6 + $0xd4] sm:$0xf0] }
 0x198   : >> { %v2227_v53 = vmul.f32 %v2223_v45, %v2045_v42  ;;  %v4535_v42 = vor.u32 %v5047_v26, %v4534_v28  ;;  %v5020_v45 = vld [vmem:[%s6170_s6 + $0x108] sm:$0xf0]  ;;  %v4407_v61 = vor.u32 %v5010_v54, %v4404_v57  ;;  %v4348_v26 = vld [vmem:[%s6170_s6 + $0x64] sm:$0xf0]  ;;  %v2217_v57 = vand.u32 2147483647, %v6407_v52 }
 0x199   : >> { %3059 = vmatpush.bf16.msra.mxu3 %v4595_v37  ;;  %v4431_v51 = vor.u32 %v5020_v45, %v4430_v23  ;;  %v4996_v28 = vld [vmem:[%s6170_s6 + $0x4c] sm:$0xf]  ;;  %v5083_v54 = vld [vmem:[%s6170_s6 + $0x300] sm:$0xf0] }
 0x19a   : >> { %3033 = vmatpush.bf16.msra.mxu1 %v4535_v42  ;;  %vm2218_vm15 = vcmp.eq.f32.partialorder %v2217_v57, 8.507059e+37  ;;  %v4410_v57 = vld [vmem:[%s6170_s6 + $0xc0] sm:$0xf] }
 0x19d   : >> { %v2046_v43 = vpop.f32.mrf.mxu0  ;;  %v2072_v31 = vpop.f32.mrf.mxu2  ;;  %3060 = vmatpush.bf16.msra.mxu3 %v4567_v27 }
 0x19e   : >> { %v2047_v30 = vadd.f32 %v2046_v43, %v2033_v36  ;;  %v2086_v36 = vpop.f32.mrf.mxu3  ;;  %v4463_v43 = vor.u32 %v5024_v17, %v4460_v38  ;;  %v2060_v49 = vpop.f32.mrf.mxu1  ;;  %v2073_v37 = vadd.f32 %v2072_v31, %v2058_v63  ;;  %v4999_v31 = vld [vmem:[%s6170_s6 + $0x60] sm:$0xf0] }
 0x1a0   : >> { %v2229_v34 = vmul.f32 %v2225_v33, %v2047_v30  ;;  %v5017_v33 = vld [vmem:[%s6170_s6 + $0xf4] sm:$0xf]  ;;  %v4432_v30 = vld [vmem:[%s6170_s6 + $0x10c] sm:$0xf0]  ;;  %v2087_v38 = vadd.f32 %v2086_v36, %v2073_v37 }
 0x1a1   : >> { %3061 = vmatpush.bf16.msra.mxu3 %v4539_v24  ;;  %v4318_v36 = vld [vmem:[%s6170_s6 + $0x10] sm:$0xf] }
 0x1a2   : >> { %v6412_v29 = vpack.c.bf16 %v2229_v34, %v2227_v53  ;;  %v4435_v53 = vor.u32 %v5017_v33, %v4432_v30  ;;  %v4402_v34 = vld [vmem:[%s6170_s6 + $0xb8] sm:$0xf] }
 0x1a3   : >> { %v4403_v47 = vor.u32 %v5013_v46, %v4402_v34  ;;  %v4522_v34 = vld [vmem:[%s6170_s6 + $0x1a0] sm:$0xf]  ;;  %v5042_v46 = vld [vmem:[%s6170_s6 + $0x1b8] sm:$0xf0] }
 0x1a4   : >> { %2964 = vmatmul.bf16.vlgmr.msrb.gmra.mxu0 %v6412_v29  ;;  %2992 = vmatmul.bf16.vlgmr.msrb.gmra.mxu2 %v6412_v29  ;;  %v4523_v37 = vor.u32 %v5042_v46, %v4522_v34  ;;  %v4682_v34 = vld [vmem:[%s6170_s6 + $0x2e8] sm:$0xf] }
 0x1a5   : >> { %3068 = vmatpush.bf16.msrb.mxu0 %v4515_v58  ;;  %3096 = vmatpush.bf16.msrb.mxu2 %v4519_v59  ;;  %v2180_v58 = vsub.f32 1.0, %v2179_v48  ;;  %v2210_v59 = vsub.f32 1.0, %v2209_v50  ;;  %v2074_v55 = vpop.f32.mrf.mxu2  ;;  %v4992_v48 = vld [vmem:[%s6170_s6 + $0x28] sm:$0xf0]  ;;  %v4989_v50 = vld [vmem:[%s6170_s6 + $0x14] sm:$0xf] }
 0x1a6   : >> { %v2088_v19 = vpop.f32.mrf.mxu3  ;;  %v2075_v27 = vadd.f32 %v2074_v55, %v2060_v49  ;;  %v4320_v49 = vld [vmem:[%s6170_s6 + $0x2c] sm:$0xf0]  ;;  %v4319_v55 = vor.u32 %v4992_v48, %v4318_v36  ;;  %v5021_v48 = vld [vmem:[%s6170_s6 + $0x110] sm:$0xf0] }
 0x1a7   : >> { %v2181_v63 = vmul.f32 %v6433_v62, %v2180_v58  ;;  %v2211_v17 = vmul.f32 %v6436_v44, %v2210_v59 }
 0x1a8   : >> { %v2089_v33 = vadd.f32 %v2088_v19, %v2075_v27 }
 0x1a9   : >> { %3069 = vmatpush.bf16.msrb.mxu0 %v4487_v41  ;;  %3097 = vmatpush.bf16.msrb.mxu2 %v4491_v56  ;;  %v4375_v56 = vor.u32 %v5006_v0, %v4374_v18  ;;  %v2182_v23 = vadd.f32 %v6433_v62, %v2181_v63  ;;  %v2212_v45 = vadd.f32 %v6436_v44, %v2211_v17 }
 0x1aa   : >> { %v4495_v63 = vor.u32 %v5035_v16, %v4494_v15 }
 0x1ad   : >> { %3070 = vmatpush.bf16.msrb.mxu0 %v4459_v39  ;;  %3098 = vmatpush.bf16.msrb.mxu2 %v4463_v43  ;;  %v4347_v39 = vor.u32 %v4999_v31, %v4346_v20  ;;  %v4351_v43 = vor.u32 %v4996_v28, %v4348_v26  ;;  %v5097_v26 = vld [vmem:[%s6170_s6 + $0x370] sm:$0xf0] }
 0x1b1   : >> { %3071 = vmatpush.bf16.msrb.mxu0 %v4431_v51  ;;  %3099 = vmatpush.bf16.msrb.mxu2 %v4435_v53  ;;  %v2189_v51 = vand.u32 2147483648, %v6403_v21  ;;  %v2219_v53 = vand.u32 2147483648, %v6407_v52  ;;  %v2216_v52 = vsel %vm6485_vm13, %v6436_v44, %v2212_v45  ;;  %v4684_v21 = vld [vmem:[%s6170_s6 + $0x304] sm:$0xf0] }
 0x1b3   : >> { %v2190_v19 = vor.u32 1.1754944e-38, %v2189_v51 }
 0x1b4   : >> { %3020 = vmatmul.bf16.vlgmr.msra.gmra.mxu0 %v6412_v29  ;;  %3048 = vmatmul.bf16.vlgmr.msra.gmra.mxu2 %v6412_v29 }
 0x1b5   : >> { %v2100_v60 = vpop.f32.mrf.mxu0  ;;  %3072 = vmatpush.bf16.msrb.mxu0 %v4403_v47  ;;  %3100 = vmatpush.bf16.msrb.mxu2 %v4407_v61  ;;  %v4323_v47 = vor.u32 %v4989_v50, %v4320_v49  ;;  %v2186_v61 = vsel %vm6477_vm11, %v6433_v62, %v2182_v23  ;;  %v4710_v23 = vld [vmem:[%s6170_s6 + $0x320] sm:$0xf]  ;;  %v5087_v50 = vld [vmem:[%s6170_s6 + $0x324] sm:$0xf] }
 0x1b6   : >> { %v2114_v41 = vpop.f32.mrf.mxu1  ;;  %v2101_v42 = vadd.f32 %v2100_v60, %v2087_v38  ;;  %v2220_v60 = vor.u32 1.1754944e-38, %v2219_v53  ;;  %v4738_v38 = vld [vmem:[%s6170_s6 + $0x358] sm:$0xf]  ;;  %v4712_v49 = vld [vmem:[%s6170_s6 + $0x33c] sm:$0xf0] }
 0x1b7   : >> { %v4715_v46 = vor.u32 %v5087_v50, %v4712_v49  ;;  %v5048_v50 = vld [vmem:[%s6170_s6 + $0x1e8] sm:$0xf0]  ;;  %v5045_v49 = vld [vmem:[%s6170_s6 + $0x1d4] sm:$0xf] }
 0x1b8   : >> { %v2115_v58 = vadd.f32 %v2114_v41, %v2101_v42  ;;  %v4466_v42 = vld [vmem:[%s6170_s6 + $0x130] sm:$0xf] }
 0x1b9   : >> { %3073 = vmatpush.bf16.msrb.mxu0 %v4375_v56  ;;  %3101 = vmatpush.bf16.msrb.mxu2 %v4379_v22  ;;  %v2191_v56 = vsel %vm2188_vm14, %v2190_v19, %v2186_v61  ;;  %v2221_v22 = vsel %vm2218_vm15, %v2220_v60, %v2216_v52  ;;  %v4654_v61 = vld [vmem:[%s6170_s6 + $0x2b0] sm:$0xf]  ;;  %v5007_v19 = vld [vmem:[%s6170_s6 + $0xa0] sm:$0xf0]  ;;  %v5073_v60 = vld [vmem:[%s6170_s6 + $0x2b4] sm:$0xf] }
 0x1ba   : >> { %v2224_v27 = vmul.f32 %v2191_v56, %v6343_v35  ;;  %v2226_v31 = vmul.f32 %v2221_v22, %v6346_v25  ;;  %v4739_v35 = vor.u32 %v5097_v26, %v4738_v38  ;;  %v4467_v25 = vor.u32 %v5028_v32, %v4466_v42  ;;  %v5069_v22 = vld [vmem:[%s6170_s6 + $0x290] sm:$0xf0]  ;;  %v4326_v26 = vld [vmem:[%s6170_s6 + $0x18] sm:$0xf]  ;;  %v5059_v32 = vld [vmem:[%s6170_s6 + $0x244] sm:$0xf] }
 0x1bb   : >> { %v4993_v42 = vld [vmem:[%s6170_s6 + $0x30] sm:$0xf0] }
 0x1bd   : >> { %v2128_v40 = vpop.f32.mrf.mxu2  ;;  %v2102_v24 = vpop.f32.mrf.mxu0  ;;  %3074 = vmatpush.bf16.msrb.mxu0 %v4347_v39  ;;  %3102 = vmatpush.bf16.msrb.mxu2 %v4351_v43  ;;  %v4740_v39 = vld [vmem:[%s6170_s6 + $0x374] sm:$0xf0] }
 0x1be   : >> { %v2142_v30 = vpop.f32.mrf.mxu3  ;;  %v2103_v59 = vadd.f32 %v2102_v24, %v2089_v33  ;;  %v2129_v18 = vadd.f32 %v2128_v40, %v2115_v58  ;;  %v2116_v0 = vpop.f32.mrf.mxu1  ;;  %v5094_v40 = vld [vmem:[%s6170_s6 + $0x35c] sm:$0xf]  ;;  %v4438_v24 = vld [vmem:[%s6170_s6 + $0xf8] sm:$0xf] }
 0x1bf   : >> { %v4743_v33 = vor.u32 %v5094_v40, %v4740_v39  ;;  %v4439_v53 = vor.u32 %v5021_v48, %v4438_v24  ;;  %v5014_v58 = vld [vmem:[%s6170_s6 + $0xd8] sm:$0xf0]  ;;  %v4600_v40 = vld [vmem:[%s6170_s6 + $0x25c] sm:$0xf0]  ;;  %v4542_v48 = vld [vmem:[%s6170_s6 + $0x1d0] sm:$0xf] }
 0x1c0   : >> { %v2117_v41 = vadd.f32 %v2116_v0, %v2103_v59  ;;  %v2143_v44 = vadd.f32 %v2142_v30, %v2129_v18  ;;  %v5090_v30 = vld [vmem:[%s6170_s6 + $0x338] sm:$0xf0]  ;;  %v5080_v59 = vld [vmem:[%s6170_s6 + $0x2ec] sm:$0xf]  ;;  %v4656_v0 = vld [vmem:[%s6170_s6 + $0x2cc] sm:$0xf0] }
 0x1c1   : >> { %3075 = vmatpush.bf16.msrb.mxu0 %v4319_v55  ;;  %3103 = vmatpush.bf16.msrb.mxu2 %v4323_v47  ;;  %v4711_v51 = vor.u32 %v5090_v30, %v4710_v23  ;;  %v4683_v55 = vor.u32 %v5083_v54, %v4682_v34  ;;  %v4411_v47 = vor.u32 %v5014_v58, %v4410_v57  ;;  %v5076_v18 = vld [vmem:[%s6170_s6 + $0x2c8] sm:$0xf0]  ;;  %v5098_v34 = vld [vmem:[%s6170_s6 + $0x378] sm:$0xf0]  ;;  %v4718_v58 = vld [vmem:[%s6170_s6 + $0x328] sm:$0xf] }
 0x1c2   : >> { %v2228_v43 = vmul.f32 %v2224_v27, %v2143_v44  ;;  %v4687_v52 = vor.u32 %v5080_v59, %v4684_v21  ;;  %v4655_v15 = vor.u32 %v5076_v18, %v4654_v61  ;;  %v4659_v56 = vor.u32 %v5073_v60, %v4656_v0  ;;  %v5000_v44 = vld [vmem:[%s6170_s6 + $0x68] sm:$0xf0]  ;;  %v4598_v27 = vld [vmem:[%s6170_s6 + $0x240] sm:$0xf]  ;;  %v5091_v59 = vld [vmem:[%s6170_s6 + $0x340] sm:$0xf0] }
 0x1c3   : >> { %v5052_v23 = vld [vmem:[%s6170_s6 + $0x20c] sm:$0xf]  ;;  %v4719_v21 = vor.u32 %v5091_v59, %v4718_v58  ;;  %v4662_v61 = vld [vmem:[%s6170_s6 + $0x2b8] sm:$0xf]  ;;  %v4606_v0 = vld [vmem:[%s6170_s6 + $0x248] sm:$0xf] }
 0x1c4   : >> { %3076 = vmatmul.bf16.vlgmr.msrb.gmra.mxu0 %v6412_v29  ;;  %3104 = vmatmul.bf16.vlgmr.msrb.gmra.mxu2 %v6412_v29  ;;  %v2240_v59 = vld [vmem:[#allocation2 + $0x20] sm:$0xff] }
 0x1c5   : >> { %v2130_v62 = vpop.f32.mrf.mxu2  ;;  %3124 = vmatpush.bf16.msra.mxu0 %v4523_v37  ;;  %v4382_v37 = vld [vmem:[%s6170_s6 + $0x88] sm:$0xf] }
 0x1c6   : >> { %v2131_v20 = vadd.f32 %v2130_v62, %v2117_v41  ;;  %v2144_v17 = vpop.f32.mrf.mxu3  ;;  %v4383_v16 = vor.u32 %v5007_v19, %v4382_v37  ;;  %v4626_v41 = vld [vmem:[%s6170_s6 + $0x278] sm:$0xf]  ;;  %v4354_v62 = vld [vmem:[%s6170_s6 + $0x50] sm:$0xf]  ;;  %v4634_v37 = vld [vmem:[%s6170_s6 + $0x280] sm:$0xf] }
 0x1c7   : >> { %v4355_v38 = vor.u32 %v5000_v44, %v4354_v62  ;;  %v5070_v19 = vld [vmem:[%s6170_s6 + $0x298] sm:$0xf0]  ;;  %v4550_v62 = vld [vmem:[%s6170_s6 + $0x1d8] sm:$0xf]  ;;  %v5049_v44 = vld [vmem:[%s6170_s6 + $0x1f0] sm:$0xf0] }
 0x1c8   : >> { %v2145_v28 = vadd.f32 %v2144_v17, %v2131_v20  ;;  %v5066_v20 = vld [vmem:[%s6170_s6 + $0x27c] sm:$0xf]  ;;  %v4627_v17 = vor.u32 %v5069_v22, %v4626_v41  ;;  %v4635_v60 = vor.u32 %v5070_v19, %v4634_v37  ;;  %v4578_v41 = vld [vmem:[%s6170_s6 + $0x210] sm:$0xf] }
 0x1c9   : >> { %3125 = vmatpush.bf16.msra.mxu0 %v4495_v63  ;;  %v4628_v63 = vld [vmem:[%s6170_s6 + $0x294] sm:$0xf0] }
 0x1ca   : >> { %v2230_v36 = vmul.f32 %v2226_v31, %v2145_v28  ;;  %v4631_v31 = vor.u32 %v5066_v20, %v4628_v63  ;;  %v5062_v28 = vld [vmem:[%s6170_s6 + $0x258] sm:$0xf0]  ;;  %v4551_v20 = vor.u32 %v5049_v44, %v4550_v62 }
 0x1cb   : >> { %v4599_v39 = vor.u32 %v5062_v28, %v4598_v27  ;;  %v2231_v27 = vld [vmem:[#allocation2 + $0x30] sm:$0xff] }
 0x1cc   : >> { %v6508_v45 = vpack.c.bf16 %v2230_v36, %v2228_v43  ;;  %v4327_v43 = vor.u32 %v4993_v42, %v4326_v26  ;;  %v4603_v36 = vor.u32 %v5059_v32, %v4600_v40  ;;  %v2232_v42 = vld [vmem:[#allocation2] sm:$0xff] }
 0x1cd   : >> { %3126 = vmatpush.bf16.msra.mxu0 %v4467_v25  ;;  %v5055_v25 = vld [vmem:[%s6170_s6 + $0x220] sm:$0xf0] }
 0x1ce   : >> { %2978 = vmatmul.bf16.vlgmr.msrb.gmra.mxu1 %v6508_v45  ;;  %3006 = vmatmul.bf16.vlgmr.msrb.gmra.mxu3 %v6508_v45 }
 0x1cf   : >> { %3082 = vmatpush.bf16.msrb.mxu1 %v4739_v35  ;;  %3110 = vmatpush.bf16.msrb.mxu3 %v4743_v33  ;;  %v4570_v35 = vld [vmem:[%s6170_s6 + $0x208] sm:$0xf] }
 0x1d0   : >> { %v4572_v33 = vld [vmem:[%s6170_s6 + $0x224] sm:$0xf0]  ;;  %v4571_v30 = vor.u32 %v5055_v25, %v4570_v35 }
 0x1d1   : >> { %3127 = vmatpush.bf16.msra.mxu0 %v4439_v53  ;;  %v4575_v24 = vor.u32 %v5052_v23, %v4572_v33  ;;  %v4746_v53 = vld [vmem:[%s6170_s6 + $0x360] sm:$0xf] }
 0x1d2   : >> { %v4747_v57 = vor.u32 %v5098_v34, %v4746_v53 }
 0x1d3   : >> { %3083 = vmatpush.bf16.msrb.mxu1 %v4711_v51  ;;  %3111 = vmatpush.bf16.msrb.mxu3 %v4715_v46  ;;  %v4544_v51 = vld [vmem:[%s6170_s6 + $0x1ec] sm:$0xf0]  ;;  %v4543_v46 = vor.u32 %v5048_v50, %v4542_v48  ;;  %v2233_v48 = vld [vmem:[#allocation2 + $0x58] sm:$0xff] }
 0x1d4   : >> { %v4547_v54 = vor.u32 %v5045_v49, %v4544_v51 }
 0x1d5   : >> { %3128 = vmatpush.bf16.msra.mxu0 %v4411_v47  ;;  %v5084_v47 = vld [vmem:[%s6170_s6 + $0x308] sm:$0xf0] }
 0x1d7   : >> { %3084 = vmatpush.bf16.msrb.mxu1 %v4683_v55  ;;  %3112 = vmatpush.bf16.msrb.mxu3 %v4687_v52  ;;  %v4690_v55 = vld [vmem:[%s6170_s6 + $0x2f0] sm:$0xf]  ;;  %v5077_v52 = vld [vmem:[%s6170_s6 + $0x2d0] sm:$0xf0] }
 0x1d8   : >> { %v4663_v18 = vor.u32 %v5077_v52, %v4662_v61 }
 0x1d9   : >> { %3129 = vmatpush.bf16.msra.mxu0 %v4383_v16 }
 0x1db   : >> { %3085 = vmatpush.bf16.msrb.mxu1 %v4655_v15  ;;  %3113 = vmatpush.bf16.msrb.mxu3 %v4659_v56  ;;  %v5063_v15 = vld [vmem:[%s6170_s6 + $0x260] sm:$0xf0]  ;;  %v5056_v56 = vld [vmem:[%s6170_s6 + $0x228] sm:$0xf0] }
 0x1dc   : >> { %v4607_v16 = vor.u32 %v5063_v15, %v4606_v0  ;;  %v4579_v22 = vor.u32 %v5056_v56, %v4578_v41 }
 0x1dd   : >> { %3130 = vmatpush.bf16.msra.mxu0 %v4355_v38 }
 0x1de   : >> { %3034 = vmatmul.bf16.vlgmr.msra.gmra.mxu1 %v6508_v45  ;;  %3062 = vmatmul.bf16.vlgmr.msra.gmra.mxu3 %v6508_v45 }
 0x1df   : >> { %3086 = vmatpush.bf16.msrb.mxu1 %v4627_v17  ;;  %3114 = vmatpush.bf16.msrb.mxu3 %v4631_v31 }
 0x1e1   : >> { %3131 = vmatpush.bf16.msra.mxu0 %v4327_v43  ;;  %v2238_v43 = vld [vmem:[#allocation2 + $0x48] sm:$0xff] }
 0x1e3   : >> { %3087 = vmatpush.bf16.msrb.mxu1 %v4599_v39  ;;  %3115 = vmatpush.bf16.msrb.mxu3 %v4603_v36 }
 0x1e4   : >> { %3132 = vmatmul.bf16.vlgmr.msra.gmra.mxu0 %v6412_v29  ;;  %v4691_v29 = vor.u32 %v5084_v47, %v4690_v55 }
 0x1e7   : >> { %3088 = vmatpush.bf16.msrb.mxu1 %v4571_v30  ;;  %3116 = vmatpush.bf16.msrb.mxu3 %v4575_v24 }
 0x1eb   : >> { %3089 = vmatpush.bf16.msrb.mxu1 %v4543_v46  ;;  %3117 = vmatpush.bf16.msrb.mxu3 %v4547_v54  ;;  %v2234_v54 = vld [vmem:[#allocation2 + $0x18] sm:$0xff] }
 0x1ee   : >> { %3090 = vmatmul.bf16.vlgmr.msrb.gmra.mxu1 %v6508_v45  ;;  %3118 = vmatmul.bf16.vlgmr.msrb.gmra.mxu3 %v6508_v45 }
 0x1ef   : >> { %3138 = vmatpush.bf16.msra.mxu1 %v4747_v57 }
 0x1f3   : >> { %3139 = vmatpush.bf16.msra.mxu1 %v4719_v21 }
 0x1f7   : >> { %3140 = vmatpush.bf16.msra.mxu1 %v4691_v29 }
 0x1fb   : >> { %3141 = vmatpush.bf16.msra.mxu1 %v4663_v18  ;;  %v2241_v18 = vld [vmem:[#allocation2 + $0x10] sm:$0xff] }
 0x1ff   : >> { %3142 = vmatpush.bf16.msra.mxu1 %v4635_v60  ;;  %v2235_v60 = vld [vmem:[#allocation2 + $0x50] sm:$0xff] }
 0x203   : >> { %3143 = vmatpush.bf16.msra.mxu1 %v4607_v16 }
 0x207   : >> { %3144 = vmatpush.bf16.msra.mxu1 %v4579_v22  ;;  %v2236_v22 = vld [vmem:[#allocation2 + $0x68] sm:$0xff] }
 0x20b   : >> { %3145 = vmatpush.bf16.msra.mxu1 %v4551_v20 }
 0x20e   : >> { %3146 = vmatmul.bf16.vlgmr.msra.gmra.mxu1 %v6508_v45  ;;  %v2239_v45 = vld [vmem:[#allocation2 + $0x40] sm:$0xff] }
 0x221   : >> { %v2965_v63 = vpop.f32.mrf.mxu0 }
 0x227   : >> { %v2993_v17 = vpop.f32.mrf.mxu2 }
 0x229   : >> { %v2967_v38 = vpop.f32.mrf.mxu0 }
 0x22f   : >> { %v2995_v40 = vpop.f32.mrf.mxu2 }
 0x231   : >> { %v3021_v23 = vpop.f32.mrf.mxu0 }
 0x237   : >> { %v3049_v49 = vpop.f32.mrf.mxu2 }
 0x239   : >> { %v3023_v46 = vpop.f32.mrf.mxu0 }
 0x23f   : >> { %v3051_v29 = vpop.f32.mrf.mxu2 }
 0x241   : >> { %v3077_v52 = vpop.f32.mrf.mxu0 }
 0x247   : >> { %v3105_v56 = vpop.f32.mrf.mxu2 }
 0x249   : >> { %v3079_v44 = vpop.f32.mrf.mxu0 }
 0x24b   : >> { %v2979_v31 = vpop.f32.mrf.mxu1 }
 0x24c   : >> { %v2980_v28 = vadd.f32 %v2979_v31, %v2965_v63  ;;  %v2242_v63 = vld [vmem:[#allocation2 + $0x38] sm:$0xff] }
 0x24e   : >> { %v3152_v26 = vadd.f32 %v2980_v28, %v2231_v27 }
 0x24f   : >> { %v3107_v28 = vpop.f32.mrf.mxu2 }
 0x250   : >> { %3166 = vst [vmem:[#allocation2 + $0x30] sm:$0xff] %v3152_v26  ;;  %v2243_v26 = vld [vmem:[#allocation2 + $0x60] sm:$0xff] }
 0x251   : >> { %v3007_v32 = vpop.f32.mrf.mxu3 }
 0x252   : >> { %v3008_v39 = vadd.f32 %v3007_v32, %v2993_v17 }
 0x253   : >> { %v2981_v36 = vpop.f32.mrf.mxu1 }
 0x254   : >> { %v3153_v35 = vadd.f32 %v3008_v39, %v2232_v42  ;;  %v2982_v25 = vadd.f32 %v2981_v36, %v2967_v38 }
 0x256   : >> { %3167 = vst [vmem:[#allocation2] sm:$0xff] %v3153_v35  ;;  %v3159_v33 = vadd.f32 %v2982_v25, %v2238_v43  ;;  %v2237_v43 = vld [vmem:[#allocation2 + $0x8] sm:$0xff] }
 0x258   : >> { %3173 = vst [vmem:[#allocation2 + $0x48] sm:$0xff] %v3159_v33  ;;  %v2244_v33 = vld [vmem:[#allocation2 + $0x28] sm:$0xff] }
 0x259   : >> { %v3009_v30 = vpop.f32.mrf.mxu3 }
 0x25a   : >> { %v3010_v24 = vadd.f32 %v3009_v30, %v2995_v40 }
 0x25b   : >> { %v3035_v50 = vpop.f32.mrf.mxu1 }
 0x25c   : >> { %v3160_v51 = vadd.f32 %v3010_v24, %v2239_v45  ;;  %v3036_v53 = vadd.f32 %v3035_v50, %v3021_v23 }
 0x25e   : >> { %3174 = vst [vmem:[#allocation2 + $0x40] sm:$0xff] %v3160_v51  ;;  %v3154_v34 = vadd.f32 %v3036_v53, %v2233_v48 }
 0x260   : >> { %3168 = vst [vmem:[#allocation2 + $0x58] sm:$0xff] %v3154_v34 }
 0x261   : >> { %v3063_v57 = vpop.f32.mrf.mxu3  ;;  %v3133_v39 = vpop.f32.mrf.mxu0 }
 0x262   : >> { %v3064_v58 = vadd.f32 %v3063_v57, %v3049_v49 }
 0x263   : >> { %v3037_v21 = vpop.f32.mrf.mxu1 }
 0x264   : >> { %v3155_v55 = vadd.f32 %v3064_v58, %v2234_v54  ;;  %v3038_v47 = vadd.f32 %v3037_v21, %v3023_v46 }
 0x266   : >> { %3169 = vst [vmem:[#allocation2 + $0x18] sm:$0xff] %v3155_v55  ;;  %v3161_v61 = vadd.f32 %v3038_v47, %v2240_v59 }
 0x268   : >> { %3175 = vst [vmem:[#allocation2 + $0x20] sm:$0xff] %v3161_v61 }
 0x269   : >> { %v3065_v37 = vpop.f32.mrf.mxu3  ;;  %v3135_v23 = vpop.f32.mrf.mxu0 }
 0x26a   : >> { %v3066_v19 = vadd.f32 %v3065_v37, %v3051_v29 }
 0x26b   : >> { %v3091_v0 = vpop.f32.mrf.mxu1 }
 0x26c   : >> { %v3162_v15 = vadd.f32 %v3066_v19, %v2241_v18  ;;  %v3092_v16 = vadd.f32 %v3091_v0, %v3077_v52 }
 0x26e   : >> { %3176 = vst [vmem:[#allocation2 + $0x10] sm:$0xff] %v3162_v15  ;;  %v3156_v41 = vadd.f32 %v3092_v16, %v2235_v60 }
 0x270   : >> { %3170 = vst [vmem:[#allocation2 + $0x50] sm:$0xff] %v3156_v41 }
 0x271   : >> { %v3119_v62 = vpop.f32.mrf.mxu3 }
 0x272   : >> { %v3120_v20 = vadd.f32 %v3119_v62, %v3105_v56 }
 0x273   : >> { %v3093_v17 = vpop.f32.mrf.mxu1 }
 0x274   : >> { %v3094_v38 = vadd.f32 %v3093_v17, %v3079_v44  ;;  %v3157_v27 = vadd.f32 %v3120_v20, %v2236_v22 }
 0x276   : >> { %v3163_v31 = vadd.f32 %v3094_v38, %v2242_v63  ;;  %3171 = vst [vmem:[#allocation2 + $0x68] sm:$0xff] %v3157_v27 }
 0x278   : >> { %3177 = vst [vmem:[#allocation2 + $0x38] sm:$0xff] %v3163_v31 }
 0x279   : >> { %v3121_v42 = vpop.f32.mrf.mxu3 }
 0x27a   : >> { %v3122_v32 = vadd.f32 %v3121_v42, %v3107_v28 }
 0x27c   : >> { %v3164_v40 = vadd.f32 %v3122_v32, %v2243_v26 }
 0x27e   : >> { %3178 = vst [vmem:[#allocation2 + $0x60] sm:$0xff] %v3164_v40 }
 0x28b   : >> { %v3147_v36 = vpop.f32.mrf.mxu1 }
 0x28c   : >> { %v3148_v35 = vadd.f32 %v3147_v36, %v3133_v39 }
 0x28e   : >> { %v3158_v25 = vadd.f32 %v3148_v35, %v2237_v43 }
 0x290   : >> { %3172 = vst [vmem:[#allocation2 + $0x8] sm:$0xff] %v3158_v25 }
 0x293   : >> { %v3149_v45 = vpop.f32.mrf.mxu1 }
 0x294   : >> { %v3150_v30 = vadd.f32 %v3149_v45, %v3135_v23  ;;  %366 = sbr.rel (!%p364_p2) target bundleno = 82 (0x52), region = 122 }
 0x296   : >> { %v3165_v24 = vadd.f32 %v3150_v30, %v2244_v33 }
 0x298   : >> { %3179 = vst [vmem:[#allocation2 + $0x28] sm:$0xff] %v3165_v24 }
 0x299   : > { %3183 = sbr.rel (%p4748_p3) target bundleno = 681 (0x2a9), region = 67 }
 0x29e   : > { %v3184_v48 = vld [vmem:[#allocation2 + $0x30] sm:$0xff]  ;;  %v3185_v50 = vld [vmem:[#allocation2] sm:$0xff]  ;;  %v3186_v49 = vld [vmem:[#allocation2 + $0x58] sm:$0xff] }
 0x29f   : > { %v3198_v51 = vpack.c.bf16 %v3185_v50, %v3184_v48  ;;  %v3187_v53 = vld [vmem:[#allocation2 + $0x18] sm:$0xff]  ;;  %v3188_v34 = vld [vmem:[#allocation2 + $0x50] sm:$0xff]  ;;  %v3189_v46 = vld [vmem:[#allocation2 + $0x68] sm:$0xff] }
 0x2a0   : > { %v3199_v54 = vpack.c.bf16 %v3187_v53, %v3186_v49  ;;  %v3200_v57 = vpack.c.bf16 %v3189_v46, %v3188_v34  ;;  %v3190_v58 = vld [vmem:[#allocation2 + $0x8] sm:$0xff]  ;;  %v3192_v21 = vld [vmem:[#allocation2 + $0x40] sm:$0xff]  ;;  %v3194_v61 = vld [vmem:[#allocation2 + $0x10] sm:$0xff] }
 0x2a1   : > { %v3191_v59 = vld [vmem:[#allocation2 + $0x48] sm:$0xff]  ;;  %3206 = vst [vmem:[#allocation11] sm:$0xff] %v3198_v51  ;;  %v3201_v55 = vpack.c.bf16 %v3190_v58, %v3190_v58  ;;  %v3193_v29 = vld [vmem:[#allocation2 + $0x20] sm:$0xff]  ;;  %v3195_v1 = vld [vmem:[#allocation2 + $0x38] sm:$0xff] }
 0x2a2   : > { %v3202_v47 = vpack.c.bf16 %v3192_v21, %v3191_v59  ;;  %3207 = vst [vmem:[#allocation11 + $0x8] sm:$0xff] %v3199_v54  ;;  %v3203_v2 = vpack.c.bf16 %v3194_v61, %v3193_v29  ;;  %v3196_v3 = vld [vmem:[#allocation2 + $0x60] sm:$0xff]  ;;  %v3197_v4 = vld [vmem:[#allocation2 + $0x28] sm:$0xff] }
 0x2a3   : > { %3208 = vst [vmem:[#allocation11 + $0x10] sm:$0xff] %v3200_v57  ;;  %v3204_v5 = vpack.c.bf16 %v3196_v3, %v3195_v1  ;;  %v3205_v6 = vpack.c.bf16 %v3197_v4, %v3197_v4 }
 0x2a4   : > { %3209 = vst [vmem:[#allocation11 + $0x18] sm:$0xf] %v3201_v55 }
 0x2a5   : > { %3210 = vst [vmem:[#allocation11 + $0x1c] sm:$0xff] %v3202_v47 }
 0x2a6   : > { %3211 = vst [vmem:[#allocation11 + $0x24] sm:$0xff] %v3203_v2 }
 0x2a7   : > { %3212 = vst [vmem:[#allocation11 + $0x2c] sm:$0xff] %v3204_v5 }
 0x2a8   : > { %3213 = vst [vmem:[#allocation11 + $0x34] sm:$0xf] %v3205_v6 }
 0x2a9 PF: > { %p5136_p4 = scmp.eq.s32.totalorder %s5544_s14, 1  ;;  %s3225_s8 = sshll.u32 %s6601_s4, 4  ;;  %s3226_s8 = int_to_ptr.hbm [resolvable:$true] %s3225_s8 }
 0x2aa   : > { %s5447_s9 = smov [#allocation11]   ;;  %s5448_s5 = smov 448  }
 0x2ab   : > { %s3223_s30 = sshll.u32 %s5447_s9, 4  ;;  %s5449_s0 = smov 28   ;;  %s3224_s30 = int_to_ptr.vmem [resolvable:$true] %s3223_s30 }
 0x2ac   : > { %5115 = dma.vmem_to_hbm [thread:$0]  (%p5136_p4), %s3224_s30, 896, %s3226_s8, [#allocation5], %s5448_s5, %s5448_s5, %s5449_s0  }
 0x2ad   : > { %5409 = dma.done.wait (%p5136_p4), [#allocation5], 896  }
 0x2ae   : > { %5411 = vsyncadd (%p5136_p4), [#allocation5], 4294966400 }
 0x2af PF: > { %s22_s20 = sadd.s32 1, %s5434_s20   ;;  %s6626_s14 = sld [smem:[#allocation17_spill]] }
 0x2b0   : > { %p19_p5 = scmp.ge.s32.totalorder %s22_s20, 4   ;;  %s6627_s1 = sld [smem:[#allocation16_spill]] }
 0x2b1   : > { %s6628_s15 = smov %s5418_s16  ;;  %s6629_s16 = smov %s5422_s17 }
 0x2b2   : > { %s6631_s18 = smov %s5430_s19  ;;  %21 = sbr.rel (!%p19_p5) target bundleno = 11 (0xb), region = 133 }
 0x2b5   : > { %s6630_s17 = smov %s6626_s14 }
 0x2b6   : > { %s6632_s19 = smov %s6627_s1 }
 0x2b7   :  { %3242 = vsyncpa [#allocation4], 1 }
 0x2b8   :  { %3244 = vsyncpa [#allocation4 + $0x1], 1 }
 0x2b9   :  { %3245 = vsyncpa [#allocation7], 1 }
 0x2ba   :  { %3247 = vsyncpa [#allocation7 + $0x1], 1 }
 0x2bb   :  { %3248 = vsyncpa [#allocation10], 1 }
 0x2bc   :  { %3250 = vsyncpa [#allocation10 + $0x1], 1 }
 0x2bd   :  { %3251 = vsyncpa [#allocation5], 1 }
 0x2be   :  { %3253 = vsyncpa [#allocation5 + $0x1], 1 }

</bundles_post_ra>
